<compile_context>
chip_gen: v5e
topology: v5e:2x2
jax: 0.10.0
libtpu: 0.0.40
codegen_flags: <defaults>
</compile_context>

<pallas_src>
import numpy as np
import jax
import jax.numpy as jnp
from jax.experimental import pallas as pl
from jax.experimental.pallas import tpu as pltpu

LANES = 128                       # vreg lane width; conv/fc outputs padded to this
VMEM_LIMIT = 32 * 1024 * 1024     # >> ~5 MB/step footprint; safe vs v7x's 64 MiB too


# ----------------------------- Pallas kernels ------------------------------

def _conv_pool_relu_kernel(x_ref, w_ref, b_ref, o_ref):
    """Fused conv(5x5, pad=2) + bias + 2x2 maxpool + ReLU.

    x_ref : [TM, 9*4C]      tap-packed space-to-depth activation (bf16):
                            column s*4C + (p*2+q)*C + c, row m = i*Wps + j
                            holds xpad[2(i+ai)+p, 2(j+bi)+q, c], s = ai*3+bi
    w_ref : [4, 9*4C, 128]  bf16 weight, one K-concatenated block per pool
                            offset d = dh*2+dw (out-of-range taps zeroed)
    b_ref : [1, 128]        f32 bias (zero padded)
    o_ref : [TM, 128]       bf16; relu(maxpool(conv)) at row m (padded rows /
                            columns / lanes are don't-care or exact zeros)
    """
    x = x_ref[...]
    acc = jnp.dot(x, w_ref[0], preferred_element_type=jnp.float32)
    for d in range(1, 4):
        acc = jnp.maximum(
            acc, jnp.dot(x, w_ref[d], preferred_element_type=jnp.float32))
    o_ref[...] = jnp.maximum(acc + b_ref[...], 0.0).astype(o_ref.dtype)


def _mlp_kernel(x_ref, w1_ref, b1_ref, w23_ref, b23_ref, o_ref):
    # fc1 + ReLU (drop2 identity) then the folded fc2·fc3 linear.
    h = jnp.dot(x_ref[...], w1_ref[...],
                preferred_element_type=jnp.float32) + b1_ref[...]
    h = jnp.maximum(h, 0.0).astype(jnp.bfloat16)
    o_ref[...] = (jnp.dot(h, w23_ref[...], preferred_element_type=jnp.float32)
                  + b23_ref[...])


# --------------------------- pallas_call wrappers ---------------------------

def _pick_bt(batch, rows_per_sample, target_rows):
    """Largest batch tile dividing `batch` whose row block is sublane-aligned
    (multiple of 8, or the full array) and does not exceed `target_rows`."""
    best = batch
    for bt in range(1, batch + 1):
        if batch % bt:
            continue
        rows = bt * rows_per_sample
        if bt != batch and rows % 8:
            continue
        if rows <= max(target_rows, rows_per_sample):
            best = bt
        else:
            break
    return best


def conv_pool_relu(x9, w9, bias, *, batch, rows_per_sample, target_rows, cost):
    mtot, k9 = x9.shape
    bt = _pick_bt(batch, rows_per_sample, target_rows)
    tm = bt * rows_per_sample
    return pl.pallas_call(
        _conv_pool_relu_kernel,
        out_shape=jax.ShapeDtypeStruct((mtot, LANES), jnp.bfloat16),
        grid=(mtot // tm,),
        in_specs=[
            pl.BlockSpec((tm, k9), lambda i: (i, 0)),
            # constant block index -> fetched once, stays VMEM-resident
            pl.BlockSpec((4, k9, LANES), lambda i: (0, 0, 0)),
            pl.BlockSpec((1, LANES), lambda i: (0, 0)),
        ],
        out_specs=pl.BlockSpec((tm, LANES), lambda i: (i, 0)),
        compiler_params=pltpu.CompilerParams(
            dimension_semantics=("parallel",),
            vmem_limit_bytes=VMEM_LIMIT,
        ),
        cost_estimate=cost,
    )(x9, w9, bias)


def mlp(x, w1, b1, w23, b23, *, batch, cost):
    mtot, k1 = x.shape
    bt = _pick_bt(batch, 1, 64)
    return pl.pallas_call(
        _mlp_kernel,
        out_shape=jax.ShapeDtypeStruct((mtot, LANES), jnp.float32),
        grid=(mtot // bt,),
        in_specs=[
            pl.BlockSpec((bt, k1), lambda i: (i, 0)),
            pl.BlockSpec((k1, LANES), lambda i: (0, 0)),
            pl.BlockSpec((1, LANES), lambda i: (0, 0)),
            pl.BlockSpec((LANES, LANES), lambda i: (0, 0)),
            pl.BlockSpec((1, LANES), lambda i: (0, 0)),
        ],
        out_specs=pl.BlockSpec((bt, LANES), lambda i: (i, 0)),
        compiler_params=pltpu.CompilerParams(
            dimension_semantics=("parallel",),
            vmem_limit_bytes=VMEM_LIMIT,
        ),
        cost_estimate=cost,
    )(x, w1, b1, w23, b23)


# ------------------------- host-side (XLA) packing --------------------------

def _stage1_pack(x_nhwc):
    """[B,28,28,1] -> tap-packed X9 [B*224, 36] bf16 (pad2, s2d(2), 9 taps)."""
    B = x_nhwc.shape[0]
    xp = jnp.pad(x_nhwc, ((0, 0), (2, 2), (2, 2), (0, 0)))            # [B,32,32,1]
    xs = xp.reshape(B, 16, 2, 16, 2, 1).transpose(0, 1, 3, 2, 4, 5)
    xs = xs.reshape(B, 256, 4)
    xs = jnp.pad(xs, ((0, 0), (0, 2), (0, 0)))                        # guard rows -> 258
    offs = [ai * 16 + bi for ai in range(3) for bi in range(3)]
    x9 = jnp.concatenate([xs[:, o:o + 224, :] for o in offs], axis=-1)  # [B,224,36]
    return x9.astype(jnp.bfloat16).reshape(B * 224, 36)


def _stage2_pack(h1):
    """[B,14,14,16] bf16 -> tap-packed X9 [B*64, 576] bf16 (row 63 = junk)."""
    B = h1.shape[0]
    xp = jnp.pad(h1, ((0, 0), (2, 2), (2, 2), (0, 0)))                # [B,18,18,16]
    xs = xp.reshape(B, 9, 2, 9, 2, 16).transpose(0, 1, 3, 2, 4, 5)
    xs = xs.reshape(B, 81, 64)
    xs = jnp.pad(xs, ((0, 0), (0, 2), (0, 0)))                        # guard rows -> 83
    offs = [ai * 9 + bi for ai in range(3) for bi in range(3)]
    x9 = jnp.concatenate([xs[:, o:o + 63, :] for o in offs], axis=-1)  # [B,63,576]
    x9 = jnp.pad(x9, ((0, 0), (0, 1), (0, 0)))                        # pad rows -> 64
    return x9.astype(jnp.bfloat16).reshape(B * 64, 576)


# ------------------------------ weight prep ---------------------------------

def _prep_conv_weight(w, b):
    """PyTorch conv weight [N, C, 5, 5] -> K-concatenated [4, 9*4C, 128] bf16
    blocks (one per pool offset d = dh*2+dw) + [1, 128] f32 bias.

    Row s*4C + (p*2+q)*C + c of block d holds w[n, c, 2ai+p-dh, 2bi+q-dw]
    (zero when the kernel index falls outside [0, 5)), s = ai*3+bi."""
    N, C, _, _ = w.shape
    wt = jnp.transpose(w, (2, 3, 1, 0))                               # [kh, kw, C, N]
    wt = jnp.pad(wt, ((1, 1), (1, 1), (0, 0), (0, LANES - N)))        # [7, 7, C, 128]
    d_ = np.arange(2).reshape(2, 1, 1)
    i_ = np.arange(3).reshape(1, 3, 1)
    p_ = np.arange(2).reshape(1, 1, 2)
    kidx = 2 * i_ + p_ - d_ + 1                                       # [2,3,2] in [0,6]
    KH = kidx[:, None, :, None, :, None]                              # [dh,1,ai,1,p,1]
    KW = kidx[None, :, None, :, None, :]                              # [1,dw,1,bi,1,q]
    blk = wt[KH, KW]                                                  # [2,2,3,3,2,2,C,128]
    wg = blk.reshape(4, 9 * 4 * C, LANES).astype(jnp.bfloat16)
    bg = jnp.pad(b, (0, LANES - N)).reshape(1, LANES).astype(jnp.float32)
    return wg, bg


def _prep_fc1_weight(w, b):
    """Fold the NCHW-flatten permutation, the garbage spatial columns (j=7,8),
    the junk row 63 and the channel padding (>=32) of the conv2 kernel output
    into fc1's weight: [8192, 128] bf16 matching the raw [B, 64*128] slab."""
    F2 = w.shape[0]
    wt = w.T.reshape(32, 7, 7, F2)                                    # [c, i, j, F2]
    wt = jnp.pad(wt, ((0, LANES - 32), (0, 0), (0, 2), (0, 0)))       # [128, 7, 9, F2]
    wt = jnp.transpose(wt, (1, 2, 0, 3)).reshape(7 * 9 * LANES, F2)   # [8064, F2]
    wt = jnp.pad(wt, ((0, LANES), (0, LANES - F2)))                   # [8192, 128]
    bg = jnp.pad(b, (0, LANES - F2)).reshape(1, LANES).astype(jnp.float32)
    return wt.astype(jnp.bfloat16), bg


def _prep_fc23_weight(w2, b2, w3, b3):
    """fc2 then fc3 with no nonlinearity between -> fold into one linear."""
    F2 = w2.shape[1]
    w23 = w2.T @ w3.T                                                 # [F2, 10]
    b23 = b2 @ w3.T + b3                                              # [10]
    w23 = jnp.pad(w23, ((0, LANES - F2), (0, LANES - 10)))
    b23 = jnp.pad(b23, (0, LANES - 10)).reshape(1, LANES)
    return w23.astype(jnp.bfloat16), b23.astype(jnp.float32)


# --------------------------------- forward ----------------------------------

def init_params(key, fc2_input_dim=64, fc3_input_dim=64):
    ks = jax.random.split(key, 10)
    scale = 0.1
    return {
        "conv1_w": jax.random.normal(ks[0], (16, 1, 5, 5), jnp.float32) * scale,
        "conv1_b": jax.random.normal(ks[1], (16,), jnp.float32) * scale,
        "conv2_w": jax.random.normal(ks[2], (32, 16, 5, 5), jnp.float32) * scale,
        "conv2_b": jax.random.normal(ks[3], (32,), jnp.float32) * scale,
        # PyTorch Linear weights are [out, in]
        "fc1_w": jax.random.normal(ks[4], (fc2_input_dim, 32 * 7 * 7), jnp.float32) * scale,
        "fc1_b": jax.random.normal(ks[5], (fc2_input_dim,), jnp.float32) * scale,
        "fc2_w": jax.random.normal(ks[6], (fc3_input_dim, fc2_input_dim), jnp.float32) * scale,
        "fc2_b": jax.random.normal(ks[7], (fc3_input_dim,), jnp.float32) * scale,
        "fc3_w": jax.random.normal(ks[8], (10, fc3_input_dim), jnp.float32) * scale,
        "fc3_b": jax.random.normal(ks[9], (10,), jnp.float32) * scale,
    }


def convnet_forward(x_nchw, p):
    B = x_nchw.shape[0]
    F2 = p["fc1_w"].shape[0]
    x = jnp.transpose(x_nchw, (0, 2, 3, 1)).astype(jnp.float32)       # NHWC [B,28,28,1]

    w1g, b1g = _prep_conv_weight(p["conv1_w"], p["conv1_b"])          # [4,36,128]
    w2g, b2g = _prep_conv_weight(p["conv2_w"], p["conv2_b"])          # [4,576,128]
    wf1, bf1 = _prep_fc1_weight(p["fc1_w"], p["fc1_b"])               # [8192,128]
    w23, b23 = _prep_fc23_weight(p["fc2_w"], p["fc2_b"], p["fc3_w"], p["fc3_b"])

    # advisory cost estimates on REAL (unpadded) dims
    cost1 = pl.CostEstimate(
        flops=2 * B * 28 * 28 * 25 * 1 * 16, transcendentals=0,
        bytes_accessed=B * 28 * 28 * 2 + 25 * 1 * 16 * 4 + B * 14 * 14 * 16 * 2)
    cost2 = pl.CostEstimate(
        flops=2 * B * 14 * 14 * 25 * 16 * 32, transcendentals=0,
        bytes_accessed=B * 14 * 14 * 16 * 2 + 25 * 16 * 32 * 4 + B * 7 * 7 * 32 * 2)
    cost3 = pl.CostEstimate(
        flops=2 * B * (1568 * F2 + F2 * 10), transcendentals=0,
        bytes_accessed=B * 1568 * 2 + (1568 * F2 + F2 * 10) * 2 + B * 10 * 4)

    # stage 1: conv1 + bias + maxpool2 + relu  (4 dots, K=36, bf16 out)
    x9_1 = _stage1_pack(x)                                            # [B*224, 36]
    o1 = conv_pool_relu(x9_1, w1g, b1g, batch=B, rows_per_sample=224,
                        target_rows=512, cost=cost1)                  # [B*224, 128] bf16
    h1 = o1.reshape(B, 14, 16, LANES)[:, :, :14, :16]                 # [B,14,14,16] bf16

    # stage 2: conv2 + bias + maxpool2 + relu  (4 dots, K=576, bf16 out)
    x9_2 = _stage2_pack(h1)                                           # [B*64, 576]
    o2 = conv_pool_relu(x9_2, w2g, b2g, batch=B, rows_per_sample=64,
                        target_rows=256, cost=cost2)                  # [B*64, 128] bf16

    # drop1: identity (eval). Flatten/permutation folded into fc1's weight.
    flat = o2.reshape(B, 64 * LANES)                                  # [B, 8192] bf16
    logits = mlp(flat, wf1, bf1, w23, b23, batch=B, cost=cost3)       # [B, 128] f32
    return logits[:, :10]


# ------------------------- pure-JAX reference check -------------------------

def _reference_forward(x_nchw, p):
    x = jnp.transpose(x_nchw, (0, 2, 3, 1))

    def conv(h, w, b):
        out = jax.lax.conv_general_dilated(
            h, jnp.transpose(w, (2, 3, 1, 0)), window_strides=(1, 1),
            padding=((2, 2), (2, 2)),
            dimension_numbers=("NHWC", "HWIO", "NHWC"))
        return out + b

    def pool_relu(h):
        B, H, W, C = h.shape
        h = h.reshape(B, H // 2, 2, W // 2, 2, C).max(axis=(2, 4))
        return jnp.maximum(h, 0.0)

    h = pool_relu(conv(x, p["conv1_w"], p["conv1_b"]))
    h = pool_relu(conv(h, p["conv2_w"], p["conv2_b"]))
    flat = jnp.transpose(h, (0, 3, 1, 2)).reshape(x.shape[0], -1)
    h = jnp.maximum(flat @ p["fc1_w"].T + p["fc1_b"], 0.0)
    h = h @ p["fc2_w"].T + p["fc2_b"]
    return h @ p["fc3_w"].T + p["fc3_b"]


# --------------------------------- main -------------------------------------

if __name__ == "__main__":
    key = jax.random.PRNGKey(0)
    k_param, k_x = jax.random.split(key)

    params = init_params(k_param)
    # MNIST-like input: batch=2, 1 channel, 28x28 (required by fc1 = 32*7*7).
    x = jax.random.normal(k_x, (2, 1, 28, 28), jnp.float32)

    fwd = jax.jit(convnet_forward)
    logits = fwd(x, params)
    jax.block_until_ready(logits)

    assert logits.shape == (2, 10), logits.shape
    assert logits.dtype == jnp.float32

    # loose sanity check vs pure-JAX reference (bf16 MXU operands -> small drift)
    ref = _reference_forward(x, params)
    err = float(jnp.max(jnp.abs(logits - ref)))
    tol = 0.1 + 0.05 * float(jnp.max(jnp.abs(ref)))
    assert err < tol, (err, tol)

    print("KERNEL_OK")
</pallas_src>

<mosaic_0001>
module attributes {stable_mosaic.version = 11 : i64} {
  func.func @_conv_pool_relu_kernel(%arg0: i32, %arg1: memref<448x36xbf16, #tpu.memory_space<vmem>>, %arg2: memref<4x36x128xbf16, #tpu.memory_space<vmem>>, %arg3: memref<1x128xf32, #tpu.memory_space<vmem>>, %arg4: memref<448x128xbf16, #tpu.memory_space<vmem>>) attributes {dimension_semantics = [#tpu.dimension_semantics<parallel>], iteration_bounds = array<i64: 1>, scalar_prefetch = 0 : i64, scratch_operands = 0 : i64, tpu.core_type = #tpu.core_type<tc>, window_params = [{transform_indices = @transform_0, window_bounds = array<i64: 448, 36>}, {pipeline_mode = #tpu.pipeline_mode<synchronous>, transform_indices = @transform_1, window_bounds = array<i64: 4, 36, 128>}, {pipeline_mode = #tpu.pipeline_mode<synchronous>, transform_indices = @transform_2, window_bounds = array<i64: 1, 128>}, {transform_indices = @transform_3, window_bounds = array<i64: 448, 128>}]} {
    %c0 = arith.constant 0 : index
    %c0_0 = arith.constant 0 : index
    %0 = vector.load %arg1[%c0, %c0_0] : memref<448x36xbf16, #tpu.memory_space<vmem>>, vector<448x36xbf16>
    %c0_1 = arith.constant 0 : index
    %c0_2 = arith.constant 0 : index
    %c0_3 = arith.constant 0 : index
    %1 = vector.load %arg2[%c0_1, %c0_2, %c0_3] : memref<4x36x128xbf16, #tpu.memory_space<vmem>>, vector<1x36x128xbf16>
    %2 = vector.shape_cast %1 : vector<1x36x128xbf16> to vector<36x128xbf16>
    %cst = arith.constant dense<0.000000e+00> : vector<448x128xf32>
    %3 = tpu.matmul %0, %2, %cst {dimension_numbers = #tpu.dot_dimension_numbers<[1], [0], [0], [1], [0, 0, 1, 1], [], []>} : vector<448x36xbf16>, vector<36x128xbf16>, vector<448x128xf32> -> vector<448x128xf32>
    %c1 = arith.constant 1 : index
    %c0_4 = arith.constant 0 : index
    %c0_5 = arith.constant 0 : index
    %4 = vector.load %arg2[%c1, %c0_4, %c0_5] : memref<4x36x128xbf16, #tpu.memory_space<vmem>>, vector<1x36x128xbf16>
    %5 = vector.shape_cast %4 : vector<1x36x128xbf16> to vector<36x128xbf16>
    %cst_6 = arith.constant dense<0.000000e+00> : vector<448x128xf32>
    %6 = tpu.matmul %0, %5, %cst_6 {dimension_numbers = #tpu.dot_dimension_numbers<[1], [0], [0], [1], [0, 0, 1, 1], [], []>} : vector<448x36xbf16>, vector<36x128xbf16>, vector<448x128xf32> -> vector<448x128xf32>
    %7 = arith.maximumf %3, %6 : vector<448x128xf32>
    %c2 = arith.constant 2 : index
    %c0_7 = arith.constant 0 : index
    %c0_8 = arith.constant 0 : index
    %8 = vector.load %arg2[%c2, %c0_7, %c0_8] : memref<4x36x128xbf16, #tpu.memory_space<vmem>>, vector<1x36x128xbf16>
    %9 = vector.shape_cast %8 : vector<1x36x128xbf16> to vector<36x128xbf16>
    %cst_9 = arith.constant dense<0.000000e+00> : vector<448x128xf32>
    %10 = tpu.matmul %0, %9, %cst_9 {dimension_numbers = #tpu.dot_dimension_numbers<[1], [0], [0], [1], [0, 0, 1, 1], [], []>} : vector<448x36xbf16>, vector<36x128xbf16>, vector<448x128xf32> -> vector<448x128xf32>
    %11 = arith.maximumf %7, %10 : vector<448x128xf32>
    %c3 = arith.constant 3 : index
    %c0_10 = arith.constant 0 : index
    %c0_11 = arith.constant 0 : index
    %12 = vector.load %arg2[%c3, %c0_10, %c0_11] : memref<4x36x128xbf16, #tpu.memory_space<vmem>>, vector<1x36x128xbf16>
    %13 = vector.shape_cast %12 : vector<1x36x128xbf16> to vector<36x128xbf16>
    %cst_12 = arith.constant dense<0.000000e+00> : vector<448x128xf32>
    %14 = tpu.matmul %0, %13, %cst_12 {dimension_numbers = #tpu.dot_dimension_numbers<[1], [0], [0], [1], [0, 0, 1, 1], [], []>} : vector<448x36xbf16>, vector<36x128xbf16>, vector<448x128xf32> -> vector<448x128xf32>
    %15 = arith.maximumf %11, %14 : vector<448x128xf32>
    %c0_13 = arith.constant 0 : index
    %c0_14 = arith.constant 0 : index
    %16 = vector.load %arg3[%c0_13, %c0_14] : memref<1x128xf32, #tpu.memory_space<vmem>>, vector<1x128xf32>
    %17 = vector.broadcast %16 : vector<1x128xf32> to vector<448x128xf32>
    %18 = arith.addf %15, %17 : vector<448x128xf32>
    %cst_15 = arith.constant 0.000000e+00 : f32
    %19 = vector.broadcast %cst_15 : f32 to vector<448x128xf32>
    %20 = arith.maximumf %18, %19 : vector<448x128xf32>
    %21 = arith.truncf %20 : vector<448x128xf32> to vector<448x128xbf16>
    %c0_16 = arith.constant 0 : index
    %c0_17 = arith.constant 0 : index
    %22 = vector.load %arg4[%c0_16, %c0_17] : memref<448x128xbf16, #tpu.memory_space<vmem>>, vector<448x128xbf16>
    tpu.vector_store %arg4[%c0_16, %c0_17], %21 {strides = array<i32>} : memref<448x128xbf16, #tpu.memory_space<vmem>>, vector<448x128xbf16>,
    return
  }
  func.func @transform_0(%arg0: i32) -> (i32, i32) {
    %c0_i32 = arith.constant 0 : i32
    %c0_i32_0 = arith.constant 0 : i32
    return %arg0, %c0_i32 : i32, i32
  }
  func.func @transform_1(%arg0: i32) -> (i32, i32, i32) {
    %c0_i32 = arith.constant 0 : i32
    %c0_i32_0 = arith.constant 0 : i32
    %c0_i32_1 = arith.constant 0 : i32
    %c0_i32_2 = arith.constant 0 : i32
    return %c0_i32, %c0_i32_0, %c0_i32_1 : i32, i32, i32
  }
  func.func @transform_2(%arg0: i32) -> (i32, i32) {
    %c0_i32 = arith.constant 0 : i32
    %c0_i32_0 = arith.constant 0 : i32
    %c0_i32_1 = arith.constant 0 : i32
    return %c0_i32, %c0_i32_0 : i32, i32
  }
  func.func @transform_3(%arg0: i32) -> (i32, i32) {
    %c0_i32 = arith.constant 0 : i32
    %c0_i32_0 = arith.constant 0 : i32
    return %arg0, %c0_i32 : i32, i32
  }
}

module attributes {stable_mosaic.version = 11 : i64} {
  func.func @_conv_pool_relu_kernel(%arg0: i32, %arg1: memref<128x576xbf16, #tpu.memory_space<vmem>>, %arg2: memref<4x576x128xbf16, #tpu.memory_space<vmem>>, %arg3: memref<1x128xf32, #tpu.memory_space<vmem>>, %arg4: memref<128x128xbf16, #tpu.memory_space<vmem>>) attributes {dimension_semantics = [#tpu.dimension_semantics<parallel>], iteration_bounds = array<i64: 1>, scalar_prefetch = 0 : i64, scratch_operands = 0 : i64, tpu.core_type = #tpu.core_type<tc>, window_params = [{transform_indices = @transform_0, window_bounds = array<i64: 128, 576>}, {pipeline_mode = #tpu.pipeline_mode<synchronous>, transform_indices = @transform_1, window_bounds = array<i64: 4, 576, 128>}, {pipeline_mode = #tpu.pipeline_mode<synchronous>, transform_indices = @transform_2, window_bounds = array<i64: 1, 128>}, {transform_indices = @transform_3, window_bounds = array<i64: 128, 128>}]} {
    %c0 = arith.constant 0 : index
    %c0_0 = arith.constant 0 : index
    %0 = vector.load %arg1[%c0, %c0_0] : memref<128x576xbf16, #tpu.memory_space<vmem>>, vector<128x576xbf16>
    %c0_1 = arith.constant 0 : index
    %c0_2 = arith.constant 0 : index
    %c0_3 = arith.constant 0 : index
    %1 = vector.load %arg2[%c0_1, %c0_2, %c0_3] : memref<4x576x128xbf16, #tpu.memory_space<vmem>>, vector<1x576x128xbf16>
    %2 = vector.shape_cast %1 : vector<1x576x128xbf16> to vector<576x128xbf16>
    %cst = arith.constant dense<0.000000e+00> : vector<128x128xf32>
    %3 = tpu.matmul %0, %2, %cst {dimension_numbers = #tpu.dot_dimension_numbers<[1], [0], [0], [1], [0, 0, 1, 1], [], []>} : vector<128x576xbf16>, vector<576x128xbf16>, vector<128x128xf32> -> vector<128x128xf32>
    %c1 = arith.constant 1 : index
    %c0_4 = arith.constant 0 : index
    %c0_5 = arith.constant 0 : index
    %4 = vector.load %arg2[%c1, %c0_4, %c0_5] : memref<4x576x128xbf16, #tpu.memory_space<vmem>>, vector<1x576x128xbf16>
    %5 = vector.shape_cast %4 : vector<1x576x128xbf16> to vector<576x128xbf16>
    %cst_6 = arith.constant dense<0.000000e+00> : vector<128x128xf32>
    %6 = tpu.matmul %0, %5, %cst_6 {dimension_numbers = #tpu.dot_dimension_numbers<[1], [0], [0], [1], [0, 0, 1, 1], [], []>} : vector<128x576xbf16>, vector<576x128xbf16>, vector<128x128xf32> -> vector<128x128xf32>
    %7 = arith.maximumf %3, %6 : vector<128x128xf32>
    %c2 = arith.constant 2 : index
    %c0_7 = arith.constant 0 : index
    %c0_8 = arith.constant 0 : index
    %8 = vector.load %arg2[%c2, %c0_7, %c0_8] : memref<4x576x128xbf16, #tpu.memory_space<vmem>>, vector<1x576x128xbf16>
    %9 = vector.shape_cast %8 : vector<1x576x128xbf16> to vector<576x128xbf16>
    %cst_9 = arith.constant dense<0.000000e+00> : vector<128x128xf32>
    %10 = tpu.matmul %0, %9, %cst_9 {dimension_numbers = #tpu.dot_dimension_numbers<[1], [0], [0], [1], [0, 0, 1, 1], [], []>} : vector<128x576xbf16>, vector<576x128xbf16>, vector<128x128xf32> -> vector<128x128xf32>
    %11 = arith.maximumf %7, %10 : vector<128x128xf32>
    %c3 = arith.constant 3 : index
    %c0_10 = arith.constant 0 : index
    %c0_11 = arith.constant 0 : index
    %12 = vector.load %arg2[%c3, %c0_10, %c0_11] : memref<4x576x128xbf16, #tpu.memory_space<vmem>>, vector<1x576x128xbf16>
    %13 = vector.shape_cast %12 : vector<1x576x128xbf16> to vector<576x128xbf16>
    %cst_12 = arith.constant dense<0.000000e+00> : vector<128x128xf32>
    %14 = tpu.matmul %0, %13, %cst_12 {dimension_numbers = #tpu.dot_dimension_numbers<[1], [0], [0], [1], [0, 0, 1, 1], [], []>} : vector<128x576xbf16>, vector<576x128xbf16>, vector<128x128xf32> -> vector<128x128xf32>
    %15 = arith.maximumf %11, %14 : vector<128x128xf32>
    %c0_13 = arith.constant 0 : index
    %c0_14 = arith.constant 0 : index
    %16 = vector.load %arg3[%c0_13, %c0_14] : memref<1x128xf32, #tpu.memory_space<vmem>>, vector<1x128xf32>
    %17 = vector.broadcast %16 : vector<1x128xf32> to vector<128x128xf32>
    %18 = arith.addf %15, %17 : vector<128x128xf32>
    %cst_15 = arith.constant 0.000000e+00 : f32
    %19 = vector.broadcast %cst_15 : f32 to vector<128x128xf32>
    %20 = arith.maximumf %18, %19 : vector<128x128xf32>
    %21 = arith.truncf %20 : vector<128x128xf32> to vector<128x128xbf16>
    %c0_16 = arith.constant 0 : index
    %c0_17 = arith.constant 0 : index
    %22 = vector.load %arg4[%c0_16, %c0_17] : memref<128x128xbf16, #tpu.memory_space<vmem>>, vector<128x128xbf16>
    tpu.vector_store %arg4[%c0_16, %c0_17], %21 {strides = array<i32>} : memref<128x128xbf16, #tpu.memory_space<vmem>>, vector<128x128xbf16>,
    return
  }
  func.func @transform_0(%arg0: i32) -> (i32, i32) {
    %c0_i32 = arith.constant 0 : i32
    %c0_i32_0 = arith.constant 0 : i32
    return %arg0, %c0_i32 : i32, i32
  }
  func.func @transform_1(%arg0: i32) -> (i32, i32, i32) {
    %c0_i32 = arith.constant 0 : i32
    %c0_i32_0 = arith.constant 0 : i32
    %c0_i32_1 = arith.constant 0 : i32
    %c0_i32_2 = arith.constant 0 : i32
    return %c0_i32, %c0_i32_0, %c0_i32_1 : i32, i32, i32
  }
  func.func @transform_2(%arg0: i32) -> (i32, i32) {
    %c0_i32 = arith.constant 0 : i32
    %c0_i32_0 = arith.constant 0 : i32
    %c0_i32_1 = arith.constant 0 : i32
    return %c0_i32, %c0_i32_0 : i32, i32
  }
  func.func @transform_3(%arg0: i32) -> (i32, i32) {
    %c0_i32 = arith.constant 0 : i32
    %c0_i32_0 = arith.constant 0 : i32
    return %arg0, %c0_i32 : i32, i32
  }
}

module attributes {stable_mosaic.version = 11 : i64} {
  func.func @_mlp_kernel(%arg0: i32, %arg1: memref<2x8192xbf16, #tpu.memory_space<vmem>>, %arg2: memref<8192x128xbf16, #tpu.memory_space<vmem>>, %arg3: memref<1x128xf32, #tpu.memory_space<vmem>>, %arg4: memref<128x128xbf16, #tpu.memory_space<vmem>>, %arg5: memref<1x128xf32, #tpu.memory_space<vmem>>, %arg6: memref<2x128xf32, #tpu.memory_space<vmem>>) attributes {dimension_semantics = [#tpu.dimension_semantics<parallel>], iteration_bounds = array<i64: 1>, scalar_prefetch = 0 : i64, scratch_operands = 0 : i64, tpu.core_type = #tpu.core_type<tc>, window_params = [{transform_indices = @transform_0, window_bounds = array<i64: 2, 8192>}, {pipeline_mode = #tpu.pipeline_mode<synchronous>, transform_indices = @transform_1, window_bounds = array<i64: 8192, 128>}, {pipeline_mode = #tpu.pipeline_mode<synchronous>, transform_indices = @transform_2, window_bounds = array<i64: 1, 128>}, {pipeline_mode = #tpu.pipeline_mode<synchronous>, transform_indices = @transform_3, window_bounds = array<i64: 128, 128>}, {pipeline_mode = #tpu.pipeline_mode<synchronous>, transform_indices = @transform_4, window_bounds = array<i64: 1, 128>}, {transform_indices = @transform_5, window_bounds = array<i64: 2, 128>}]} {
    %c0 = arith.constant 0 : index
    %c0_0 = arith.constant 0 : index
    %0 = vector.load %arg1[%c0, %c0_0] : memref<2x8192xbf16, #tpu.memory_space<vmem>>, vector<2x8192xbf16>
    %c0_1 = arith.constant 0 : index
    %c0_2 = arith.constant 0 : index
    %1 = vector.load %arg2[%c0_1, %c0_2] : memref<8192x128xbf16, #tpu.memory_space<vmem>>, vector<8192x128xbf16>
    %cst = arith.constant dense<0.000000e+00> : vector<2x128xf32>
    %2 = tpu.matmul %0, %1, %cst {dimension_numbers = #tpu.dot_dimension_numbers<[1], [0], [0], [1], [0, 0, 1, 1], [], []>} : vector<2x8192xbf16>, vector<8192x128xbf16>, vector<2x128xf32> -> vector<2x128xf32>
    %c0_3 = arith.constant 0 : index
    %c0_4 = arith.constant 0 : index
    %3 = vector.load %arg3[%c0_3, %c0_4] : memref<1x128xf32, #tpu.memory_space<vmem>>, vector<1x128xf32>
    %4 = vector.broadcast %3 : vector<1x128xf32> to vector<2x128xf32>
    %5 = arith.addf %2, %4 : vector<2x128xf32>
    %cst_5 = arith.constant 0.000000e+00 : f32
    %6 = vector.broadcast %cst_5 : f32 to vector<2x128xf32>
    %7 = arith.maximumf %5, %6 : vector<2x128xf32>
    %8 = arith.truncf %7 : vector<2x128xf32> to vector<2x128xbf16>
    %c0_6 = arith.constant 0 : index
    %c0_7 = arith.constant 0 : index
    %9 = vector.load %arg4[%c0_6, %c0_7] : memref<128x128xbf16, #tpu.memory_space<vmem>>, vector<128x128xbf16>
    %cst_8 = arith.constant dense<0.000000e+00> : vector<2x128xf32>
    %10 = tpu.matmul %8, %9, %cst_8 {dimension_numbers = #tpu.dot_dimension_numbers<[1], [0], [0], [1], [0, 0, 1, 1], [], []>} : vector<2x128xbf16>, vector<128x128xbf16>, vector<2x128xf32> -> vector<2x128xf32>
    %c0_9 = arith.constant 0 : index
    %c0_10 = arith.constant 0 : index
    %11 = vector.load %arg5[%c0_9, %c0_10] : memref<1x128xf32, #tpu.memory_space<vmem>>, vector<1x128xf32>
    %12 = vector.broadcast %11 : vector<1x128xf32> to vector<2x128xf32>
    %13 = arith.addf %10, %12 : vector<2x128xf32>
    %c0_11 = arith.constant 0 : index
    %c0_12 = arith.constant 0 : index
    %14 = vector.load %arg6[%c0_11, %c0_12] : memref<2x128xf32, #tpu.memory_space<vmem>>, vector<2x128xf32>
    tpu.vector_store %arg6[%c0_11, %c0_12], %13 {strides = array<i32>} : memref<2x128xf32, #tpu.memory_space<vmem>>, vector<2x128xf32>,
    return
  }
  func.func @transform_0(%arg0: i32) -> (i32, i32) {
    %c0_i32 = arith.constant 0 : i32
    %c0_i32_0 = arith.constant 0 : i32
    return %arg0, %c0_i32 : i32, i32
  }
  func.func @transform_1(%arg0: i32) -> (i32, i32) {
    %c0_i32 = arith.constant 0 : i32
    %c0_i32_0 = arith.constant 0 : i32
    %c0_i32_1 = arith.constant 0 : i32
    return %c0_i32, %c0_i32_0 : i32, i32
  }
  func.func @transform_2(%arg0: i32) -> (i32, i32) {
    %c0_i32 = arith.constant 0 : i32
    %c0_i32_0 = arith.constant 0 : i32
    %c0_i32_1 = arith.constant 0 : i32
    return %c0_i32, %c0_i32_0 : i32, i32
  }
  func.func @transform_3(%arg0: i32) -> (i32, i32) {
    %c0_i32 = arith.constant 0 : i32
    %c0_i32_0 = arith.constant 0 : i32
    %c0_i32_1 = arith.constant 0 : i32
    return %c0_i32, %c0_i32_0 : i32, i32
  }
  func.func @transform_4(%arg0: i32) -> (i32, i32) {
    %c0_i32 = arith.constant 0 : i32
    %c0_i32_0 = arith.constant 0 : i32
    %c0_i32_1 = arith.constant 0 : i32
    return %c0_i32, %c0_i32_0 : i32, i32
  }
  func.func @transform_5(%arg0: i32) -> (i32, i32) {
    %c0_i32 = arith.constant 0 : i32
    %c0_i32_0 = arith.constant 0 : i32
    return %arg0, %c0_i32 : i32, i32
  }
}

</mosaic_0001>

<bundles_post_ra>
// kernel: convnet_forward.3
= control target key start
LH: loop header
LB: loop body
LE: loop exit
PB: predicated region body
PF: predicated region fallthrough
CT: control target
= control target key end

     0   :  { %vm316_vm0 = vcmask 1041408   ;;  %vm231_vm1 = vcmask 293888   ;;  %s2266_s1 = inlined_call_operand.vmem [shape: bf16[4,36,128], index: 1, kind: input, shape index: {}]   ;;  %s2267_s0 = inlined_call_operand.vmem [shape: bf16[448,36], index: 0, kind: input, shape index: {}]   ;;  %s2268_s2 = inlined_call_operand.vmem [shape: f32[1,128], index: 2, kind: input, shape index: {}]   ;;  %s2269_s3 = inlined_call_operand.vmem [shape: bf16[448,128], index: 3, kind: output, shape index: {}]  }
   0x1   :  { %v75_v0 = vld [vmem:[%s2266_s1 + $0x10] sm:$0x3]  ;;  %v1540_v1 = vld [vmem:[%s2266_s1 + $0x24] sm:$0x3]  ;;  %v1581_v2 = vld [vmem:[%s2266_s1 + $0x38] sm:$0x3] }
   0x2   :  { %v225_v3 = vunpack.c.l.b16 %v75_v0  ;;  %v484_v4 = vunpack.c.l.b16 %v1540_v1  ;;  %v713_v5 = vunpack.c.l.b16 %v1581_v2  ;;  %v1622_v6 = vld [vmem:[%s2266_s1 + $0x4c] sm:$0x3]  ;;  %v1690_v17 = vld [vmem:[%s2266_s1 + $0x1c] sm:$0xff]  ;;  %v1692_v18 = vld [vmem:[%s2266_s1 + $0x30] sm:$0xff] }
   0x3   :  { %v942_v7 = vunpack.c.l.b16 %v1622_v6  ;;  %v1688_v16 = vld [vmem:[%s2266_s1 + $0x8] sm:$0xff]  ;;  %v1687_v20 = vld [vmem:[%s2266_s1] sm:$0xff]  ;;  %v1689_v21 = vld [vmem:[%s2266_s1 + $0x14] sm:$0xff] }
   0x4   :  { %v228_v8 = vpack.c.b16 %v225_v3, %v225_v3  ;;  %v487_v9 = vpack.c.b16 %v484_v4, %v484_v4  ;;  %v716_v10 = vpack.c.b16 %v713_v5, %v713_v5  ;;  %v1694_v19 = vld [vmem:[%s2266_s1 + $0x44] sm:$0xff]  ;;  %v1693_v23 = vld [vmem:[%s2266_s1 + $0x3c] sm:$0xff]  ;;  %v1661_v26 = vld [vmem:[%s2267_s0 + $0x10] sm:$0xff] }
   0x5   :  { %v945_v11 = vpack.c.b16 %v942_v7, %v942_v7  ;;  %v1691_v22 = vld [vmem:[%s2266_s1 + $0x28] sm:$0xff]  ;;  %v1659_v24 = vld [vmem:[%s2267_s0] sm:$0xff]  ;;  %v1662_v27 = vld [vmem:[%s2267_s0 + $0x18] sm:$0xff] }
   0x6   :  { %v318_v12 = vsel %vm316_vm0, %v228_v8, 0  ;;  %v491_v13 = vsel %vm316_vm0, %v487_v9, 0  ;;  %v720_v14 = vsel %vm316_vm0, %v716_v10, 0  ;;  %v1660_v25 = vld [vmem:[%s2267_s0 + $0x8] sm:$0xff]  ;;  %v1663_v28 = vld [vmem:[%s2267_s0 + $0x20] sm:$0xff]  ;;  %v1665_v30 = vld [vmem:[%s2267_s0 + $0x30] sm:$0xff] }
   0x7   :  { %325 = vmatpush.bf16.msra.mxu0 %v318_v12  ;;  %498 = vmatpush.bf16.msra.mxu1 %v491_v13  ;;  %v949_v15 = vsel %vm316_vm0, %v945_v11, 0  ;;  %v1664_v29 = vld [vmem:[%s2267_s0 + $0x28] sm:$0xff]  ;;  %v1666_v31 = vld [vmem:[%s2267_s0 + $0x38] sm:$0xff]  ;;  %v1667_v32 = vld [vmem:[%s2267_s0 + $0x40] sm:$0xff] }
   0x8   :  { %727 = vmatpush.bf16.msra.mxu2 %v720_v14  ;;  %956 = vmatpush.bf16.msra.mxu3 %v949_v15  ;;  %v1986_v42 = vld [vmem:[%s2268_s2] ss:$0 sm:$0xff]  ;;  %v1668_v46 = vld [vmem:[%s2267_s0 + $0x48] sm:$0xff]  ;;  %v1669_v2 = vld [vmem:[%s2267_s0 + $0x50] sm:$0xff] }
   0xb   :  { %326 = vmatpush.bf16.msra.mxu0 %v1688_v16  ;;  %499 = vmatpush.bf16.msra.mxu1 %v1690_v17 }
   0xc   :  { %728 = vmatpush.bf16.msra.mxu2 %v1692_v18  ;;  %957 = vmatpush.bf16.msra.mxu3 %v1694_v19 }
   0xf   :  { %327 = vmatpush.bf16.msra.mxu0 %v1687_v20  ;;  %500 = vmatpush.bf16.msra.mxu1 %v1689_v21 }
  0x10   :  { %729 = vmatpush.bf16.msra.mxu2 %v1691_v22  ;;  %958 = vmatpush.bf16.msra.mxu3 %v1693_v23  ;;  %v1670_v22 = vld [vmem:[%s2267_s0 + $0x58] sm:$0xff] }
  0x12   :  { %1508 = vmatmul.msk.bf16.vlgmr.msra.gmra.mxu0 %vm231_vm1, %v1659_v24  ;;  %1549 = vmatmul.msk.bf16.vlgmr.msra.gmra.mxu1 %vm231_vm1, %v1659_v24 }
  0x13   :  { %1590 = vmatmul.msk.bf16.vlgmr.msra.gmra.mxu2 %vm231_vm1, %v1659_v24  ;;  %1631 = vmatmul.msk.bf16.vlgmr.msra.gmra.mxu3 %vm231_vm1, %v1659_v24 }
  0x22   :  { %1509 = vmatmul.msk.bf16.gmra.mxu0 %vm231_vm1, %v1660_v25  ;;  %1550 = vmatmul.msk.bf16.gmra.mxu1 %vm231_vm1, %v1660_v25 }
  0x23   :  { %1591 = vmatmul.msk.bf16.gmra.mxu2 %vm231_vm1, %v1660_v25  ;;  %1632 = vmatmul.msk.bf16.gmra.mxu3 %vm231_vm1, %v1660_v25 }
  0x32   :  { %1510 = vmatmul.msk.bf16.gmra.mxu0 %vm231_vm1, %v1661_v26  ;;  %1551 = vmatmul.msk.bf16.gmra.mxu1 %vm231_vm1, %v1661_v26 }
  0x33   :  { %1592 = vmatmul.msk.bf16.gmra.mxu2 %vm231_vm1, %v1661_v26  ;;  %1633 = vmatmul.msk.bf16.gmra.mxu3 %vm231_vm1, %v1661_v26 }
  0x42   :  { %1511 = vmatmul.msk.bf16.gmra.mxu0 %vm231_vm1, %v1662_v27  ;;  %1552 = vmatmul.msk.bf16.gmra.mxu1 %vm231_vm1, %v1662_v27 }
  0x43   :  { %1593 = vmatmul.msk.bf16.gmra.mxu2 %vm231_vm1, %v1662_v27  ;;  %1634 = vmatmul.msk.bf16.gmra.mxu3 %vm231_vm1, %v1662_v27 }
  0x52   :  { %1512 = vmatmul.msk.bf16.gmra.mxu0 %vm231_vm1, %v1663_v28  ;;  %1553 = vmatmul.msk.bf16.gmra.mxu1 %vm231_vm1, %v1663_v28 }
  0x53   :  { %1594 = vmatmul.msk.bf16.gmra.mxu2 %vm231_vm1, %v1663_v28  ;;  %1635 = vmatmul.msk.bf16.gmra.mxu3 %vm231_vm1, %v1663_v28 }
  0x62   :  { %1513 = vmatmul.msk.bf16.gmra.mxu0 %vm231_vm1, %v1664_v29  ;;  %1554 = vmatmul.msk.bf16.gmra.mxu1 %vm231_vm1, %v1664_v29 }
  0x63   :  { %1595 = vmatmul.msk.bf16.gmra.mxu2 %vm231_vm1, %v1664_v29  ;;  %1636 = vmatmul.msk.bf16.gmra.mxu3 %vm231_vm1, %v1664_v29 }
  0x72   :  { %1514 = vmatmul.msk.bf16.gmra.mxu0 %vm231_vm1, %v1665_v30  ;;  %1555 = vmatmul.msk.bf16.gmra.mxu1 %vm231_vm1, %v1665_v30 }
  0x73   :  { %1596 = vmatmul.msk.bf16.gmra.mxu2 %vm231_vm1, %v1665_v30  ;;  %1637 = vmatmul.msk.bf16.gmra.mxu3 %vm231_vm1, %v1665_v30 }
  0x82   :  { %1515 = vmatmul.msk.bf16.gmra.mxu0 %vm231_vm1, %v1666_v31  ;;  %1556 = vmatmul.msk.bf16.gmra.mxu1 %vm231_vm1, %v1666_v31 }
  0x83   :  { %1597 = vmatmul.msk.bf16.gmra.mxu2 %vm231_vm1, %v1666_v31  ;;  %1638 = vmatmul.msk.bf16.gmra.mxu3 %vm231_vm1, %v1666_v31 }
  0x8f   :  { %v329_v33 = vpop.f32.mrf.mxu0  ;;  %v502_v34 = vpop.f32.mrf.mxu1 }
  0x90   :  { %v642_v35 = vmax.f32 %v329_v33, %v502_v34 }
  0x92   :  { %1516 = vmatmul.msk.bf16.gmra.mxu0 %vm231_vm1, %v1667_v32  ;;  %1557 = vmatmul.msk.bf16.gmra.mxu1 %vm231_vm1, %v1667_v32 }
  0x93   :  { %1598 = vmatmul.msk.bf16.gmra.mxu2 %vm231_vm1, %v1667_v32  ;;  %1639 = vmatmul.msk.bf16.gmra.mxu3 %vm231_vm1, %v1667_v32 }
  0x96   :  { %v731_v36 = vpop.f32.mrf.mxu2  ;;  %v960_v37 = vpop.f32.mrf.mxu3 }
  0x97   :  { %v331_v38 = vpop.f32.mrf.mxu0  ;;  %v504_v39 = vpop.f32.mrf.mxu1  ;;  %v871_v40 = vmax.f32 %v642_v35, %v731_v36 }
  0x98   :  { %v643_v43 = vmax.f32 %v331_v38, %v504_v39 }
  0x99   :  { %v1100_v41 = vmax.f32 %v871_v40, %v960_v37 }
  0x9b   :  { %v1160_v50 = vadd.f32 %v1986_v42, %v1100_v41 }
  0x9d   :  { %v1216_v53 = vmax.f32 %v1160_v50, 0.0 }
  0x9e   :  { %v733_v44 = vpop.f32.mrf.mxu2  ;;  %v962_v45 = vpop.f32.mrf.mxu3 }
  0x9f   :  { %v872_v47 = vmax.f32 %v643_v43, %v733_v44  ;;  %v334_v48 = vpop.f32.mrf.mxu0  ;;  %v507_v49 = vpop.f32.mrf.mxu1  ;;  %v1671_v43 = vld [vmem:[%s2267_s0 + $0x60] sm:$0xff] }
  0xa0   :  { %v644_v55 = vmax.f32 %v334_v48, %v507_v49 }
  0xa1   :  { %v1101_v51 = vmax.f32 %v872_v47, %v962_v45 }
  0xa2   :  { %1517 = vmatmul.msk.bf16.gmra.mxu0 %vm231_vm1, %v1668_v46  ;;  %1558 = vmatmul.msk.bf16.gmra.mxu1 %vm231_vm1, %v1668_v46 }
  0xa3   :  { %v1161_v52 = vadd.f32 %v1986_v42, %v1101_v51  ;;  %1599 = vmatmul.msk.bf16.gmra.mxu2 %vm231_vm1, %v1668_v46  ;;  %1640 = vmatmul.msk.bf16.gmra.mxu3 %vm231_vm1, %v1668_v46 }
  0xa5   :  { %v1217_v54 = vmax.f32 %v1161_v52, 0.0 }
  0xa6   :  { %v736_v56 = vpop.f32.mrf.mxu2  ;;  %v965_v57 = vpop.f32.mrf.mxu3 }
  0xa7   :  { %v1698_v58 = vpack.c.bf16 %v1217_v54, %v1216_v53  ;;  %v336_v59 = vpop.f32.mrf.mxu0  ;;  %v509_v60 = vpop.f32.mrf.mxu1  ;;  %v873_v61 = vmax.f32 %v644_v55, %v736_v56 }
  0xa8   :  { %v645_v63 = vmax.f32 %v336_v59, %v509_v60 }
  0xa9   :  { %1699 = vst [vmem:[%s2269_s3] sm:$0xff] %v1698_v58   ;;  %v1102_v62 = vmax.f32 %v873_v61, %v965_v57 }
  0xab   :  { %v1162_v6 = vadd.f32 %v1986_v42, %v1102_v62 }
  0xad   :  { %v1218_v9 = vmax.f32 %v1162_v6, 0.0 }
  0xae   :  { %v738_v0 = vpop.f32.mrf.mxu2  ;;  %v967_v1 = vpop.f32.mrf.mxu3 }
  0xaf   :  { %v874_v3 = vmax.f32 %v645_v63, %v738_v0  ;;  %v339_v4 = vpop.f32.mrf.mxu0  ;;  %v512_v5 = vpop.f32.mrf.mxu1  ;;  %v1672_v63 = vld [vmem:[%s2267_s0 + $0x68] sm:$0xff] }
  0xb0   :  { %v646_v11 = vmax.f32 %v339_v4, %v512_v5 }
  0xb1   :  { %v1103_v7 = vmax.f32 %v874_v3, %v967_v1 }
  0xb2   :  { %1518 = vmatmul.msk.bf16.gmra.mxu0 %vm231_vm1, %v1669_v2  ;;  %1559 = vmatmul.msk.bf16.gmra.mxu1 %vm231_vm1, %v1669_v2 }
  0xb3   :  { %v1163_v8 = vadd.f32 %v1986_v42, %v1103_v7  ;;  %1600 = vmatmul.msk.bf16.gmra.mxu2 %vm231_vm1, %v1669_v2  ;;  %1641 = vmatmul.msk.bf16.gmra.mxu3 %vm231_vm1, %v1669_v2 }
  0xb5   :  { %v1219_v10 = vmax.f32 %v1163_v8, 0.0 }
  0xb6   :  { %v741_v12 = vpop.f32.mrf.mxu2  ;;  %v970_v13 = vpop.f32.mrf.mxu3 }
  0xb7   :  { %v1703_v14 = vpack.c.bf16 %v1219_v10, %v1218_v9  ;;  %v341_v15 = vpop.f32.mrf.mxu0  ;;  %v514_v16 = vpop.f32.mrf.mxu1  ;;  %v875_v17 = vmax.f32 %v646_v11, %v741_v12 }
  0xb8   :  { %v647_v19 = vmax.f32 %v341_v15, %v514_v16 }
  0xb9   :  { %1835 = vst [vmem:[%s2269_s3 + $0x8] sm:$0xff] %v1703_v14   ;;  %v1104_v18 = vmax.f32 %v875_v17, %v970_v13 }
  0xbb   :  { %v1164_v26 = vadd.f32 %v1986_v42, %v1104_v18 }
  0xbd   :  { %v1220_v29 = vmax.f32 %v1164_v26, 0.0 }
  0xbe   :  { %v743_v20 = vpop.f32.mrf.mxu2  ;;  %v972_v21 = vpop.f32.mrf.mxu3 }
  0xbf   :  { %v876_v23 = vmax.f32 %v647_v19, %v743_v20  ;;  %v344_v24 = vpop.f32.mrf.mxu0  ;;  %v517_v25 = vpop.f32.mrf.mxu1  ;;  %v1673_v19 = vld [vmem:[%s2267_s0 + $0x70] sm:$0xff] }
  0xc0   :  { %v648_v31 = vmax.f32 %v344_v24, %v517_v25 }
  0xc1   :  { %v1105_v27 = vmax.f32 %v876_v23, %v972_v21 }
  0xc2   :  { %1519 = vmatmul.msk.bf16.gmra.mxu0 %vm231_vm1, %v1670_v22  ;;  %1560 = vmatmul.msk.bf16.gmra.mxu1 %vm231_vm1, %v1670_v22 }
  0xc3   :  { %v1165_v28 = vadd.f32 %v1986_v42, %v1105_v27  ;;  %1601 = vmatmul.msk.bf16.gmra.mxu2 %vm231_vm1, %v1670_v22  ;;  %1642 = vmatmul.msk.bf16.gmra.mxu3 %vm231_vm1, %v1670_v22 }
  0xc5   :  { %v1221_v30 = vmax.f32 %v1165_v28, 0.0 }
  0xc6   :  { %v746_v32 = vpop.f32.mrf.mxu2  ;;  %v975_v33 = vpop.f32.mrf.mxu3 }
  0xc7   :  { %v1708_v34 = vpack.c.bf16 %v1221_v30, %v1220_v29  ;;  %v346_v35 = vpop.f32.mrf.mxu0  ;;  %v519_v36 = vpop.f32.mrf.mxu1  ;;  %v877_v37 = vmax.f32 %v648_v31, %v746_v32 }
  0xc8   :  { %v649_v39 = vmax.f32 %v346_v35, %v519_v36 }
  0xc9   :  { %1836 = vst [vmem:[%s2269_s3 + $0x10] sm:$0xff] %v1708_v34   ;;  %v1106_v38 = vmax.f32 %v877_v37, %v975_v33 }
  0xcb   :  { %v1166_v47 = vadd.f32 %v1986_v42, %v1106_v38 }
  0xcd   :  { %v1222_v50 = vmax.f32 %v1166_v47, 0.0 }
  0xce   :  { %v748_v40 = vpop.f32.mrf.mxu2  ;;  %v977_v41 = vpop.f32.mrf.mxu3 }
  0xcf   :  { %v878_v44 = vmax.f32 %v649_v39, %v748_v40  ;;  %v349_v45 = vpop.f32.mrf.mxu0  ;;  %v522_v46 = vpop.f32.mrf.mxu1  ;;  %v1674_v39 = vld [vmem:[%s2267_s0 + $0x78] sm:$0xff] }
  0xd0   :  { %v650_v52 = vmax.f32 %v349_v45, %v522_v46 }
  0xd1   :  { %v1107_v48 = vmax.f32 %v878_v44, %v977_v41 }
  0xd2   :  { %1520 = vmatmul.msk.bf16.gmra.mxu0 %vm231_vm1, %v1671_v43  ;;  %1561 = vmatmul.msk.bf16.gmra.mxu1 %vm231_vm1, %v1671_v43 }
  0xd3   :  { %v1167_v49 = vadd.f32 %v1986_v42, %v1107_v48  ;;  %1602 = vmatmul.msk.bf16.gmra.mxu2 %vm231_vm1, %v1671_v43  ;;  %1643 = vmatmul.msk.bf16.gmra.mxu3 %vm231_vm1, %v1671_v43 }
  0xd5   :  { %v1223_v51 = vmax.f32 %v1167_v49, 0.0 }
  0xd6   :  { %v751_v53 = vpop.f32.mrf.mxu2  ;;  %v980_v54 = vpop.f32.mrf.mxu3 }
  0xd7   :  { %v1713_v55 = vpack.c.bf16 %v1223_v51, %v1222_v50  ;;  %v351_v56 = vpop.f32.mrf.mxu0  ;;  %v524_v57 = vpop.f32.mrf.mxu1  ;;  %v879_v58 = vmax.f32 %v650_v52, %v751_v53 }
  0xd8   :  { %v651_v60 = vmax.f32 %v351_v56, %v524_v57 }
  0xd9   :  { %1837 = vst [vmem:[%s2269_s3 + $0x18] sm:$0xff] %v1713_v55   ;;  %v1108_v59 = vmax.f32 %v879_v58, %v980_v54 }
  0xdb   :  { %v1168_v3 = vadd.f32 %v1986_v42, %v1108_v59 }
  0xdd   :  { %v1224_v6 = vmax.f32 %v1168_v3, 0.0 }
  0xde   :  { %v753_v61 = vpop.f32.mrf.mxu2  ;;  %v982_v62 = vpop.f32.mrf.mxu3 }
  0xdf   :  { %v880_v0 = vmax.f32 %v651_v60, %v753_v61  ;;  %v354_v1 = vpop.f32.mrf.mxu0  ;;  %v527_v2 = vpop.f32.mrf.mxu1  ;;  %v1675_v60 = vld [vmem:[%s2267_s0 + $0x80] sm:$0xff] }
  0xe0   :  { %v652_v8 = vmax.f32 %v354_v1, %v527_v2 }
  0xe1   :  { %v1109_v4 = vmax.f32 %v880_v0, %v982_v62 }
  0xe2   :  { %1521 = vmatmul.msk.bf16.gmra.mxu0 %vm231_vm1, %v1672_v63  ;;  %1562 = vmatmul.msk.bf16.gmra.mxu1 %vm231_vm1, %v1672_v63 }
  0xe3   :  { %v1169_v5 = vadd.f32 %v1986_v42, %v1109_v4  ;;  %1603 = vmatmul.msk.bf16.gmra.mxu2 %vm231_vm1, %v1672_v63  ;;  %1644 = vmatmul.msk.bf16.gmra.mxu3 %vm231_vm1, %v1672_v63 }
  0xe5   :  { %v1225_v7 = vmax.f32 %v1169_v5, 0.0 }
  0xe6   :  { %v756_v9 = vpop.f32.mrf.mxu2  ;;  %v985_v10 = vpop.f32.mrf.mxu3 }
  0xe7   :  { %v1718_v11 = vpack.c.bf16 %v1225_v7, %v1224_v6  ;;  %v356_v12 = vpop.f32.mrf.mxu0  ;;  %v529_v13 = vpop.f32.mrf.mxu1  ;;  %v881_v14 = vmax.f32 %v652_v8, %v756_v9 }
  0xe8   :  { %v653_v16 = vmax.f32 %v356_v12, %v529_v13 }
  0xe9   :  { %1838 = vst [vmem:[%s2269_s3 + $0x20] sm:$0xff] %v1718_v11   ;;  %v1110_v15 = vmax.f32 %v881_v14, %v985_v10 }
  0xeb   :  { %v1170_v23 = vadd.f32 %v1986_v42, %v1110_v15 }
  0xed   :  { %v1226_v26 = vmax.f32 %v1170_v23, 0.0 }
  0xee   :  { %v758_v17 = vpop.f32.mrf.mxu2  ;;  %v987_v18 = vpop.f32.mrf.mxu3 }
  0xef   :  { %v882_v20 = vmax.f32 %v653_v16, %v758_v17  ;;  %v359_v21 = vpop.f32.mrf.mxu0  ;;  %v532_v22 = vpop.f32.mrf.mxu1  ;;  %v1676_v16 = vld [vmem:[%s2267_s0 + $0x88] sm:$0xff] }
  0xf0   :  { %v654_v28 = vmax.f32 %v359_v21, %v532_v22 }
  0xf1   :  { %v1111_v24 = vmax.f32 %v882_v20, %v987_v18 }
  0xf2   :  { %1522 = vmatmul.msk.bf16.gmra.mxu0 %vm231_vm1, %v1673_v19  ;;  %1563 = vmatmul.msk.bf16.gmra.mxu1 %vm231_vm1, %v1673_v19 }
  0xf3   :  { %v1171_v25 = vadd.f32 %v1986_v42, %v1111_v24  ;;  %1604 = vmatmul.msk.bf16.gmra.mxu2 %vm231_vm1, %v1673_v19  ;;  %1645 = vmatmul.msk.bf16.gmra.mxu3 %vm231_vm1, %v1673_v19 }
  0xf5   :  { %v1227_v27 = vmax.f32 %v1171_v25, 0.0 }
  0xf6   :  { %v761_v29 = vpop.f32.mrf.mxu2  ;;  %v990_v30 = vpop.f32.mrf.mxu3 }
  0xf7   :  { %v1723_v31 = vpack.c.bf16 %v1227_v27, %v1226_v26  ;;  %v361_v32 = vpop.f32.mrf.mxu0  ;;  %v534_v33 = vpop.f32.mrf.mxu1  ;;  %v883_v34 = vmax.f32 %v654_v28, %v761_v29 }
  0xf8   :  { %v655_v36 = vmax.f32 %v361_v32, %v534_v33 }
  0xf9   :  { %1839 = vst [vmem:[%s2269_s3 + $0x28] sm:$0xff] %v1723_v31   ;;  %v1112_v35 = vmax.f32 %v883_v34, %v990_v30 }
  0xfb   :  { %v1172_v44 = vadd.f32 %v1986_v42, %v1112_v35 }
  0xfd   :  { %v1228_v47 = vmax.f32 %v1172_v44, 0.0 }
  0xfe   :  { %v763_v37 = vpop.f32.mrf.mxu2  ;;  %v992_v38 = vpop.f32.mrf.mxu3 }
  0xff   :  { %v884_v40 = vmax.f32 %v655_v36, %v763_v37  ;;  %v364_v41 = vpop.f32.mrf.mxu0  ;;  %v537_v43 = vpop.f32.mrf.mxu1  ;;  %v1677_v36 = vld [vmem:[%s2267_s0 + $0x90] sm:$0xff] }
 0x100   :  { %v656_v49 = vmax.f32 %v364_v41, %v537_v43 }
 0x101   :  { %v1113_v45 = vmax.f32 %v884_v40, %v992_v38 }
 0x102   :  { %1523 = vmatmul.msk.bf16.gmra.mxu0 %vm231_vm1, %v1674_v39  ;;  %1564 = vmatmul.msk.bf16.gmra.mxu1 %vm231_vm1, %v1674_v39 }
 0x103   :  { %v1173_v46 = vadd.f32 %v1986_v42, %v1113_v45  ;;  %1605 = vmatmul.msk.bf16.gmra.mxu2 %vm231_vm1, %v1674_v39  ;;  %1646 = vmatmul.msk.bf16.gmra.mxu3 %vm231_vm1, %v1674_v39 }
 0x105   :  { %v1229_v48 = vmax.f32 %v1173_v46, 0.0 }
 0x106   :  { %v766_v50 = vpop.f32.mrf.mxu2  ;;  %v995_v51 = vpop.f32.mrf.mxu3 }
 0x107   :  { %v1728_v52 = vpack.c.bf16 %v1229_v48, %v1228_v47  ;;  %v366_v53 = vpop.f32.mrf.mxu0  ;;  %v539_v54 = vpop.f32.mrf.mxu1  ;;  %v885_v55 = vmax.f32 %v656_v49, %v766_v50 }
 0x108   :  { %v657_v57 = vmax.f32 %v366_v53, %v539_v54 }
 0x109   :  { %1840 = vst [vmem:[%s2269_s3 + $0x30] sm:$0xff] %v1728_v52   ;;  %v1114_v56 = vmax.f32 %v885_v55, %v995_v51 }
 0x10b   :  { %v1174_v0 = vadd.f32 %v1986_v42, %v1114_v56 }
 0x10d   :  { %v1230_v3 = vmax.f32 %v1174_v0, 0.0 }
 0x10e   :  { %v768_v58 = vpop.f32.mrf.mxu2  ;;  %v997_v59 = vpop.f32.mrf.mxu3 }
 0x10f   :  { %v886_v61 = vmax.f32 %v657_v57, %v768_v58  ;;  %v369_v62 = vpop.f32.mrf.mxu0  ;;  %v542_v63 = vpop.f32.mrf.mxu1  ;;  %v1678_v57 = vld [vmem:[%s2267_s0 + $0x98] sm:$0xff] }
 0x110   :  { %v658_v5 = vmax.f32 %v369_v62, %v542_v63 }
 0x111   :  { %v1115_v1 = vmax.f32 %v886_v61, %v997_v59 }
 0x112   :  { %1524 = vmatmul.msk.bf16.gmra.mxu0 %vm231_vm1, %v1675_v60  ;;  %1565 = vmatmul.msk.bf16.gmra.mxu1 %vm231_vm1, %v1675_v60 }
 0x113   :  { %v1175_v2 = vadd.f32 %v1986_v42, %v1115_v1  ;;  %1606 = vmatmul.msk.bf16.gmra.mxu2 %vm231_vm1, %v1675_v60  ;;  %1647 = vmatmul.msk.bf16.gmra.mxu3 %vm231_vm1, %v1675_v60 }
 0x115   :  { %v1231_v4 = vmax.f32 %v1175_v2, 0.0 }
 0x116   :  { %v771_v6 = vpop.f32.mrf.mxu2  ;;  %v1000_v7 = vpop.f32.mrf.mxu3 }
 0x117   :  { %v1733_v8 = vpack.c.bf16 %v1231_v4, %v1230_v3  ;;  %v371_v9 = vpop.f32.mrf.mxu0  ;;  %v544_v10 = vpop.f32.mrf.mxu1  ;;  %v887_v11 = vmax.f32 %v658_v5, %v771_v6 }
 0x118   :  { %v659_v13 = vmax.f32 %v371_v9, %v544_v10 }
 0x119   :  { %1841 = vst [vmem:[%s2269_s3 + $0x38] sm:$0xff] %v1733_v8   ;;  %v1116_v12 = vmax.f32 %v887_v11, %v1000_v7 }
 0x11b   :  { %v1176_v20 = vadd.f32 %v1986_v42, %v1116_v12 }
 0x11d   :  { %v1232_v23 = vmax.f32 %v1176_v20, 0.0 }
 0x11e   :  { %v773_v14 = vpop.f32.mrf.mxu2  ;;  %v1002_v15 = vpop.f32.mrf.mxu3 }
 0x11f   :  { %v888_v17 = vmax.f32 %v659_v13, %v773_v14  ;;  %v374_v18 = vpop.f32.mrf.mxu0  ;;  %v547_v19 = vpop.f32.mrf.mxu1  ;;  %v1679_v13 = vld [vmem:[%s2267_s0 + $0xa0] sm:$0xff] }
 0x120   :  { %v660_v25 = vmax.f32 %v374_v18, %v547_v19 }
 0x121   :  { %v1117_v21 = vmax.f32 %v888_v17, %v1002_v15 }
 0x122   :  { %1525 = vmatmul.msk.bf16.gmra.mxu0 %vm231_vm1, %v1676_v16  ;;  %1566 = vmatmul.msk.bf16.gmra.mxu1 %vm231_vm1, %v1676_v16 }
 0x123   :  { %v1177_v22 = vadd.f32 %v1986_v42, %v1117_v21  ;;  %1607 = vmatmul.msk.bf16.gmra.mxu2 %vm231_vm1, %v1676_v16  ;;  %1648 = vmatmul.msk.bf16.gmra.mxu3 %vm231_vm1, %v1676_v16 }
 0x125   :  { %v1233_v24 = vmax.f32 %v1177_v22, 0.0 }
 0x126   :  { %v776_v26 = vpop.f32.mrf.mxu2  ;;  %v1005_v27 = vpop.f32.mrf.mxu3 }
 0x127   :  { %v1738_v28 = vpack.c.bf16 %v1233_v24, %v1232_v23  ;;  %v376_v29 = vpop.f32.mrf.mxu0  ;;  %v549_v30 = vpop.f32.mrf.mxu1  ;;  %v889_v31 = vmax.f32 %v660_v25, %v776_v26 }
 0x128   :  { %v661_v33 = vmax.f32 %v376_v29, %v549_v30 }
 0x129   :  { %1842 = vst [vmem:[%s2269_s3 + $0x40] sm:$0xff] %v1738_v28   ;;  %v1118_v32 = vmax.f32 %v889_v31, %v1005_v27 }
 0x12b   :  { %v1178_v40 = vadd.f32 %v1986_v42, %v1118_v32 }
 0x12d   :  { %v1234_v44 = vmax.f32 %v1178_v40, 0.0 }
 0x12e   :  { %v778_v34 = vpop.f32.mrf.mxu2  ;;  %v1007_v35 = vpop.f32.mrf.mxu3 }
 0x12f   :  { %v890_v37 = vmax.f32 %v661_v33, %v778_v34  ;;  %v379_v38 = vpop.f32.mrf.mxu0  ;;  %v552_v39 = vpop.f32.mrf.mxu1  ;;  %v1680_v33 = vld [vmem:[%s2267_s0 + $0xa8] sm:$0xff] }
 0x130   :  { %v662_v46 = vmax.f32 %v379_v38, %v552_v39 }
 0x131   :  { %v1119_v41 = vmax.f32 %v890_v37, %v1007_v35 }
 0x132   :  { %1526 = vmatmul.msk.bf16.gmra.mxu0 %vm231_vm1, %v1677_v36  ;;  %1567 = vmatmul.msk.bf16.gmra.mxu1 %vm231_vm1, %v1677_v36 }
 0x133   :  { %v1179_v43 = vadd.f32 %v1986_v42, %v1119_v41  ;;  %1608 = vmatmul.msk.bf16.gmra.mxu2 %vm231_vm1, %v1677_v36  ;;  %1649 = vmatmul.msk.bf16.gmra.mxu3 %vm231_vm1, %v1677_v36 }
 0x135   :  { %v1235_v45 = vmax.f32 %v1179_v43, 0.0 }
 0x136   :  { %v781_v47 = vpop.f32.mrf.mxu2  ;;  %v1010_v48 = vpop.f32.mrf.mxu3 }
 0x137   :  { %v1743_v49 = vpack.c.bf16 %v1235_v45, %v1234_v44  ;;  %v381_v50 = vpop.f32.mrf.mxu0  ;;  %v554_v51 = vpop.f32.mrf.mxu1  ;;  %v891_v52 = vmax.f32 %v662_v46, %v781_v47 }
 0x138   :  { %v663_v54 = vmax.f32 %v381_v50, %v554_v51 }
 0x139   :  { %1843 = vst [vmem:[%s2269_s3 + $0x48] sm:$0xff] %v1743_v49   ;;  %v1120_v53 = vmax.f32 %v891_v52, %v1010_v48 }
 0x13b   :  { %v1180_v61 = vadd.f32 %v1986_v42, %v1120_v53 }
 0x13d   :  { %v1236_v0 = vmax.f32 %v1180_v61, 0.0 }
 0x13e   :  { %v783_v55 = vpop.f32.mrf.mxu2  ;;  %v1012_v56 = vpop.f32.mrf.mxu3 }
 0x13f   :  { %v892_v58 = vmax.f32 %v663_v54, %v783_v55  ;;  %v384_v59 = vpop.f32.mrf.mxu0  ;;  %v557_v60 = vpop.f32.mrf.mxu1  ;;  %v1681_v54 = vld [vmem:[%s2267_s0 + $0xb0] sm:$0xff] }
 0x140   :  { %v664_v2 = vmax.f32 %v384_v59, %v557_v60 }
 0x141   :  { %v1121_v62 = vmax.f32 %v892_v58, %v1012_v56 }
 0x142   :  { %1527 = vmatmul.msk.bf16.gmra.mxu0 %vm231_vm1, %v1678_v57  ;;  %1568 = vmatmul.msk.bf16.gmra.mxu1 %vm231_vm1, %v1678_v57 }
 0x143   :  { %v1181_v63 = vadd.f32 %v1986_v42, %v1121_v62  ;;  %1609 = vmatmul.msk.bf16.gmra.mxu2 %vm231_vm1, %v1678_v57  ;;  %1650 = vmatmul.msk.bf16.gmra.mxu3 %vm231_vm1, %v1678_v57 }
 0x145   :  { %v1237_v1 = vmax.f32 %v1181_v63, 0.0 }
 0x146   :  { %v786_v3 = vpop.f32.mrf.mxu2  ;;  %v1015_v4 = vpop.f32.mrf.mxu3 }
 0x147   :  { %v1748_v5 = vpack.c.bf16 %v1237_v1, %v1236_v0  ;;  %v386_v6 = vpop.f32.mrf.mxu0  ;;  %v559_v7 = vpop.f32.mrf.mxu1  ;;  %v893_v8 = vmax.f32 %v664_v2, %v786_v3 }
 0x148   :  { %v665_v10 = vmax.f32 %v386_v6, %v559_v7 }
 0x149   :  { %1844 = vst [vmem:[%s2269_s3 + $0x50] sm:$0xff] %v1748_v5   ;;  %v1122_v9 = vmax.f32 %v893_v8, %v1015_v4 }
 0x14b   :  { %v1182_v17 = vadd.f32 %v1986_v42, %v1122_v9 }
 0x14d   :  { %v1238_v20 = vmax.f32 %v1182_v17, 0.0 }
 0x14e   :  { %v788_v11 = vpop.f32.mrf.mxu2  ;;  %v1017_v12 = vpop.f32.mrf.mxu3 }
 0x14f   :  { %v894_v14 = vmax.f32 %v665_v10, %v788_v11  ;;  %v389_v15 = vpop.f32.mrf.mxu0  ;;  %v562_v16 = vpop.f32.mrf.mxu1  ;;  %v1682_v10 = vld [vmem:[%s2267_s0 + $0xb8] sm:$0xff] }
 0x150   :  { %v666_v22 = vmax.f32 %v389_v15, %v562_v16 }
 0x151   :  { %v1123_v18 = vmax.f32 %v894_v14, %v1017_v12 }
 0x152   :  { %1528 = vmatmul.msk.bf16.gmra.mxu0 %vm231_vm1, %v1679_v13  ;;  %1569 = vmatmul.msk.bf16.gmra.mxu1 %vm231_vm1, %v1679_v13 }
 0x153   :  { %v1183_v19 = vadd.f32 %v1986_v42, %v1123_v18  ;;  %1610 = vmatmul.msk.bf16.gmra.mxu2 %vm231_vm1, %v1679_v13  ;;  %1651 = vmatmul.msk.bf16.gmra.mxu3 %vm231_vm1, %v1679_v13 }
 0x155   :  { %v1239_v21 = vmax.f32 %v1183_v19, 0.0 }
 0x156   :  { %v791_v23 = vpop.f32.mrf.mxu2  ;;  %v1020_v24 = vpop.f32.mrf.mxu3 }
 0x157   :  { %v1753_v25 = vpack.c.bf16 %v1239_v21, %v1238_v20  ;;  %v391_v26 = vpop.f32.mrf.mxu0  ;;  %v564_v27 = vpop.f32.mrf.mxu1  ;;  %v895_v28 = vmax.f32 %v666_v22, %v791_v23 }
 0x158   :  { %v667_v30 = vmax.f32 %v391_v26, %v564_v27 }
 0x159   :  { %1845 = vst [vmem:[%s2269_s3 + $0x58] sm:$0xff] %v1753_v25   ;;  %v1124_v29 = vmax.f32 %v895_v28, %v1020_v24 }
 0x15b   :  { %v1184_v37 = vadd.f32 %v1986_v42, %v1124_v29 }
 0x15d   :  { %v1240_v40 = vmax.f32 %v1184_v37, 0.0 }
 0x15e   :  { %v793_v31 = vpop.f32.mrf.mxu2  ;;  %v1022_v32 = vpop.f32.mrf.mxu3 }
 0x15f   :  { %v896_v34 = vmax.f32 %v667_v30, %v793_v31  ;;  %v394_v35 = vpop.f32.mrf.mxu0  ;;  %v567_v36 = vpop.f32.mrf.mxu1  ;;  %v1683_v30 = vld [vmem:[%s2267_s0 + $0xc0] sm:$0xff] }
 0x160   :  { %v668_v43 = vmax.f32 %v394_v35, %v567_v36 }
 0x161   :  { %v1125_v38 = vmax.f32 %v896_v34, %v1022_v32 }
 0x162   :  { %1529 = vmatmul.msk.bf16.gmra.mxu0 %vm231_vm1, %v1680_v33  ;;  %1570 = vmatmul.msk.bf16.gmra.mxu1 %vm231_vm1, %v1680_v33 }
 0x163   :  { %v1185_v39 = vadd.f32 %v1986_v42, %v1125_v38  ;;  %1611 = vmatmul.msk.bf16.gmra.mxu2 %vm231_vm1, %v1680_v33  ;;  %1652 = vmatmul.msk.bf16.gmra.mxu3 %vm231_vm1, %v1680_v33 }
 0x165   :  { %v1241_v41 = vmax.f32 %v1185_v39, 0.0 }
 0x166   :  { %v796_v44 = vpop.f32.mrf.mxu2  ;;  %v1025_v45 = vpop.f32.mrf.mxu3 }
 0x167   :  { %v1758_v46 = vpack.c.bf16 %v1241_v41, %v1240_v40  ;;  %v396_v47 = vpop.f32.mrf.mxu0  ;;  %v569_v48 = vpop.f32.mrf.mxu1  ;;  %v897_v49 = vmax.f32 %v668_v43, %v796_v44 }
 0x168   :  { %v669_v51 = vmax.f32 %v396_v47, %v569_v48 }
 0x169   :  { %1846 = vst [vmem:[%s2269_s3 + $0x60] sm:$0xff] %v1758_v46   ;;  %v1126_v50 = vmax.f32 %v897_v49, %v1025_v45 }
 0x16b   :  { %v1186_v58 = vadd.f32 %v1986_v42, %v1126_v50 }
 0x16d   :  { %v1242_v61 = vmax.f32 %v1186_v58, 0.0 }
 0x16e   :  { %v798_v52 = vpop.f32.mrf.mxu2  ;;  %v1027_v53 = vpop.f32.mrf.mxu3 }
 0x16f   :  { %v898_v55 = vmax.f32 %v669_v51, %v798_v52  ;;  %v399_v56 = vpop.f32.mrf.mxu0  ;;  %v572_v57 = vpop.f32.mrf.mxu1  ;;  %v1684_v51 = vld [vmem:[%s2267_s0 + $0xc8] sm:$0xff] }
 0x170   :  { %v670_v63 = vmax.f32 %v399_v56, %v572_v57 }
 0x171   :  { %v1127_v59 = vmax.f32 %v898_v55, %v1027_v53 }
 0x172   :  { %1530 = vmatmul.msk.bf16.gmra.mxu0 %vm231_vm1, %v1681_v54  ;;  %1571 = vmatmul.msk.bf16.gmra.mxu1 %vm231_vm1, %v1681_v54 }
 0x173   :  { %v1187_v60 = vadd.f32 %v1986_v42, %v1127_v59  ;;  %1612 = vmatmul.msk.bf16.gmra.mxu2 %vm231_vm1, %v1681_v54  ;;  %1653 = vmatmul.msk.bf16.gmra.mxu3 %vm231_vm1, %v1681_v54 }
 0x175   :  { %v1243_v62 = vmax.f32 %v1187_v60, 0.0 }
 0x176   :  { %v801_v0 = vpop.f32.mrf.mxu2  ;;  %v1030_v1 = vpop.f32.mrf.mxu3 }
 0x177   :  { %v1763_v2 = vpack.c.bf16 %v1243_v62, %v1242_v61  ;;  %v401_v3 = vpop.f32.mrf.mxu0  ;;  %v574_v4 = vpop.f32.mrf.mxu1  ;;  %v899_v5 = vmax.f32 %v670_v63, %v801_v0 }
 0x178   :  { %v671_v7 = vmax.f32 %v401_v3, %v574_v4 }
 0x179   :  { %1847 = vst [vmem:[%s2269_s3 + $0x68] sm:$0xff] %v1763_v2   ;;  %v1128_v6 = vmax.f32 %v899_v5, %v1030_v1 }
 0x17b   :  { %v1188_v14 = vadd.f32 %v1986_v42, %v1128_v6 }
 0x17d   :  { %v1244_v17 = vmax.f32 %v1188_v14, 0.0 }
 0x17e   :  { %v803_v8 = vpop.f32.mrf.mxu2  ;;  %v1032_v9 = vpop.f32.mrf.mxu3 }
 0x17f   :  { %v900_v11 = vmax.f32 %v671_v7, %v803_v8  ;;  %v404_v12 = vpop.f32.mrf.mxu0  ;;  %v577_v13 = vpop.f32.mrf.mxu1  ;;  %v1685_v7 = vld [vmem:[%s2267_s0 + $0xd0] sm:$0xff] }
 0x180   :  { %v672_v19 = vmax.f32 %v404_v12, %v577_v13 }
 0x181   :  { %v1129_v15 = vmax.f32 %v900_v11, %v1032_v9 }
 0x182   :  { %1531 = vmatmul.msk.bf16.gmra.mxu0 %vm231_vm1, %v1682_v10  ;;  %1572 = vmatmul.msk.bf16.gmra.mxu1 %vm231_vm1, %v1682_v10 }
 0x183   :  { %v1189_v16 = vadd.f32 %v1986_v42, %v1129_v15  ;;  %1613 = vmatmul.msk.bf16.gmra.mxu2 %vm231_vm1, %v1682_v10  ;;  %1654 = vmatmul.msk.bf16.gmra.mxu3 %vm231_vm1, %v1682_v10 }
 0x185   :  { %v1245_v18 = vmax.f32 %v1189_v16, 0.0 }
 0x186   :  { %v806_v20 = vpop.f32.mrf.mxu2  ;;  %v1035_v21 = vpop.f32.mrf.mxu3 }
 0x187   :  { %v1768_v22 = vpack.c.bf16 %v1245_v18, %v1244_v17  ;;  %v406_v23 = vpop.f32.mrf.mxu0  ;;  %v579_v24 = vpop.f32.mrf.mxu1  ;;  %v901_v25 = vmax.f32 %v672_v19, %v806_v20 }
 0x188   :  { %v673_v27 = vmax.f32 %v406_v23, %v579_v24 }
 0x189   :  { %1848 = vst [vmem:[%s2269_s3 + $0x70] sm:$0xff] %v1768_v22   ;;  %v1130_v26 = vmax.f32 %v901_v25, %v1035_v21 }
 0x18b   :  { %v1190_v34 = vadd.f32 %v1986_v42, %v1130_v26 }
 0x18d   :  { %v1246_v37 = vmax.f32 %v1190_v34, 0.0 }
 0x18e   :  { %v808_v28 = vpop.f32.mrf.mxu2  ;;  %v1037_v29 = vpop.f32.mrf.mxu3 }
 0x18f   :  { %v902_v31 = vmax.f32 %v673_v27, %v808_v28  ;;  %v409_v32 = vpop.f32.mrf.mxu0  ;;  %v582_v33 = vpop.f32.mrf.mxu1  ;;  %v1686_v27 = vld [vmem:[%s2267_s0 + $0xd8] sm:$0xff] }
 0x190   :  { %v674_v39 = vmax.f32 %v409_v32, %v582_v33 }
 0x191   :  { %v1131_v35 = vmax.f32 %v902_v31, %v1037_v29 }
 0x192   :  { %1532 = vmatmul.msk.bf16.gmra.mxu0 %vm231_vm1, %v1683_v30  ;;  %1573 = vmatmul.msk.bf16.gmra.mxu1 %vm231_vm1, %v1683_v30 }
 0x193   :  { %v1191_v36 = vadd.f32 %v1986_v42, %v1131_v35  ;;  %1614 = vmatmul.msk.bf16.gmra.mxu2 %vm231_vm1, %v1683_v30  ;;  %1655 = vmatmul.msk.bf16.gmra.mxu3 %vm231_vm1, %v1683_v30 }
 0x195   :  { %v1247_v38 = vmax.f32 %v1191_v36, 0.0 }
 0x196   :  { %v811_v40 = vpop.f32.mrf.mxu2  ;;  %v1040_v41 = vpop.f32.mrf.mxu3 }
 0x197   :  { %v1773_v43 = vpack.c.bf16 %v1247_v38, %v1246_v37  ;;  %v411_v44 = vpop.f32.mrf.mxu0  ;;  %v584_v45 = vpop.f32.mrf.mxu1  ;;  %v903_v46 = vmax.f32 %v674_v39, %v811_v40 }
 0x198   :  { %v675_v48 = vmax.f32 %v411_v44, %v584_v45 }
 0x199   :  { %1849 = vst [vmem:[%s2269_s3 + $0x78] sm:$0xff] %v1773_v43   ;;  %v1132_v47 = vmax.f32 %v903_v46, %v1040_v41 }
 0x19b   :  { %v1192_v55 = vadd.f32 %v1986_v42, %v1132_v47 }
 0x19d   :  { %v1248_v58 = vmax.f32 %v1192_v55, 0.0 }
 0x19e   :  { %v813_v49 = vpop.f32.mrf.mxu2  ;;  %v1042_v50 = vpop.f32.mrf.mxu3 }
 0x19f   :  { %v904_v52 = vmax.f32 %v675_v48, %v813_v49  ;;  %v414_v53 = vpop.f32.mrf.mxu0  ;;  %v587_v54 = vpop.f32.mrf.mxu1 }
 0x1a0   :  { %v676_v60 = vmax.f32 %v414_v53, %v587_v54 }
 0x1a1   :  { %v1133_v56 = vmax.f32 %v904_v52, %v1042_v50 }
 0x1a2   :  { %1533 = vmatmul.msk.bf16.gmra.mxu0 %vm231_vm1, %v1684_v51  ;;  %1574 = vmatmul.msk.bf16.gmra.mxu1 %vm231_vm1, %v1684_v51 }
 0x1a3   :  { %v1193_v57 = vadd.f32 %v1986_v42, %v1133_v56  ;;  %1615 = vmatmul.msk.bf16.gmra.mxu2 %vm231_vm1, %v1684_v51  ;;  %1656 = vmatmul.msk.bf16.gmra.mxu3 %vm231_vm1, %v1684_v51 }
 0x1a5   :  { %v1249_v59 = vmax.f32 %v1193_v57, 0.0 }
 0x1a6   :  { %v816_v61 = vpop.f32.mrf.mxu2  ;;  %v1045_v62 = vpop.f32.mrf.mxu3 }
 0x1a7   :  { %v1778_v63 = vpack.c.bf16 %v1249_v59, %v1248_v58  ;;  %v416_v0 = vpop.f32.mrf.mxu0  ;;  %v589_v1 = vpop.f32.mrf.mxu1  ;;  %v905_v2 = vmax.f32 %v676_v60, %v816_v61 }
 0x1a8   :  { %v677_v4 = vmax.f32 %v416_v0, %v589_v1 }
 0x1a9   :  { %1850 = vst [vmem:[%s2269_s3 + $0x80] sm:$0xff] %v1778_v63   ;;  %v1134_v3 = vmax.f32 %v905_v2, %v1045_v62 }
 0x1ab   :  { %v1194_v11 = vadd.f32 %v1986_v42, %v1134_v3 }
 0x1ad   :  { %v1250_v14 = vmax.f32 %v1194_v11, 0.0 }
 0x1ae   :  { %v818_v5 = vpop.f32.mrf.mxu2  ;;  %v1047_v6 = vpop.f32.mrf.mxu3 }
 0x1af   :  { %v906_v8 = vmax.f32 %v677_v4, %v818_v5  ;;  %v419_v9 = vpop.f32.mrf.mxu0  ;;  %v592_v10 = vpop.f32.mrf.mxu1 }
 0x1b0   :  { %v678_v16 = vmax.f32 %v419_v9, %v592_v10 }
 0x1b1   :  { %v1135_v12 = vmax.f32 %v906_v8, %v1047_v6 }
 0x1b2   :  { %1534 = vmatmul.msk.bf16.gmra.mxu0 %vm231_vm1, %v1685_v7  ;;  %1575 = vmatmul.msk.bf16.gmra.mxu1 %vm231_vm1, %v1685_v7 }
 0x1b3   :  { %v1195_v13 = vadd.f32 %v1986_v42, %v1135_v12  ;;  %1616 = vmatmul.msk.bf16.gmra.mxu2 %vm231_vm1, %v1685_v7  ;;  %1657 = vmatmul.msk.bf16.gmra.mxu3 %vm231_vm1, %v1685_v7 }
 0x1b5   :  { %v1251_v15 = vmax.f32 %v1195_v13, 0.0 }
 0x1b6   :  { %v821_v17 = vpop.f32.mrf.mxu2  ;;  %v1050_v18 = vpop.f32.mrf.mxu3 }
 0x1b7   :  { %v1783_v19 = vpack.c.bf16 %v1251_v15, %v1250_v14  ;;  %v421_v20 = vpop.f32.mrf.mxu0  ;;  %v594_v21 = vpop.f32.mrf.mxu1  ;;  %v907_v22 = vmax.f32 %v678_v16, %v821_v17 }
 0x1b8   :  { %v679_v24 = vmax.f32 %v421_v20, %v594_v21 }
 0x1b9   :  { %1851 = vst [vmem:[%s2269_s3 + $0x88] sm:$0xff] %v1783_v19   ;;  %v1136_v23 = vmax.f32 %v907_v22, %v1050_v18 }
 0x1bb   :  { %v1196_v31 = vadd.f32 %v1986_v42, %v1136_v23 }
 0x1bd   :  { %v1252_v34 = vmax.f32 %v1196_v31, 0.0 }
 0x1be   :  { %v823_v25 = vpop.f32.mrf.mxu2  ;;  %v1052_v26 = vpop.f32.mrf.mxu3 }
 0x1bf   :  { %v908_v28 = vmax.f32 %v679_v24, %v823_v25  ;;  %v424_v29 = vpop.f32.mrf.mxu0  ;;  %v597_v30 = vpop.f32.mrf.mxu1  ;;  %v2229_v24 = vld [vmem:[%s2268_s2] ss:$0 sm:$0xff] }
 0x1c0   :  { %v680_v36 = vmax.f32 %v424_v29, %v597_v30 }
 0x1c1   :  { %v1137_v32 = vmax.f32 %v908_v28, %v1052_v26 }
 0x1c2   :  { %1535 = vmatmul.msk.bf16.gmra.mxu0 %vm231_vm1, %v1686_v27  ;;  %1576 = vmatmul.msk.bf16.gmra.mxu1 %vm231_vm1, %v1686_v27 }
 0x1c3   :  { %v1197_v33 = vadd.f32 %v1986_v42, %v1137_v32  ;;  %1617 = vmatmul.msk.bf16.gmra.mxu2 %vm231_vm1, %v1686_v27  ;;  %1658 = vmatmul.msk.bf16.gmra.mxu3 %vm231_vm1, %v1686_v27 }
 0x1c5   :  { %v1253_v35 = vmax.f32 %v1197_v33, 0.0 }
 0x1c6   :  { %v826_v37 = vpop.f32.mrf.mxu2  ;;  %v1055_v38 = vpop.f32.mrf.mxu3 }
 0x1c7   :  { %v1788_v39 = vpack.c.bf16 %v1253_v35, %v1252_v34  ;;  %v426_v40 = vpop.f32.mrf.mxu0  ;;  %v599_v41 = vpop.f32.mrf.mxu1  ;;  %v909_v43 = vmax.f32 %v680_v36, %v826_v37 }
 0x1c8   :  { %v681_v45 = vmax.f32 %v426_v40, %v599_v41 }
 0x1c9   :  { %1852 = vst [vmem:[%s2269_s3 + $0x90] sm:$0xff] %v1788_v39   ;;  %v1138_v44 = vmax.f32 %v909_v43, %v1055_v38 }
 0x1cb   :  { %v1198_v51 = vadd.f32 %v1986_v42, %v1138_v44 }
 0x1cd   :  { %v1254_v54 = vmax.f32 %v1198_v51, 0.0 }
 0x1ce   :  { %v828_v46 = vpop.f32.mrf.mxu2  ;;  %v1057_v47 = vpop.f32.mrf.mxu3 }
 0x1cf   :  { %v910_v48 = vmax.f32 %v681_v45, %v828_v46  ;;  %v429_v49 = vpop.f32.mrf.mxu0  ;;  %v602_v50 = vpop.f32.mrf.mxu1 }
 0x1d0   :  { %v682_v56 = vmax.f32 %v429_v49, %v602_v50 }
 0x1d1   :  { %v1139_v52 = vmax.f32 %v910_v48, %v1057_v47 }
 0x1d3   :  { %v1199_v53 = vadd.f32 %v1986_v42, %v1139_v52 }
 0x1d5   :  { %v1255_v55 = vmax.f32 %v1199_v53, 0.0 }
 0x1d6   :  { %v831_v57 = vpop.f32.mrf.mxu2  ;;  %v1060_v58 = vpop.f32.mrf.mxu3 }
 0x1d7   :  { %v1793_v59 = vpack.c.bf16 %v1255_v55, %v1254_v54  ;;  %v431_v60 = vpop.f32.mrf.mxu0  ;;  %v604_v61 = vpop.f32.mrf.mxu1  ;;  %v911_v62 = vmax.f32 %v682_v56, %v831_v57 }
 0x1d8   :  { %v683_v0 = vmax.f32 %v431_v60, %v604_v61 }
 0x1d9   :  { %1853 = vst [vmem:[%s2269_s3 + $0x98] sm:$0xff] %v1793_v59   ;;  %v1140_v63 = vmax.f32 %v911_v62, %v1060_v58 }
 0x1db   :  { %v1200_v6 = vadd.f32 %v1986_v42, %v1140_v63 }
 0x1dd   :  { %v1256_v9 = vmax.f32 %v1200_v6, 0.0 }
 0x1de   :  { %v833_v1 = vpop.f32.mrf.mxu2  ;;  %v1062_v2 = vpop.f32.mrf.mxu3 }
 0x1df   :  { %v912_v3 = vmax.f32 %v683_v0, %v833_v1  ;;  %v434_v4 = vpop.f32.mrf.mxu0  ;;  %v607_v5 = vpop.f32.mrf.mxu1 }
 0x1e0   :  { %v684_v11 = vmax.f32 %v434_v4, %v607_v5 }
 0x1e1   :  { %v1141_v7 = vmax.f32 %v912_v3, %v1062_v2 }
 0x1e3   :  { %v1201_v8 = vadd.f32 %v1986_v42, %v1141_v7 }
 0x1e5   :  { %v1257_v10 = vmax.f32 %v1201_v8, 0.0 }
 0x1e6   :  { %v836_v12 = vpop.f32.mrf.mxu2  ;;  %v1065_v13 = vpop.f32.mrf.mxu3 }
 0x1e7   :  { %v1798_v14 = vpack.c.bf16 %v1257_v10, %v1256_v9  ;;  %v436_v15 = vpop.f32.mrf.mxu0  ;;  %v609_v16 = vpop.f32.mrf.mxu1  ;;  %v913_v17 = vmax.f32 %v684_v11, %v836_v12 }
 0x1e8   :  { %v685_v19 = vmax.f32 %v436_v15, %v609_v16 }
 0x1e9   :  { %1854 = vst [vmem:[%s2269_s3 + $0xa0] sm:$0xff] %v1798_v14   ;;  %v1142_v18 = vmax.f32 %v913_v17, %v1065_v13 }
 0x1eb   :  { %v1202_v25 = vadd.f32 %v2229_v24, %v1142_v18 }
 0x1ed   :  { %v1258_v28 = vmax.f32 %v1202_v25, 0.0 }
 0x1ee   :  { %v838_v20 = vpop.f32.mrf.mxu2  ;;  %v1067_v21 = vpop.f32.mrf.mxu3 }
 0x1ef   :  { %v914_v22 = vmax.f32 %v685_v19, %v838_v20  ;;  %v439_v23 = vpop.f32.mrf.mxu0  ;;  %v612_v42 = vpop.f32.mrf.mxu1 }
 0x1f0   :  { %v686_v30 = vmax.f32 %v439_v23, %v612_v42 }
 0x1f1   :  { %v1143_v26 = vmax.f32 %v914_v22, %v1067_v21 }
 0x1f3   :  { %v1203_v27 = vadd.f32 %v2229_v24, %v1143_v26 }
 0x1f5   :  { %v1259_v29 = vmax.f32 %v1203_v27, 0.0 }
 0x1f6   :  { %v841_v31 = vpop.f32.mrf.mxu2  ;;  %v1070_v32 = vpop.f32.mrf.mxu3 }
 0x1f7   :  { %v1803_v33 = vpack.c.bf16 %v1259_v29, %v1258_v28  ;;  %v441_v34 = vpop.f32.mrf.mxu0  ;;  %v614_v35 = vpop.f32.mrf.mxu1  ;;  %v915_v36 = vmax.f32 %v686_v30, %v841_v31 }
 0x1f8   :  { %v687_v38 = vmax.f32 %v441_v34, %v614_v35 }
 0x1f9   :  { %1855 = vst [vmem:[%s2269_s3 + $0xa8] sm:$0xff] %v1803_v33   ;;  %v1144_v37 = vmax.f32 %v915_v36, %v1070_v32 }
 0x1fb   :  { %v1204_v45 = vadd.f32 %v2229_v24, %v1144_v37 }
 0x1fd   :  { %v1260_v48 = vmax.f32 %v1204_v45, 0.0 }
 0x1fe   :  { %v843_v39 = vpop.f32.mrf.mxu2  ;;  %v1072_v40 = vpop.f32.mrf.mxu3 }
 0x1ff   :  { %v916_v41 = vmax.f32 %v687_v38, %v843_v39  ;;  %v444_v43 = vpop.f32.mrf.mxu0  ;;  %v617_v44 = vpop.f32.mrf.mxu1 }
 0x200   :  { %v688_v50 = vmax.f32 %v444_v43, %v617_v44 }
 0x201   :  { %v1145_v46 = vmax.f32 %v916_v41, %v1072_v40 }
 0x203   :  { %v1205_v47 = vadd.f32 %v2229_v24, %v1145_v46 }
 0x205   :  { %v1261_v49 = vmax.f32 %v1205_v47, 0.0 }
 0x206   :  { %v846_v51 = vpop.f32.mrf.mxu2  ;;  %v1075_v52 = vpop.f32.mrf.mxu3 }
 0x207   :  { %v1808_v53 = vpack.c.bf16 %v1261_v49, %v1260_v48  ;;  %v446_v54 = vpop.f32.mrf.mxu0  ;;  %v619_v55 = vpop.f32.mrf.mxu1  ;;  %v917_v56 = vmax.f32 %v688_v50, %v846_v51 }
 0x208   :  { %v689_v58 = vmax.f32 %v446_v54, %v619_v55 }
 0x209   :  { %1856 = vst [vmem:[%s2269_s3 + $0xb0] sm:$0xff] %v1808_v53   ;;  %v1146_v57 = vmax.f32 %v917_v56, %v1075_v52 }
 0x20b   :  { %v1206_v0 = vadd.f32 %v2229_v24, %v1146_v57 }
 0x20d   :  { %v1262_v3 = vmax.f32 %v1206_v0, 0.0 }
 0x20e   :  { %v848_v59 = vpop.f32.mrf.mxu2  ;;  %v1077_v60 = vpop.f32.mrf.mxu3 }
 0x20f   :  { %v918_v61 = vmax.f32 %v689_v58, %v848_v59  ;;  %v449_v62 = vpop.f32.mrf.mxu0  ;;  %v622_v63 = vpop.f32.mrf.mxu1 }
 0x210   :  { %v690_v5 = vmax.f32 %v449_v62, %v622_v63 }
 0x211   :  { %v1147_v1 = vmax.f32 %v918_v61, %v1077_v60 }
 0x213   :  { %v1207_v2 = vadd.f32 %v2229_v24, %v1147_v1 }
 0x215   :  { %v1263_v4 = vmax.f32 %v1207_v2, 0.0 }
 0x216   :  { %v851_v6 = vpop.f32.mrf.mxu2  ;;  %v1080_v7 = vpop.f32.mrf.mxu3 }
 0x217   :  { %v1813_v8 = vpack.c.bf16 %v1263_v4, %v1262_v3  ;;  %v451_v9 = vpop.f32.mrf.mxu0  ;;  %v624_v10 = vpop.f32.mrf.mxu1  ;;  %v919_v11 = vmax.f32 %v690_v5, %v851_v6 }
 0x218   :  { %v691_v13 = vmax.f32 %v451_v9, %v624_v10 }
 0x219   :  { %1857 = vst [vmem:[%s2269_s3 + $0xb8] sm:$0xff] %v1813_v8   ;;  %v1148_v12 = vmax.f32 %v919_v11, %v1080_v7 }
 0x21b   :  { %v1208_v19 = vadd.f32 %v2229_v24, %v1148_v12 }
 0x21d   :  { %v1264_v22 = vmax.f32 %v1208_v19, 0.0 }
 0x21e   :  { %v853_v14 = vpop.f32.mrf.mxu2  ;;  %v1082_v15 = vpop.f32.mrf.mxu3 }
 0x21f   :  { %v920_v16 = vmax.f32 %v691_v13, %v853_v14  ;;  %v454_v17 = vpop.f32.mrf.mxu0  ;;  %v627_v18 = vpop.f32.mrf.mxu1 }
 0x220   :  { %v692_v42 = vmax.f32 %v454_v17, %v627_v18 }
 0x221   :  { %v1149_v20 = vmax.f32 %v920_v16, %v1082_v15 }
 0x223   :  { %v1209_v21 = vadd.f32 %v2229_v24, %v1149_v20 }
 0x225   :  { %v1265_v23 = vmax.f32 %v1209_v21, 0.0 }
 0x226   :  { %v856_v25 = vpop.f32.mrf.mxu2  ;;  %v1085_v26 = vpop.f32.mrf.mxu3 }
 0x227   :  { %v1818_v27 = vpack.c.bf16 %v1265_v23, %v1264_v22  ;;  %v456_v28 = vpop.f32.mrf.mxu0  ;;  %v629_v29 = vpop.f32.mrf.mxu1  ;;  %v921_v30 = vmax.f32 %v692_v42, %v856_v25 }
 0x228   :  { %v693_v32 = vmax.f32 %v456_v28, %v629_v29 }
 0x229   :  { %1858 = vst [vmem:[%s2269_s3 + $0xc0] sm:$0xff] %v1818_v27   ;;  %v1150_v31 = vmax.f32 %v921_v30, %v1085_v26 }
 0x22b   :  { %v1210_v38 = vadd.f32 %v2229_v24, %v1150_v31 }
 0x22d   :  { %v1266_v41 = vmax.f32 %v1210_v38, 0.0 }
 0x22e   :  { %v858_v33 = vpop.f32.mrf.mxu2  ;;  %v1087_v34 = vpop.f32.mrf.mxu3 }
 0x22f   :  { %v922_v35 = vmax.f32 %v693_v32, %v858_v33  ;;  %v459_v36 = vpop.f32.mrf.mxu0  ;;  %v632_v37 = vpop.f32.mrf.mxu1 }
 0x230   :  { %v694_v44 = vmax.f32 %v459_v36, %v632_v37 }
 0x231   :  { %v1151_v39 = vmax.f32 %v922_v35, %v1087_v34 }
 0x233   :  { %v1211_v40 = vadd.f32 %v2229_v24, %v1151_v39 }
 0x235   :  { %v1267_v43 = vmax.f32 %v1211_v40, 0.0 }
 0x236   :  { %v861_v45 = vpop.f32.mrf.mxu2  ;;  %v1090_v46 = vpop.f32.mrf.mxu3 }
 0x237   :  { %v1823_v47 = vpack.c.bf16 %v1267_v43, %v1266_v41  ;;  %v461_v48 = vpop.f32.mrf.mxu0  ;;  %v634_v49 = vpop.f32.mrf.mxu1  ;;  %v923_v50 = vmax.f32 %v694_v44, %v861_v45 }
 0x238   :  { %v695_v52 = vmax.f32 %v461_v48, %v634_v49 }
 0x239   :  { %1859 = vst [vmem:[%s2269_s3 + $0xc8] sm:$0xff] %v1823_v47   ;;  %v1152_v51 = vmax.f32 %v923_v50, %v1090_v46 }
 0x23b   :  { %v1212_v58 = vadd.f32 %v2229_v24, %v1152_v51 }
 0x23d   :  { %v1268_v61 = vmax.f32 %v1212_v58, 0.0 }
 0x23e   :  { %v863_v53 = vpop.f32.mrf.mxu2  ;;  %v1092_v54 = vpop.f32.mrf.mxu3 }
 0x23f   :  { %v924_v55 = vmax.f32 %v695_v52, %v863_v53  ;;  %v464_v56 = vpop.f32.mrf.mxu0  ;;  %v637_v57 = vpop.f32.mrf.mxu1 }
 0x240   :  { %v696_v63 = vmax.f32 %v464_v56, %v637_v57 }
 0x241   :  { %v1153_v59 = vmax.f32 %v924_v55, %v1092_v54 }
 0x243   :  { %v1213_v60 = vadd.f32 %v2229_v24, %v1153_v59 }
 0x245   :  { %v1269_v62 = vmax.f32 %v1213_v60, 0.0 }
 0x246   :  { %v866_v0 = vpop.f32.mrf.mxu2  ;;  %v1095_v1 = vpop.f32.mrf.mxu3 }
 0x247   :  { %v1828_v2 = vpack.c.bf16 %v1269_v62, %v1268_v61  ;;  %v925_v3 = vmax.f32 %v696_v63, %v866_v0  ;;  %v466_v4 = vpop.f32.mrf.mxu0  ;;  %v639_v5 = vpop.f32.mrf.mxu1 }
 0x248   :  { %v697_v7 = vmax.f32 %v466_v4, %v639_v5 }
 0x249   :  { %1860 = vst [vmem:[%s2269_s3 + $0xd0] sm:$0xff] %v1828_v2   ;;  %v1154_v6 = vmax.f32 %v925_v3, %v1095_v1 }
 0x24b   :  { %v1214_v11 = vadd.f32 %v2229_v24, %v1154_v6 }
 0x24d   :  { %v1270_v14 = vmax.f32 %v1214_v11, 0.0 }
 0x24e   :  { %v868_v8 = vpop.f32.mrf.mxu2  ;;  %v1097_v10 = vpop.f32.mrf.mxu3 }
 0x24f   :  { %v926_v9 = vmax.f32 %v697_v7, %v868_v8 }
 0x251   :  { %v1155_v12 = vmax.f32 %v926_v9, %v1097_v10 }
 0x253   :  { %v1215_v13 = vadd.f32 %v2229_v24, %v1155_v12 }
 0x255   :  { %v1271_v15 = vmax.f32 %v1215_v13, 0.0 }
 0x257   :  { %v1833_v16 = vpack.c.bf16 %v1271_v15, %v1270_v14 }
 0x259   :  { %1861 = vst [vmem:[%s2269_s3 + $0xd8] sm:$0xff] %v1833_v16  }

// kernel: convnet_forward.4
= control target key start
LH: loop header
LB: loop body
LE: loop exit
PB: predicated region body
PF: predicated region fallthrough
CT: control target
= control target key end

     0   :  { %vm551_vm0 = vcmask 523264   ;;  %s5152_s1 = inlined_call_operand.vmem [shape: bf16[4,576,128], index: 1, kind: input, shape index: {}]   ;;  %s5153_s0 = inlined_call_operand.vmem [shape: bf16[128,576], index: 0, kind: input, shape index: {}]   ;;  %s5154_s2 = inlined_call_operand.vmem [shape: f32[1,128], index: 2, kind: input, shape index: {}]   ;;  %s5155_s3 = inlined_call_operand.vmem [shape: bf16[128,128], index: 3, kind: output, shape index: {}]  }
   0x1   :  { %v3574_v0 = vld [vmem:[%s5152_s1 + $0x38] sm:$0xff]  ;;  %v3573_v4 = vld [vmem:[%s5152_s1 + $0x30] sm:$0xff]  ;;  %v3572_v8 = vld [vmem:[%s5152_s1 + $0x28] sm:$0xff] }
   0x2   :  { %v3582_v1 = vld [vmem:[%s5152_s1 + $0x78] sm:$0xff]  ;;  %576 = vmatpush.bf16.msra.mxu0 %v3574_v0  ;;  %v3581_v5 = vld [vmem:[%s5152_s1 + $0x70] sm:$0xff]  ;;  %v3580_v9 = vld [vmem:[%s5152_s1 + $0x68] sm:$0xff] }
   0x3   :  { %v3590_v2 = vld [vmem:[%s5152_s1 + $0xb8] sm:$0xff]  ;;  %625 = vmatpush.bf16.msra.mxu1 %v3582_v1  ;;  %v3589_v6 = vld [vmem:[%s5152_s1 + $0xb0] sm:$0xff]  ;;  %v3588_v10 = vld [vmem:[%s5152_s1 + $0xa8] sm:$0xff] }
   0x4   :  { %v3598_v3 = vld [vmem:[%s5152_s1 + $0xf8] sm:$0xff]  ;;  %674 = vmatpush.bf16.msra.mxu2 %v3590_v2  ;;  %v3597_v7 = vld [vmem:[%s5152_s1 + $0xf0] sm:$0xff]  ;;  %v3596_v11 = vld [vmem:[%s5152_s1 + $0xe8] sm:$0xff] }
   0x5   :  { %723 = vmatpush.bf16.msra.mxu3 %v3598_v3  ;;  %v3571_v12 = vld [vmem:[%s5152_s1 + $0x20] sm:$0xff]  ;;  %v3570_v16 = vld [vmem:[%s5152_s1 + $0x18] sm:$0xff]  ;;  %v3569_v20 = vld [vmem:[%s5152_s1 + $0x10] sm:$0xff] }
   0x6   :  { %577 = vmatpush.bf16.msra.mxu0 %v3573_v4  ;;  %v3579_v13 = vld [vmem:[%s5152_s1 + $0x60] sm:$0xff]  ;;  %v3578_v17 = vld [vmem:[%s5152_s1 + $0x58] sm:$0xff]  ;;  %v3577_v21 = vld [vmem:[%s5152_s1 + $0x50] sm:$0xff] }
   0x7   :  { %626 = vmatpush.bf16.msra.mxu1 %v3581_v5  ;;  %v3587_v14 = vld [vmem:[%s5152_s1 + $0xa0] sm:$0xff]  ;;  %v3586_v18 = vld [vmem:[%s5152_s1 + $0x98] sm:$0xff]  ;;  %v3585_v22 = vld [vmem:[%s5152_s1 + $0x90] sm:$0xff] }
   0x8   :  { %675 = vmatpush.bf16.msra.mxu2 %v3589_v6  ;;  %v3595_v15 = vld [vmem:[%s5152_s1 + $0xe0] sm:$0xff]  ;;  %v3594_v19 = vld [vmem:[%s5152_s1 + $0xd8] sm:$0xff]  ;;  %v3593_v23 = vld [vmem:[%s5152_s1 + $0xd0] sm:$0xff] }
   0x9   :  { %724 = vmatpush.bf16.msra.mxu3 %v3597_v7  ;;  %v3568_v24 = vld [vmem:[%s5152_s1 + $0x8] sm:$0xff]  ;;  %v3567_v28 = vld [vmem:[%s5152_s1] sm:$0xff]  ;;  %v3529_v33 = vld [vmem:[%s5153_s0 + $0x10] sm:$0xf0] }
   0xa   :  { %578 = vmatpush.bf16.msra.mxu0 %v3572_v8  ;;  %v3576_v25 = vld [vmem:[%s5152_s1 + $0x48] sm:$0xff]  ;;  %v3575_v29 = vld [vmem:[%s5152_s1 + $0x40] sm:$0xff]  ;;  %v2547_v35 = vld [vmem:[%s5153_s0 + $0x14] sm:$0xf0] }
   0xb   :  { %627 = vmatpush.bf16.msra.mxu1 %v3580_v9  ;;  %v3584_v26 = vld [vmem:[%s5152_s1 + $0x88] sm:$0xff]  ;;  %v3583_v30 = vld [vmem:[%s5152_s1 + $0x80] sm:$0xff]  ;;  %v3530_v37 = vld [vmem:[%s5153_s0 + $0x18] sm:$0xf0] }
   0xc   :  { %676 = vmatpush.bf16.msra.mxu2 %v3588_v10  ;;  %v3592_v27 = vld [vmem:[%s5152_s1 + $0xc8] sm:$0xff]  ;;  %v3591_v31 = vld [vmem:[%s5152_s1 + $0xc0] sm:$0xff]  ;;  %v3618_v40 = vld [vmem:[%s5152_s1 + $0x198] sm:$0xff] }
   0xd   :  { %725 = vmatpush.bf16.msra.mxu3 %v3596_v11  ;;  %v2545_v32 = vld [vmem:[%s5153_s0] sm:$0xf]  ;;  %v3527_v34 = vld [vmem:[%s5153_s0 + $0x4] sm:$0xf]  ;;  %v2553_v36 = vld [vmem:[%s5153_s0 + $0x8] sm:$0xf] }
   0xe   :  { %579 = vmatpush.bf16.msra.mxu0 %v3571_v12  ;;  %v3528_v38 = vld [vmem:[%s5153_s0 + $0xc] sm:$0xf]  ;;  %v2555_v39 = vld [vmem:[%s5153_s0 + $0x1c] sm:$0xf0]  ;;  %v3602_v41 = vld [vmem:[%s5152_s1 + $0x118] sm:$0xff]  ;;  %v3905_v42 = vor.u32 %v3529_v33, %v2545_v32  ;;  %v3907_v43 = vor.u32 %v3527_v34, %v2547_v35  ;;  %v3909_v44 = vor.u32 %v3530_v37, %v2553_v36 }
   0xf   :  { %628 = vmatpush.bf16.msra.mxu1 %v3579_v13  ;;  %v3911_v45 = vor.u32 %v3528_v38, %v2555_v39  ;;  %v3626_v46 = vld [vmem:[%s5152_s1 + $0x1d8] sm:$0xff]  ;;  %v3617_v48 = vld [vmem:[%s5152_s1 + $0x190] sm:$0xff]  ;;  %v3616_v52 = vld [vmem:[%s5152_s1 + $0x188] sm:$0xff] }
  0x10   :  { %677 = vmatpush.bf16.msra.mxu2 %v3587_v14  ;;  %5199 = vst [vmem:[#allocation2_spill] sm:$0xff] %v3907_v43  ;;  %v3610_v47 = vld [vmem:[%s5152_s1 + $0x158] sm:$0xff]  ;;  %v3601_v49 = vld [vmem:[%s5152_s1 + $0x110] sm:$0xff]  ;;  %v3624_v53 = vld [vmem:[%s5152_s1 + $0x1c8] sm:$0xff] }
  0x11   :  { %726 = vmatpush.bf16.msra.mxu3 %v3595_v15  ;;  %v3625_v50 = vld [vmem:[%s5152_s1 + $0x1d0] sm:$0xff]  ;;  %v3608_v54 = vld [vmem:[%s5152_s1 + $0x148] sm:$0xff]  ;;  %v3534_v56 = vld [vmem:[%s5153_s0 + $0x38] sm:$0xf0] }
  0x12   :  { %580 = vmatpush.bf16.msra.mxu0 %v3570_v16  ;;  %v3609_v51 = vld [vmem:[%s5152_s1 + $0x150] sm:$0xff]  ;;  %v2565_v55 = vld [vmem:[%s5153_s0 + $0x28] sm:$0xf]  ;;  %v3532_v57 = vld [vmem:[%s5153_s0 + $0x2c] sm:$0xf] }
  0x13   :  { %629 = vmatpush.bf16.msra.mxu1 %v3578_v17  ;;  %v2567_v58 = vld [vmem:[%s5153_s0 + $0x3c] sm:$0xf0]  ;;  %v2573_v59 = vld [vmem:[%s5153_s0 + $0x30] sm:$0xf]  ;;  %v3535_v60 = vld [vmem:[%s5153_s0 + $0x40] sm:$0xf0]  ;;  %v3968_v63 = vor.u32 %v3534_v56, %v2565_v55 }
  0x14   :  { %678 = vmatpush.bf16.msra.mxu2 %v3586_v18  ;;  %v3533_v61 = vld [vmem:[%s5153_s0 + $0x34] sm:$0xf]  ;;  %v2575_v62 = vld [vmem:[%s5153_s0 + $0x44] sm:$0xf0]  ;;  %v3970_v0 = vor.u32 %v3532_v57, %v2567_v58  ;;  %v3972_v1 = vor.u32 %v3535_v60, %v2573_v59  ;;  %v3615_v3 = vld [vmem:[%s5152_s1 + $0x180] sm:$0xff] }
  0x15   :  { %727 = vmatpush.bf16.msra.mxu3 %v3594_v19  ;;  %v3974_v2 = vor.u32 %v3533_v61, %v2575_v62  ;;  %v3623_v4 = vld [vmem:[%s5152_s1 + $0x1c0] sm:$0xff]  ;;  %v2585_v6 = vld [vmem:[%s5153_s0 + $0x50] sm:$0xf]  ;;  %v3537_v8 = vld [vmem:[%s5153_s0 + $0x54] sm:$0xf] }
  0x16   :  { %581 = vmatpush.bf16.msra.mxu0 %v3569_v20  ;;  %5200 = vst [vmem:[#allocation3_spill] sm:$0xff] %v3970_v0  ;;  %v3607_v5 = vld [vmem:[%s5152_s1 + $0x140] sm:$0xff]  ;;  %v2587_v9 = vld [vmem:[%s5153_s0 + $0x64] sm:$0xf0]  ;;  %v2593_v10 = vld [vmem:[%s5153_s0 + $0x58] sm:$0xf] }
  0x17   :  { %630 = vmatpush.bf16.msra.mxu1 %v3577_v21  ;;  %v3539_v7 = vld [vmem:[%s5153_s0 + $0x60] sm:$0xf0]  ;;  %v3540_v11 = vld [vmem:[%s5153_s0 + $0x68] sm:$0xf0]  ;;  %v3538_v12 = vld [vmem:[%s5153_s0 + $0x5c] sm:$0xf]  ;;  %v4015_v15 = vor.u32 %v3537_v8, %v2587_v9 }
  0x18   :  { %679 = vmatpush.bf16.msra.mxu2 %v3585_v22  ;;  %v2595_v13 = vld [vmem:[%s5153_s0 + $0x6c] sm:$0xf0]  ;;  %v4013_v14 = vor.u32 %v3539_v7, %v2585_v6  ;;  %v4017_v16 = vor.u32 %v3540_v11, %v2593_v10  ;;  %v3614_v18 = vld [vmem:[%s5152_s1 + $0x178] sm:$0xff]  ;;  %v3600_v19 = vld [vmem:[%s5152_s1 + $0x108] sm:$0xff] }
  0x19   :  { %728 = vmatpush.bf16.msra.mxu3 %v3593_v23  ;;  %5201 = vst [vmem:[#allocation4_spill] sm:$0xff] %v4015_v15  ;;  %v4019_v17 = vor.u32 %v3538_v12, %v2595_v13  ;;  %v3622_v20 = vld [vmem:[%s5152_s1 + $0x1b8] sm:$0xff]  ;;  %v3544_v23 = vld [vmem:[%s5153_s0 + $0x88] sm:$0xf0]  ;;  %v3613_v34 = vld [vmem:[%s5152_s1 + $0x170] sm:$0xff] }
  0x1a   :  { %582 = vmatpush.bf16.msra.mxu0 %v3568_v24  ;;  %5202 = vst [vmem:[#allocation5_spill] sm:$0xff] %v4017_v16  ;;  %v3606_v21 = vld [vmem:[%s5152_s1 + $0x138] sm:$0xff]  ;;  %v3621_v35 = vld [vmem:[%s5152_s1 + $0x1b0] sm:$0xff]  ;;  %v2625_v37 = vld [vmem:[%s5153_s0 + $0xa0] sm:$0xf] }
  0x1b   :  { %631 = vmatpush.bf16.msra.mxu1 %v3576_v25  ;;  %v2605_v22 = vld [vmem:[%s5153_s0 + $0x78] sm:$0xf]  ;;  %v3542_v24 = vld [vmem:[%s5153_s0 + $0x7c] sm:$0xf]  ;;  %v2607_v25 = vld [vmem:[%s5153_s0 + $0x8c] sm:$0xf0] }
  0x1c   :  { %680 = vmatpush.bf16.msra.mxu2 %v3584_v26  ;;  %v2613_v26 = vld [vmem:[%s5153_s0 + $0x80] sm:$0xf]  ;;  %v3605_v36 = vld [vmem:[%s5152_s1 + $0x130] sm:$0xff]  ;;  %v3547_v39 = vld [vmem:[%s5153_s0 + $0xa4] sm:$0xf] }
  0x1d   :  { %729 = vmatpush.bf16.msra.mxu3 %v3592_v27  ;;  %v3545_v27 = vld [vmem:[%s5153_s0 + $0x90] sm:$0xf0]  ;;  %v3620_v55 = vld [vmem:[%s5152_s1 + $0x1a8] sm:$0xff]  ;;  %v3554_v58 = vld [vmem:[%s5153_s0 + $0xd8] sm:$0xf0] }
  0x1e   :  { %583 = vmatpush.bf16.msra.mxu0 %v3567_v28  ;;  %v3543_v28 = vld [vmem:[%s5153_s0 + $0x84] sm:$0xf]  ;;  %v4065_v32 = vor.u32 %v3545_v27, %v2613_v26  ;;  %v3549_v38 = vld [vmem:[%s5153_s0 + $0xb0] sm:$0xf0]  ;;  %v3604_v56 = vld [vmem:[%s5152_s1 + $0x128] sm:$0xff] }
  0x1f   :  { %632 = vmatpush.bf16.msra.mxu1 %v3575_v29  ;;  %v2615_v29 = vld [vmem:[%s5153_s0 + $0x94] sm:$0xf0]  ;;  %v2645_v57 = vld [vmem:[%s5153_s0 + $0xc8] sm:$0xf]  ;;  %v3552_v59 = vld [vmem:[%s5153_s0 + $0xcc] sm:$0xf] }
  0x20   :  { %681 = vmatpush.bf16.msra.mxu2 %v3583_v30  ;;  %v4061_v30 = vor.u32 %v3544_v23, %v2605_v22  ;;  %5204 = vst [vmem:[#allocation7_spill] sm:$0xff] %v4065_v32  ;;  %v4067_v33 = vor.u32 %v3543_v28, %v2615_v29  ;;  %v2647_v60 = vld [vmem:[%s5153_s0 + $0xdc] sm:$0xf0]  ;;  %v2653_v61 = vld [vmem:[%s5153_s0 + $0xd0] sm:$0xf]  ;;  %v3646_v28 = vld [vmem:[%s5152_s1 + $0x278] sm:$0xff] }
  0x21   :  { %730 = vmatpush.bf16.msra.mxu3 %v3591_v31  ;;  %584 = vmatmul.bf16.vlgmr.msra.gmra.mxu0 %v3905_v42  ;;  %v4063_v31 = vor.u32 %v3542_v24, %v2607_v25  ;;  %v3555_v62 = vld [vmem:[%s5153_s0 + $0xe0] sm:$0xf0]  ;;  %v4156_v6 = vor.u32 %v3552_v59, %v2647_v60  ;;  %v2665_v12 = vld [vmem:[%s5153_s0 + $0xf0] sm:$0xf]  ;;  %v3558_v22 = vld [vmem:[%s5153_s0 + $0xfc] sm:$0xf] }
  0x22   :  { %776 = vmatpush.bf16.msrb.mxu0 %v3602_v41  ;;  %633 = vmatmul.bf16.vlgmr.msra.gmra.mxu1 %v3907_v43  ;;  %v2633_v41 = vld [vmem:[%s5153_s0 + $0xa8] sm:$0xf]  ;;  %v4158_v7 = vor.u32 %v3555_v62, %v2653_v61  ;;  %v3611_v9 = vld [vmem:[%s5152_s1 + $0x160] sm:$0xff]  ;;  %v2675_v23 = vld [vmem:[%s5153_s0 + $0x10c] sm:$0xf0] }
  0x23   :  { %682 = vmatmul.bf16.vlgmr.msra.gmra.mxu2 %v3909_v44  ;;  %1110 = vmatpush.bf16.msrb.mxu1 %v3610_v47  ;;  %5203 = vst [vmem:[#allocation6_spill] sm:$0xff] %v4063_v31  ;;  %v3548_v47 = vld [vmem:[%s5153_s0 + $0xac] sm:$0xf]  ;;  %v3619_v10 = vld [vmem:[%s5152_s1 + $0x1a0] sm:$0xff]  ;;  %v4205_v27 = vor.u32 %v3558_v22, %v2675_v23  ;;  %v3634_v29 = vld [vmem:[%s5152_s1 + $0x218] sm:$0xff] }
  0x24   :  { %1159 = vmatpush.bf16.msrb.mxu2 %v3618_v40  ;;  %731 = vmatmul.bf16.vlgmr.msra.gmra.mxu3 %v3911_v45  ;;  %v2627_v40 = vld [vmem:[%s5153_s0 + $0xb4] sm:$0xf0]  ;;  %5207 = vst [vmem:[#allocation10_spill] sm:$0xff] %v4156_v6  ;;  %v3603_v11 = vld [vmem:[%s5152_s1 + $0x120] sm:$0xff]  ;;  %v2561_v59 = vld [vmem:[%s5153_s0 + $0x10] sm:$0xf] }
  0x25   :  { %1208 = vmatpush.bf16.msrb.mxu3 %v3626_v46  ;;  %v3550_v46 = vld [vmem:[%s5153_s0 + $0xb8] sm:$0xf0]  ;;  %5208 = vst [vmem:[#allocation11_spill] sm:$0xff] %v4158_v7  ;;  %v3559_v13 = vld [vmem:[%s5153_s0 + $0x100] sm:$0xf0]  ;;  %v3637_v23 = vld [vmem:[%s5152_s1 + $0x230] sm:$0xff] }
  0x26   :  { %777 = vmatpush.bf16.msrb.mxu0 %v3601_v49  ;;  %v4106_v49 = vor.u32 %v3549_v38, %v2625_v37  ;;  %v4199_v24 = vor.u32 %v3559_v13, %v2665_v12  ;;  %5212 = vst [vmem:[#allocation15_spill] sm:$0xff] %v4205_v27  ;;  %v3564_v37 = vld [vmem:[%s5153_s0 + $0x128] sm:$0xf0]  ;;  %v3562_v38 = vld [vmem:[%s5153_s0 + $0x11c] sm:$0xf] }
  0x27   :  { %1111 = vmatpush.bf16.msrb.mxu1 %v3609_v51  ;;  %v4110_v51 = vor.u32 %v3550_v46, %v2633_v41  ;;  %v3565_v41 = vld [vmem:[%s5153_s0 + $0x130] sm:$0xf0]  ;;  %v3563_v46 = vld [vmem:[%s5153_s0 + $0x124] sm:$0xf] }
  0x28   :  { %1160 = vmatpush.bf16.msrb.mxu2 %v3617_v48  ;;  %v2635_v48 = vld [vmem:[%s5153_s0 + $0xbc] sm:$0xf0]  ;;  %5209 = vst [vmem:[#allocation12_spill] sm:$0xff] %v4199_v24  ;;  %v3531_v60 = vld [vmem:[%s5153_s0 + $0x20] sm:$0xf0] }
  0x29   :  { %1209 = vmatpush.bf16.msrb.mxu3 %v3625_v50  ;;  %v4108_v50 = vor.u32 %v3547_v39, %v2627_v40  ;;  %5206 = vst [vmem:[#allocation9_spill] sm:$0xff] %v4110_v51  ;;  %v2687_v39 = vld [vmem:[%s5153_s0 + $0x12c] sm:$0xf0]  ;;  %v2693_v40 = vld [vmem:[%s5153_s0 + $0x120] sm:$0xf]  ;;  %v4274_v61 = vor.u32 %v3531_v60, %v2561_v59 }
  0x2a   :  { %778 = vmatpush.bf16.msrb.mxu0 %v3600_v19  ;;  %v2667_v19 = vld [vmem:[%s5153_s0 + $0x104] sm:$0xf0] }
  0x2b   :  { %1112 = vmatpush.bf16.msrb.mxu1 %v3608_v54  ;;  %5205 = vst [vmem:[#allocation8_spill] sm:$0xff] %v4108_v50  ;;  %v3599_v54 = vld [vmem:[%s5152_s1 + $0x100] sm:$0xff] }
  0x2c   :  { %1161 = vmatpush.bf16.msrb.mxu2 %v3616_v52  ;;  %v4112_v52 = vor.u32 %v3548_v47, %v2635_v48  ;;  %v2695_v47 = vld [vmem:[%s5153_s0 + $0x134] sm:$0xf0] }
  0x2d   :  { %1210 = vmatpush.bf16.msrb.mxu3 %v3624_v53  ;;  %v3612_v53 = vld [vmem:[%s5152_s1 + $0x168] sm:$0xff] }
  0x2e   :  { %779 = vmatpush.bf16.msrb.mxu0 %v3599_v54  ;;  %v4251_v54 = vor.u32 %v3565_v41, %v2693_v40 }
  0x2f   :  { %1113 = vmatpush.bf16.msrb.mxu1 %v3607_v5  ;;  %v4154_v5 = vor.u32 %v3554_v58, %v2645_v57  ;;  %v3633_v57 = vld [vmem:[%s5152_s1 + $0x210] sm:$0xff] }
  0x30   :  { %1162 = vmatpush.bf16.msrb.mxu2 %v3615_v3  ;;  %v3553_v3 = vld [vmem:[%s5153_s0 + $0xd4] sm:$0xf]  ;;  %5214 = vst [vmem:[#allocation17_spill] sm:$0xff] %v4251_v54 }
  0x31   :  { %589 = vmatmul.bf16.gmra.mxu0 %v3968_v63  ;;  %1211 = vmatpush.bf16.msrb.mxu3 %v3623_v4  ;;  %v2655_v4 = vld [vmem:[%s5153_s0 + $0xe4] sm:$0xf0]  ;;  %v3653_v58 = vld [vmem:[%s5152_s1 + $0x2b0] sm:$0xff] }
  0x32   :  { %638 = vmatmul.bf16.gmra.mxu1 %v3970_v0  ;;  %v4160_v8 = vor.u32 %v3553_v3, %v2655_v4  ;;  %1257 = vmatpush.bf16.msra.mxu0 %v3634_v29  ;;  %v3536_v29 = vld [vmem:[%s5153_s0 + $0x48] sm:$0xf0] }
  0x33   :  { %687 = vmatmul.bf16.gmra.mxu2 %v3972_v1  ;;  %1114 = vmatpush.bf16.msrb.mxu1 %v3606_v21  ;;  %v3560_v21 = vld [vmem:[%s5153_s0 + $0x108] sm:$0xf0] }
  0x34   :  { %736 = vmatmul.bf16.gmra.mxu3 %v3974_v2  ;;  %1163 = vmatpush.bf16.msrb.mxu2 %v3614_v18  ;;  %v3557_v18 = vld [vmem:[%s5153_s0 + $0xf4] sm:$0xf] }
  0x35   :  { %1212 = vmatpush.bf16.msrb.mxu3 %v3622_v20  ;;  %v2673_v20 = vld [vmem:[%s5153_s0 + $0xf8] sm:$0xf]  ;;  %v4201_v25 = vor.u32 %v3557_v18, %v2667_v19 }
  0x36   :  { %v4203_v26 = vor.u32 %v3560_v21, %v2673_v20  ;;  %1258 = vmatpush.bf16.msra.mxu0 %v3633_v57 }
  0x37   :  { %1115 = vmatpush.bf16.msrb.mxu1 %v3605_v36  ;;  %5210 = vst [vmem:[#allocation13_spill] sm:$0xff] %v4201_v25  ;;  %v2685_v36 = vld [vmem:[%s5153_s0 + $0x118] sm:$0xf] }
  0x38   :  { %1164 = vmatpush.bf16.msrb.mxu2 %v3613_v34  ;;  %5211 = vst [vmem:[#allocation14_spill] sm:$0xff] %v4203_v26  ;;  %v3654_v34 = vld [vmem:[%s5152_s1 + $0x2b8] sm:$0xff]  ;;  %v4247_v48 = vor.u32 %v3564_v37, %v2685_v36 }
  0x39   :  { %1213 = vmatpush.bf16.msrb.mxu3 %v3621_v35  ;;  %v3638_v35 = vld [vmem:[%s5152_s1 + $0x238] sm:$0xff] }
  0x3b   :  { %1116 = vmatpush.bf16.msrb.mxu1 %v3604_v56  ;;  %v3645_v56 = vld [vmem:[%s5152_s1 + $0x270] sm:$0xff] }
  0x3c   :  { %1165 = vmatpush.bf16.msrb.mxu2 %v3612_v53  ;;  %v4249_v53 = vor.u32 %v3562_v38, %v2687_v39 }
  0x3d   :  { %1214 = vmatpush.bf16.msrb.mxu3 %v3620_v55  ;;  %v4253_v55 = vor.u32 %v3563_v46, %v2695_v47  ;;  %v3643_v46 = vld [vmem:[%s5152_s1 + $0x260] sm:$0xff] }
  0x3e   :  { %5213 = vst [vmem:[#allocation16_spill] sm:$0xff] %v4249_v53  ;;  %v3631_v47 = vld [vmem:[%s5152_s1 + $0x200] sm:$0xff] }
  0x3f   :  { %1117 = vmatpush.bf16.msrb.mxu1 %v3603_v11  ;;  %5215 = vst [vmem:[#allocation18_spill] sm:$0xff] %v4253_v55  ;;  %v3652_v11 = vld [vmem:[%s5152_s1 + $0x2a8] sm:$0xff] }
  0x40   :  { %1166 = vmatpush.bf16.msrb.mxu2 %v3611_v9  ;;  %v3644_v9 = vld [vmem:[%s5152_s1 + $0x268] sm:$0xff] }
  0x41   :  { %594 = vmatmul.bf16.gmra.mxu0 %v4013_v14  ;;  %1215 = vmatpush.bf16.msrb.mxu3 %v3619_v10  ;;  %v3632_v10 = vld [vmem:[%s5152_s1 + $0x208] sm:$0xff] }
  0x42   :  { %643 = vmatmul.bf16.gmra.mxu1 %v4015_v15  ;;  %1259 = vmatpush.bf16.msra.mxu0 %v3632_v10  ;;  %v3541_v10 = vld [vmem:[%s5153_s0 + $0x70] sm:$0xf0] }
  0x43   :  { %692 = vmatmul.bf16.gmra.mxu2 %v4017_v16  ;;  %1310 = vmatpush.bf16.msra.mxu1 %v3638_v35 }
  0x44   :  { %741 = vmatmul.bf16.gmra.mxu3 %v4019_v17  ;;  %1660 = vmatpush.bf16.msra.mxu2 %v3646_v28  ;;  %v2581_v28 = vld [vmem:[%s5153_s0 + $0x38] sm:$0xf] }
  0x45   :  { %1709 = vmatpush.bf16.msra.mxu3 %v3654_v34  ;;  %v4301_v36 = vor.u32 %v3536_v29, %v2581_v28  ;;  %v3642_v28 = vld [vmem:[%s5152_s1 + $0x258] sm:$0xff] }
  0x46   :  { %1260 = vmatpush.bf16.msra.mxu0 %v3631_v47  ;;  %v3630_v29 = vld [vmem:[%s5152_s1 + $0x1f8] sm:$0xff] }
  0x47   :  { %1311 = vmatpush.bf16.msra.mxu1 %v3637_v23 }
  0x48   :  { %1661 = vmatpush.bf16.msra.mxu2 %v3645_v56  ;;  %v3651_v56 = vld [vmem:[%s5152_s1 + $0x2a0] sm:$0xff] }
  0x49   :  { %1710 = vmatpush.bf16.msra.mxu3 %v3653_v58 }
  0x4a   :  { %1261 = vmatpush.bf16.msra.mxu0 %v3630_v29 }
  0x4c   :  { %1662 = vmatpush.bf16.msra.mxu2 %v3644_v9  ;;  %v2601_v9 = vld [vmem:[%s5153_s0 + $0x60] sm:$0xf] }
  0x4d   :  { %1711 = vmatpush.bf16.msra.mxu3 %v3652_v11 }
  0x50   :  { %1663 = vmatpush.bf16.msra.mxu2 %v3643_v46 }
  0x51   :  { %599 = vmatmul.bf16.gmra.mxu0 %v4061_v30  ;;  %1712 = vmatpush.bf16.msra.mxu3 %v3651_v56  ;;  %v3636_v56 = vld [vmem:[%s5152_s1 + $0x228] sm:$0xff] }
  0x52   :  { %648 = vmatmul.bf16.gmra.mxu1 %v4063_v31 }
  0x53   :  { %697 = vmatmul.bf16.gmra.mxu2 %v4065_v32  ;;  %1312 = vmatpush.bf16.msra.mxu1 %v3636_v56 }
  0x54   :  { %746 = vmatmul.bf16.gmra.mxu3 %v4067_v33  ;;  %1664 = vmatpush.bf16.msra.mxu2 %v3642_v28 }
  0x61   :  { %604 = vmatmul.bf16.gmra.mxu0 %v4106_v49 }
  0x62   :  { %653 = vmatmul.bf16.gmra.mxu1 %v4108_v50 }
  0x63   :  { %702 = vmatmul.bf16.gmra.mxu2 %v4110_v51 }
  0x64   :  { %751 = vmatmul.bf16.gmra.mxu3 %v4112_v52 }
  0x71   :  { %609 = vmatmul.bf16.gmra.mxu0 %v4154_v5 }
  0x72   :  { %658 = vmatmul.bf16.gmra.mxu1 %v4156_v6 }
  0x73   :  { %707 = vmatmul.bf16.gmra.mxu2 %v4158_v7 }
  0x74   :  { %756 = vmatmul.bf16.gmra.mxu3 %v4160_v8 }
  0x81   :  { %614 = vmatmul.bf16.gmra.mxu0 %v4199_v24 }
  0x82   :  { %663 = vmatmul.bf16.gmra.mxu1 %v4201_v25 }
  0x83   :  { %712 = vmatmul.bf16.gmra.mxu2 %v4203_v26 }
  0x84   :  { %761 = vmatmul.bf16.gmra.mxu3 %v4205_v27 }
  0x91   :  { %619 = vmatmul.bf16.gmra.mxu0 %v4247_v48 }
  0x92   :  { %668 = vmatmul.bf16.gmra.mxu1 %v4249_v53 }
  0x93   :  { %717 = vmatmul.bf16.gmra.mxu2 %v4251_v54 }
  0x94   :  { %766 = vmatmul.bf16.gmra.mxu3 %v4253_v55 }
  0x9e   :  { %v585_v62 = vpop.f32.mrf.mxu0 }
  0x9f   :  { %v634_v3 = vpop.f32.mrf.mxu1 }
  0xa0   :  { %v635_v4 = vadd.f32 %v634_v3, %v585_v62 }
  0xa1   :  { %2847 = vmatmul.msk.bf16.vlgmr.msrb.gmra.mxu0 %vm551_vm0, %v4274_v61 }
  0xa2   :  { %1118 = vmatmul.bf16.vlgmr.msrb.gmra.mxu1 %v3905_v42 }
  0xa3   :  { %1167 = vmatmul.bf16.vlgmr.msrb.gmra.mxu2 %v3907_v43 }
  0xa4   :  { %1216 = vmatmul.bf16.vlgmr.msrb.gmra.mxu3 %v3909_v44 }
  0xa6   :  { %v683_v12 = vpop.f32.mrf.mxu2  ;;  %v587_v19 = vpop.f32.mrf.mxu0 }
  0xa7   :  { %v732_v13 = vpop.f32.mrf.mxu3  ;;  %v684_v18 = vadd.f32 %v683_v12, %v635_v4  ;;  %v636_v20 = vpop.f32.mrf.mxu1 }
  0xa8   :  { %v637_v21 = vadd.f32 %v636_v20, %v587_v19 }
  0xa9   :  { %v4290_v22 = vadd.f32 %v732_v13, %v684_v18  ;;  %v4327_v13 = vor.u32 %v3541_v10, %v2601_v9 }
  0xab   :  { %5216 = vst [vmem:[#allocation19_spill] sm:$0xff] %v4327_v13 }
  0xae   :  { %v685_v34 = vpop.f32.mrf.mxu2  ;;  %v590_v38 = vpop.f32.mrf.mxu0 }
  0xaf   :  { %v734_v35 = vpop.f32.mrf.mxu3  ;;  %v686_v37 = vadd.f32 %v685_v34, %v637_v21  ;;  %v639_v39 = vpop.f32.mrf.mxu1  ;;  %v3650_v34 = vld [vmem:[%s5152_s1 + $0x298] sm:$0xff] }
  0xb0   :  { %v640_v40 = vadd.f32 %v639_v39, %v590_v38  ;;  %1713 = vmatpush.bf16.msra.mxu3 %v3650_v34 }
  0xb1   :  { %v4303_v41 = vadd.f32 %v734_v35, %v686_v37  ;;  %2848 = vmatmul.msk.bf16.gmra.mxu0 %vm551_vm0, %v4301_v36 }
  0xb2   :  { %1123 = vmatmul.bf16.gmra.mxu1 %v3968_v63 }
  0xb3   :  { %1172 = vmatmul.bf16.gmra.mxu2 %v3970_v0 }
  0xb4   :  { %1221 = vmatmul.bf16.gmra.mxu3 %v3972_v1 }
  0xb6   :  { %v688_v57 = vpop.f32.mrf.mxu2  ;;  %v592_v60 = vpop.f32.mrf.mxu0 }
  0xb7   :  { %v737_v58 = vpop.f32.mrf.mxu3  ;;  %v689_v59 = vadd.f32 %v688_v57, %v640_v40  ;;  %v641_v62 = vpop.f32.mrf.mxu1  ;;  %v2621_v57 = vld [vmem:[%s5153_s0 + $0x88] sm:$0xf] }
  0xb8   :  { %v642_v3 = vadd.f32 %v641_v62, %v592_v60 }
  0xb9   :  { %v4319_v4 = vadd.f32 %v737_v58, %v689_v59  ;;  %v3546_v58 = vld [vmem:[%s5153_s0 + $0x98] sm:$0xf0] }
  0xba   :  { %v4356_v62 = vor.u32 %v3546_v58, %v2621_v57 }
  0xbc   :  { %5217 = vst [vmem:[#allocation20_spill] sm:$0xff] %v4356_v62 }
  0xbe   :  { %v690_v11 = vpop.f32.mrf.mxu2  ;;  %v595_v19 = vpop.f32.mrf.mxu0 }
  0xbf   :  { %v739_v12 = vpop.f32.mrf.mxu3  ;;  %v691_v18 = vadd.f32 %v690_v11, %v642_v3  ;;  %v644_v20 = vpop.f32.mrf.mxu1 }
  0xc0   :  { %v645_v21 = vadd.f32 %v644_v20, %v595_v19  ;;  %v3629_v19 = vld [vmem:[%s5152_s1 + $0x1f0] sm:$0xff] }
  0xc1   :  { %v4329_v23 = vadd.f32 %v739_v12, %v691_v18  ;;  %2849 = vmatmul.msk.bf16.gmra.mxu0 %vm551_vm0, %v4327_v13  ;;  %v3641_v18 = vld [vmem:[%s5152_s1 + $0x250] sm:$0xff] }
  0xc2   :  { %1128 = vmatmul.bf16.gmra.mxu1 %v4013_v14  ;;  %v3649_v20 = vld [vmem:[%s5152_s1 + $0x290] sm:$0xff]  ;;  %1665 = vmatpush.bf16.msra.mxu2 %v3641_v18  ;;  %v3648_v18 = vld [vmem:[%s5152_s1 + $0x288] sm:$0xff] }
  0xc3   :  { %1177 = vmatmul.bf16.gmra.mxu2 %v4015_v15  ;;  %1262 = vmatpush.bf16.msra.mxu0 %v3629_v19 }
  0xc4   :  { %1226 = vmatmul.bf16.gmra.mxu3 %v4017_v16 }
  0xc5   :  { %1714 = vmatpush.bf16.msra.mxu3 %v3649_v20 }
  0xc6   :  { %v693_v35 = vpop.f32.mrf.mxu2  ;;  %v597_v39 = vpop.f32.mrf.mxu0 }
  0xc7   :  { %v742_v37 = vpop.f32.mrf.mxu3  ;;  %v694_v38 = vadd.f32 %v693_v35, %v645_v21  ;;  %v646_v40 = vpop.f32.mrf.mxu1 }
  0xc8   :  { %v647_v46 = vadd.f32 %v646_v40, %v597_v39  ;;  %v2641_v39 = vld [vmem:[%s5153_s0 + $0xb0] sm:$0xf]  ;;  %v3551_v40 = vld [vmem:[%s5153_s0 + $0xc0] sm:$0xf0] }
  0xc9   :  { %v4345_v47 = vadd.f32 %v742_v37, %v694_v38  ;;  %v4382_v57 = vor.u32 %v3551_v40, %v2641_v39  ;;  %1715 = vmatpush.bf16.msra.mxu3 %v3648_v18  ;;  %v2661_v39 = vld [vmem:[%s5153_s0 + $0xd8] sm:$0xf]  ;;  %v3556_v40 = vld [vmem:[%s5153_s0 + $0xe8] sm:$0xf0]  ;;  %v3639_v18 = vld [vmem:[%s5152_s1 + $0x240] sm:$0xff] }
  0xcb   :  { %5218 = vst [vmem:[#allocation21_spill] sm:$0xff] %v4382_v57 }
  0xce   :  { %v695_v59 = vpop.f32.mrf.mxu2  ;;  %v600_v9 = vpop.f32.mrf.mxu0 }
  0xcf   :  { %v744_v60 = vpop.f32.mrf.mxu3  ;;  %v696_v3 = vadd.f32 %v695_v59, %v647_v46  ;;  %v649_v10 = vpop.f32.mrf.mxu1 }
  0xd0   :  { %v650_v11 = vadd.f32 %v649_v10, %v600_v9  ;;  %v3640_v10 = vld [vmem:[%s5152_s1 + $0x248] sm:$0xff] }
  0xd1   :  { %v4358_v12 = vadd.f32 %v744_v60, %v696_v3  ;;  %2850 = vmatmul.msk.bf16.gmra.mxu0 %vm551_vm0, %v4356_v62  ;;  %1666 = vmatpush.bf16.msra.mxu2 %v3640_v10 }
  0xd2   :  { %1133 = vmatmul.bf16.gmra.mxu1 %v4061_v30 }
  0xd3   :  { %1182 = vmatmul.bf16.gmra.mxu2 %v4063_v31 }
  0xd4   :  { %1231 = vmatmul.bf16.gmra.mxu3 %v4065_v32 }
  0xd5   :  { %1667 = vmatpush.bf16.msra.mxu2 %v3639_v18 }
  0xd6   :  { %v698_v21 = vpop.f32.mrf.mxu2  ;;  %v602_v34 = vpop.f32.mrf.mxu0 }
  0xd7   :  { %v747_v28 = vpop.f32.mrf.mxu3  ;;  %v699_v29 = vadd.f32 %v698_v21, %v650_v11  ;;  %v651_v35 = vpop.f32.mrf.mxu1  ;;  %v3628_v11 = vld [vmem:[%s5152_s1 + $0x1e8] sm:$0xff] }
  0xd8   :  { %v652_v37 = vadd.f32 %v651_v35, %v602_v34  ;;  %1263 = vmatpush.bf16.msra.mxu0 %v3628_v11 }
  0xd9   :  { %v4374_v38 = vadd.f32 %v747_v28, %v699_v29 }
  0xde   :  { %v700_v46 = vpop.f32.mrf.mxu2  ;;  %v605_v59 = vpop.f32.mrf.mxu0 }
  0xdf   :  { %v749_v56 = vpop.f32.mrf.mxu3  ;;  %v701_v58 = vadd.f32 %v700_v46, %v652_v37  ;;  %v654_v60 = vpop.f32.mrf.mxu1  ;;  %v3635_v37 = vld [vmem:[%s5152_s1 + $0x220] sm:$0xff] }
  0xe0   :  { %v655_v3 = vadd.f32 %v654_v60, %v605_v59  ;;  %1313 = vmatpush.bf16.msra.mxu1 %v3635_v37 }
  0xe1   :  { %v4384_v9 = vadd.f32 %v749_v56, %v701_v58  ;;  %2851 = vmatmul.msk.bf16.gmra.mxu0 %vm551_vm0, %v4382_v57  ;;  %v4411_v58 = vor.u32 %v3556_v40, %v2661_v39 }
  0xe2   :  { %1138 = vmatmul.bf16.gmra.mxu1 %v4106_v49 }
  0xe3   :  { %1187 = vmatmul.bf16.gmra.mxu2 %v4108_v50  ;;  %5219 = vst [vmem:[#allocation22_spill] sm:$0xff] %v4411_v58 }
  0xe4   :  { %1236 = vmatmul.bf16.gmra.mxu3 %v4110_v51 }
  0xe6   :  { %v703_v19 = vpop.f32.mrf.mxu2  ;;  %v607_v28 = vpop.f32.mrf.mxu0 }
  0xe7   :  { %v752_v20 = vpop.f32.mrf.mxu3  ;;  %v704_v21 = vadd.f32 %v703_v19, %v655_v3  ;;  %v656_v29 = vpop.f32.mrf.mxu1  ;;  %v3627_v19 = vld [vmem:[%s5152_s1 + $0x1e0] sm:$0xff] }
  0xe8   :  { %v657_v34 = vadd.f32 %v656_v29, %v607_v28  ;;  %1264 = vmatpush.bf16.msra.mxu0 %v3627_v19 }
  0xe9   :  { %v4400_v35 = vadd.f32 %v752_v20, %v704_v21  ;;  %v3647_v20 = vld [vmem:[%s5152_s1 + $0x280] sm:$0xff] }
  0xea   :  { %1716 = vmatpush.bf16.msra.mxu3 %v3647_v20 }
  0xee   :  { %v705_v46 = vpop.f32.mrf.mxu2  ;;  %v610_v60 = vpop.f32.mrf.mxu0 }
  0xef   :  { %v754_v56 = vpop.f32.mrf.mxu3  ;;  %v706_v59 = vadd.f32 %v705_v46, %v657_v34  ;;  %v659_v3 = vpop.f32.mrf.mxu1  ;;  %v2681_v46 = vld [vmem:[%s5153_s0 + $0x100] sm:$0xf] }
  0xf0   :  { %v660_v10 = vadd.f32 %v659_v3, %v610_v60 }
  0xf1   :  { %v4413_v11 = vadd.f32 %v754_v56, %v706_v59  ;;  %2852 = vmatmul.msk.bf16.gmra.mxu0 %vm551_vm0, %v4411_v58  ;;  %v3561_v56 = vld [vmem:[%s5153_s0 + $0x110] sm:$0xf0] }
  0xf2   :  { %1143 = vmatmul.bf16.gmra.mxu1 %v4154_v5  ;;  %v4437_v3 = vor.u32 %v3561_v56, %v2681_v46 }
  0xf3   :  { %1192 = vmatmul.bf16.gmra.mxu2 %v4156_v6 }
  0xf4   :  { %1241 = vmatmul.bf16.gmra.mxu3 %v4158_v7  ;;  %5220 = vst [vmem:[#allocation23_spill] sm:$0xff] %v4437_v3 }
  0xf6   :  { %v708_v21 = vpop.f32.mrf.mxu2  ;;  %v612_v34 = vpop.f32.mrf.mxu0 }
  0xf7   :  { %v757_v28 = vpop.f32.mrf.mxu3  ;;  %v709_v29 = vadd.f32 %v708_v21, %v660_v10  ;;  %v661_v37 = vpop.f32.mrf.mxu1 }
  0xf8   :  { %v662_v39 = vadd.f32 %v661_v37, %v612_v34  ;;  %v3682_v34 = vld [vmem:[%s5152_s1 + $0x398] sm:$0xff] }
  0xf9   :  { %v4429_v40 = vadd.f32 %v757_v28, %v709_v29  ;;  %v3674_v28 = vld [vmem:[%s5152_s1 + $0x358] sm:$0xff]  ;;  %2210 = vmatpush.bf16.msrb.mxu3 %v3682_v34 }
  0xfa   :  { %v3662_v29 = vld [vmem:[%s5152_s1 + $0x2f8] sm:$0xff]  ;;  %1860 = vmatpush.bf16.msrb.mxu2 %v3674_v28 }
  0xfb   :  { %1758 = vmatpush.bf16.msrb.mxu0 %v3662_v29  ;;  %v3566_v28 = vld [vmem:[%s5153_s0 + $0x138] sm:$0xf0] }
  0xfe   :  { %v710_v59 = vpop.f32.mrf.mxu2  ;;  %v615_v19 = vpop.f32.mrf.mxu0 }
  0xff   :  { %v759_v60 = vpop.f32.mrf.mxu3  ;;  %v711_v18 = vadd.f32 %v710_v59, %v662_v39  ;;  %v664_v10 = vpop.f32.mrf.mxu1 }
 0x100   :  { %v665_v20 = vadd.f32 %v664_v10, %v615_v19  ;;  %v3670_v19 = vld [vmem:[%s5152_s1 + $0x338] sm:$0xff]  ;;  %v2701_v10 = vld [vmem:[%s5153_s0 + $0x128] sm:$0xf] }
 0x101   :  { %v4439_v21 = vadd.f32 %v759_v60, %v711_v18  ;;  %2853 = vmatmul.msk.bf16.gmra.mxu0 %vm551_vm0, %v4437_v3  ;;  %1807 = vmatpush.bf16.msrb.mxu1 %v3670_v19  ;;  %v4466_v34 = vor.u32 %v3566_v28, %v2701_v10  ;;  %v3661_v19 = vld [vmem:[%s5152_s1 + $0x2f0] sm:$0xff] }
 0x102   :  { %1148 = vmatmul.bf16.gmra.mxu1 %v4199_v24  ;;  %1759 = vmatpush.bf16.msrb.mxu0 %v3661_v19 }
 0x103   :  { %1197 = vmatmul.bf16.gmra.mxu2 %v4201_v25  ;;  %5221 = vst [vmem:[#allocation24_spill] sm:$0xff] %v4466_v34 }
 0x104   :  { %1246 = vmatmul.bf16.gmra.mxu3 %v4203_v26 }
 0x106   :  { %v713_v37 = vpop.f32.mrf.mxu2  ;;  %v617_v56 = vpop.f32.mrf.mxu0 }
 0x107   :  { %v762_v39 = vpop.f32.mrf.mxu3  ;;  %v714_v46 = vadd.f32 %v713_v37, %v665_v20  ;;  %v666_v59 = vpop.f32.mrf.mxu1 }
 0x108   :  { %v667_v60 = vadd.f32 %v666_v59, %v617_v56 }
 0x109   :  { %v4455_v18 = vadd.f32 %v762_v39, %v714_v46 }
 0x10e   :  { %v715_v29 = vpop.f32.mrf.mxu2  ;;  %v620_v39 = vpop.f32.mrf.mxu0 }
 0x10f   :  { %v764_v20 = vpop.f32.mrf.mxu3  ;;  %v716_v37 = vadd.f32 %v715_v29, %v667_v60  ;;  %v669_v46 = vpop.f32.mrf.mxu1  ;;  %v3681_v60 = vld [vmem:[%s5152_s1 + $0x390] sm:$0xff] }
 0x110   :  { %v670_v56 = vadd.f32 %v669_v46, %v620_v39  ;;  %2211 = vmatpush.bf16.msrb.mxu3 %v3681_v60 }
 0x111   :  { %v4468_v59 = vadd.f32 %v764_v20, %v716_v37  ;;  %2854 = vmatmul.msk.bf16.gmra.mxu0 %vm551_vm0, %v4466_v34 }
 0x112   :  { %1153 = vmatmul.bf16.gmra.mxu1 %v4247_v48 }
 0x113   :  { %1202 = vmatmul.bf16.gmra.mxu2 %v4249_v53 }
 0x114   :  { %1251 = vmatmul.bf16.gmra.mxu3 %v4251_v54  ;;  %v3669_v54 = vld [vmem:[%s5152_s1 + $0x330] sm:$0xff] }
 0x115   :  { %1808 = vmatpush.bf16.msrb.mxu1 %v3669_v54 }
 0x116   :  { %v718_v10 = vpop.f32.mrf.mxu2  ;;  %v622_v20 = vpop.f32.mrf.mxu0 }
 0x117   :  { %v767_v28 = vpop.f32.mrf.mxu3  ;;  %v719_v29 = vadd.f32 %v718_v10, %v670_v56  ;;  %v671_v37 = vpop.f32.mrf.mxu1 }
 0x118   :  { %v672_v39 = vadd.f32 %v671_v37, %v622_v20  ;;  %v3668_v20 = vld [vmem:[%s5152_s1 + $0x328] sm:$0xff] }
 0x119   :  { %v4481_v46 = vadd.f32 %v767_v28, %v719_v29  ;;  %1809 = vmatpush.bf16.msrb.mxu1 %v3668_v20 }
 0x11e   :  { %v720_v26 = vpop.f32.mrf.mxu2  ;;  %v781_v32 = vpop.f32.mrf.mxu0 }
 0x11f   :  { %v769_v7 = vpop.f32.mrf.mxu3  ;;  %v721_v51 = vadd.f32 %v720_v26, %v672_v39  ;;  %v1119_v16 = vpop.f32.mrf.mxu1  ;;  %v4487_v19 = vadd.f32 %v781_v32, %v4290_v22  ;;  %v3673_v26 = vld [vmem:[%s5152_s1 + $0x350] sm:$0xff]  ;;  %v3660_v32 = vld [vmem:[%s5152_s1 + $0x2e8] sm:$0xff] }
 0x120   :  { %1861 = vmatpush.bf16.msrb.mxu2 %v3673_v26  ;;  %1760 = vmatpush.bf16.msrb.mxu0 %v3660_v32 }
 0x121   :  { %v4489_v60 = vadd.f32 %v769_v7, %v721_v51  ;;  %1265 = vmatmul.bf16.vlgmr.msra.gmra.mxu0 %v3911_v45  ;;  %v3680_v51 = vld [vmem:[%s5152_s1 + $0x388] sm:$0xff] }
 0x122   :  { %3071 = vmatmul.msk.bf16.vlgmr.msra.gmra.mxu1 %vm551_vm0, %v4274_v61  ;;  %2212 = vmatpush.bf16.msrb.mxu3 %v3680_v51 }
 0x123   :  { %1668 = vmatmul.bf16.vlgmr.msra.gmra.mxu2 %v3905_v42 }
 0x124   :  { %1717 = vmatmul.bf16.vlgmr.msra.gmra.mxu3 %v3907_v43 }
 0x126   :  { %v1168_v7 = vpop.f32.mrf.mxu2  ;;  %v783_v56 = vpop.f32.mrf.mxu0 }
 0x127   :  { %v1217_v54 = vpop.f32.mrf.mxu3  ;;  %v1169_v22 = vadd.f32 %v1168_v7, %v1119_v16  ;;  %v1121_v10 = vpop.f32.mrf.mxu1  ;;  %v4506_v28 = vadd.f32 %v783_v56, %v4303_v41  ;;  %v3659_v41 = vld [vmem:[%s5152_s1 + $0x2e0] sm:$0xff] }
 0x128   :  { %1761 = vmatpush.bf16.msrb.mxu0 %v3659_v41 }
 0x129   :  { %v4508_v29 = vadd.f32 %v1217_v54, %v1169_v22 }
 0x12e   :  { %v1170_v37 = vpop.f32.mrf.mxu2  ;;  %v786_v32 = vpop.f32.mrf.mxu0 }
 0x12f   :  { %v1219_v39 = vpop.f32.mrf.mxu3  ;;  %v1171_v26 = vadd.f32 %v1170_v37, %v1121_v10  ;;  %v1124_v43 = vpop.f32.mrf.mxu1  ;;  %v4514_v51 = vadd.f32 %v786_v32, %v4319_v4  ;;  %v3679_v4 = vld [vmem:[%s5152_s1 + $0x380] sm:$0xff] }
 0x130   :  { %2213 = vmatpush.bf16.msrb.mxu3 %v3679_v4 }
 0x131   :  { %5222 = vst [vmem:[#allocation25_spill] sm:$0xff] %v4514_v51  ;;  %v4516_v16 = vadd.f32 %v1219_v39, %v1171_v26  ;;  %1270 = vmatmul.bf16.gmra.mxu0 %v3974_v2  ;;  %v3667_v39 = vld [vmem:[%s5152_s1 + $0x320] sm:$0xff] }
 0x132   :  { %3072 = vmatmul.msk.bf16.gmra.mxu1 %vm551_vm0, %v4301_v36 }
 0x133   :  { %1673 = vmatmul.bf16.gmra.mxu2 %v3968_v63  ;;  %1810 = vmatpush.bf16.msrb.mxu1 %v3667_v39 }
 0x134   :  { %1722 = vmatmul.bf16.gmra.mxu3 %v3970_v0 }
 0x136   :  { %v1173_v7 = vpop.f32.mrf.mxu2  ;;  %v788_v56 = vpop.f32.mrf.mxu0 }
 0x137   :  { %v1222_v54 = vpop.f32.mrf.mxu3  ;;  %v1174_v22 = vadd.f32 %v1173_v7, %v1124_v43  ;;  %v1126_v10 = vpop.f32.mrf.mxu1  ;;  %v4530_v20 = vadd.f32 %v788_v56, %v4329_v23  ;;  %v3672_v23 = vld [vmem:[%s5152_s1 + $0x348] sm:$0xff] }
 0x138   :  { %1862 = vmatpush.bf16.msrb.mxu2 %v3672_v23 }
 0x139   :  { %v4532_v37 = vadd.f32 %v1222_v54, %v1174_v22 }
 0x13e   :  { %v1175_v26 = vpop.f32.mrf.mxu2  ;;  %v791_v41 = vpop.f32.mrf.mxu0 }
 0x13f   :  { %v1224_v32 = vpop.f32.mrf.mxu3  ;;  %v1176_v0 = vadd.f32 %v1175_v26, %v1126_v10  ;;  %v1129_v4 = vpop.f32.mrf.mxu1  ;;  %v4538_v51 = vadd.f32 %v791_v41, %v4345_v47  ;;  %v3658_v47 = vld [vmem:[%s5152_s1 + $0x2d8] sm:$0xff] }
 0x140   :  { %1762 = vmatpush.bf16.msrb.mxu0 %v3658_v47 }
 0x141   :  { %5223 = vst [vmem:[#allocation26_spill] sm:$0xff] %v4538_v51  ;;  %v4540_v43 = vadd.f32 %v1224_v32, %v1176_v0  ;;  %1275 = vmatmul.bf16.gmra.mxu0 %v4019_v17  ;;  %v3678_v0 = vld [vmem:[%s5152_s1 + $0x378] sm:$0xff] }
 0x142   :  { %3073 = vmatmul.msk.bf16.gmra.mxu1 %vm551_vm0, %v4327_v13  ;;  %2214 = vmatpush.bf16.msrb.mxu3 %v3678_v0  ;;  %v3666_v32 = vld [vmem:[%s5152_s1 + $0x318] sm:$0xff] }
 0x143   :  { %1678 = vmatmul.bf16.gmra.mxu2 %v4013_v14  ;;  %1811 = vmatpush.bf16.msrb.mxu1 %v3666_v32 }
 0x144   :  { %1727 = vmatmul.bf16.gmra.mxu3 %v4015_v15 }
 0x146   :  { %v1178_v7 = vpop.f32.mrf.mxu2  ;;  %v793_v56 = vpop.f32.mrf.mxu0 }
 0x147   :  { %v1227_v54 = vpop.f32.mrf.mxu3  ;;  %v1179_v22 = vadd.f32 %v1178_v7, %v1129_v4  ;;  %v1131_v10 = vpop.f32.mrf.mxu1  ;;  %v4557_v39 = vadd.f32 %v793_v56, %v4358_v12  ;;  %v3657_v12 = vld [vmem:[%s5152_s1 + $0x2d0] sm:$0xff] }
 0x148   :  { %1763 = vmatpush.bf16.msrb.mxu0 %v3657_v12 }
 0x149   :  { %v4559_v26 = vadd.f32 %v1227_v54, %v1179_v22 }
 0x14e   :  { %v1180_v41 = vpop.f32.mrf.mxu2  ;;  %v796_v47 = vpop.f32.mrf.mxu0 }
 0x14f   :  { %v1229_v15 = vpop.f32.mrf.mxu3  ;;  %v1181_v23 = vadd.f32 %v1180_v41, %v1131_v10  ;;  %v1134_v51 = vpop.f32.mrf.mxu1  ;;  %v4565_v0 = vadd.f32 %v796_v47, %v4374_v38  ;;  %v3677_v38 = vld [vmem:[%s5152_s1 + $0x370] sm:$0xff] }
 0x150   :  { %2215 = vmatpush.bf16.msrb.mxu3 %v3677_v38  ;;  %v3665_v41 = vld [vmem:[%s5152_s1 + $0x310] sm:$0xff] }
 0x151   :  { %5224 = vst [vmem:[#allocation27_spill] sm:$0xff] %v4565_v0  ;;  %v4567_v4 = vadd.f32 %v1229_v15, %v1181_v23  ;;  %1280 = vmatmul.bf16.gmra.mxu0 %v4067_v33  ;;  %1812 = vmatpush.bf16.msrb.mxu1 %v3665_v41 }
 0x152   :  { %3074 = vmatmul.msk.bf16.gmra.mxu1 %vm551_vm0, %v4356_v62 }
 0x153   :  { %1683 = vmatmul.bf16.gmra.mxu2 %v4061_v30 }
 0x154   :  { %1732 = vmatmul.bf16.gmra.mxu3 %v4063_v31 }
 0x156   :  { %v1183_v15 = vpop.f32.mrf.mxu2  ;;  %v798_v22 = vpop.f32.mrf.mxu0 }
 0x157   :  { %v1232_v7 = vpop.f32.mrf.mxu3  ;;  %v1184_v54 = vadd.f32 %v1183_v15, %v1134_v51  ;;  %v1136_v56 = vpop.f32.mrf.mxu1  ;;  %v4581_v10 = vadd.f32 %v798_v22, %v4384_v9  ;;  %v3671_v9 = vld [vmem:[%s5152_s1 + $0x340] sm:$0xff] }
 0x158   :  { %1863 = vmatpush.bf16.msrb.mxu2 %v3671_v9 }
 0x159   :  { %v4583_v32 = vadd.f32 %v1232_v7, %v1184_v54 }
 0x15e   :  { %v1185_v23 = vpop.f32.mrf.mxu2  ;;  %v801_v12 = vpop.f32.mrf.mxu0 }
 0x15f   :  { %v1234_v47 = vpop.f32.mrf.mxu3  ;;  %v1186_v31 = vadd.f32 %v1185_v23, %v1136_v56  ;;  %v1139_v38 = vpop.f32.mrf.mxu1  ;;  %v4589_v0 = vadd.f32 %v801_v12, %v4400_v35  ;;  %v3656_v35 = vld [vmem:[%s5152_s1 + $0x2c8] sm:$0xff] }
 0x160   :  { %1764 = vmatpush.bf16.msrb.mxu0 %v3656_v35 }
 0x161   :  { %5225 = vst [vmem:[#allocation28_spill] sm:$0xff] %v4589_v0  ;;  %v4591_v51 = vadd.f32 %v1234_v47, %v1186_v31  ;;  %1285 = vmatmul.bf16.gmra.mxu0 %v4112_v52  ;;  %v3676_v31 = vld [vmem:[%s5152_s1 + $0x368] sm:$0xff] }
 0x162   :  { %3075 = vmatmul.msk.bf16.gmra.mxu1 %vm551_vm0, %v4382_v57  ;;  %2216 = vmatpush.bf16.msrb.mxu3 %v3676_v31  ;;  %v3664_v47 = vld [vmem:[%s5152_s1 + $0x308] sm:$0xff] }
 0x163   :  { %1688 = vmatmul.bf16.gmra.mxu2 %v4106_v49  ;;  %1813 = vmatpush.bf16.msrb.mxu1 %v3664_v47 }
 0x164   :  { %1737 = vmatmul.bf16.gmra.mxu3 %v4108_v50 }
 0x166   :  { %v1188_v15 = vpop.f32.mrf.mxu2  ;;  %v803_v22 = vpop.f32.mrf.mxu0 }
 0x167   :  { %v1237_v7 = vpop.f32.mrf.mxu3  ;;  %v1189_v54 = vadd.f32 %v1188_v15, %v1139_v38  ;;  %v1141_v56 = vpop.f32.mrf.mxu1  ;;  %v4608_v41 = vadd.f32 %v803_v22, %v4413_v11  ;;  %v3655_v11 = vld [vmem:[%s5152_s1 + $0x2c0] sm:$0xff] }
 0x168   :  { %1765 = vmatpush.bf16.msrb.mxu0 %v3655_v11 }
 0x169   :  { %v4610_v23 = vadd.f32 %v1237_v7, %v1189_v54 }
 0x16e   :  { %v1190_v12 = vpop.f32.mrf.mxu2  ;;  %v806_v35 = vpop.f32.mrf.mxu0 }
 0x16f   :  { %v1239_v50 = vpop.f32.mrf.mxu3  ;;  %v1191_v9 = vadd.f32 %v1190_v12, %v1141_v56  ;;  %v1144_v0 = vpop.f32.mrf.mxu1  ;;  %v4616_v31 = vadd.f32 %v806_v35, %v4429_v40  ;;  %v3675_v40 = vld [vmem:[%s5152_s1 + $0x360] sm:$0xff] }
 0x170   :  { %2217 = vmatpush.bf16.msrb.mxu3 %v3675_v40  ;;  %v3663_v12 = vld [vmem:[%s5152_s1 + $0x300] sm:$0xff] }
 0x171   :  { %5226 = vst [vmem:[#allocation29_spill] sm:$0xff] %v4616_v31  ;;  %v4618_v38 = vadd.f32 %v1239_v50, %v1191_v9  ;;  %1290 = vmatmul.bf16.gmra.mxu0 %v4160_v8  ;;  %1814 = vmatpush.bf16.msrb.mxu1 %v3663_v12  ;;  %v3698_v12 = vld [vmem:[%s5152_s1 + $0x418] sm:$0xff] }
 0x172   :  { %3076 = vmatmul.msk.bf16.gmra.mxu1 %vm551_vm0, %v4411_v58 }
 0x173   :  { %1693 = vmatmul.bf16.gmra.mxu2 %v4154_v5 }
 0x174   :  { %1742 = vmatmul.bf16.gmra.mxu3 %v4156_v6 }
 0x175   :  { %2308 = vmatpush.bf16.msra.mxu1 %v3698_v12 }
 0x176   :  { %v1193_v50 = vpop.f32.mrf.mxu2  ;;  %v808_v54 = vpop.f32.mrf.mxu0 }
 0x177   :  { %v1242_v15 = vpop.f32.mrf.mxu3  ;;  %v1194_v7 = vadd.f32 %v1193_v50, %v1144_v0  ;;  %v1146_v22 = vpop.f32.mrf.mxu1  ;;  %v4632_v56 = vadd.f32 %v808_v54, %v4439_v21  ;;  %v3706_v21 = vld [vmem:[%s5152_s1 + $0x458] sm:$0xff] }
 0x178   :  { %2357 = vmatpush.bf16.msra.mxu2 %v3706_v21 }
 0x179   :  { %v4634_v47 = vadd.f32 %v1242_v15, %v1194_v7 }
 0x17e   :  { %v1195_v9 = vpop.f32.mrf.mxu2  ;;  %v811_v11 = vpop.f32.mrf.mxu0 }
 0x17f   :  { %v1244_v35 = vpop.f32.mrf.mxu3  ;;  %v1196_v6 = vadd.f32 %v1195_v9, %v1146_v22  ;;  %v1149_v40 = vpop.f32.mrf.mxu1  ;;  %v4640_v31 = vadd.f32 %v811_v11, %v4455_v18  ;;  %v3690_v18 = vld [vmem:[%s5152_s1 + $0x3d8] sm:$0xff] }
 0x180   :  { %2259 = vmatpush.bf16.msra.mxu0 %v3690_v18 }
 0x181   :  { %5227 = vst [vmem:[#allocation30_spill] sm:$0xff] %v4640_v31  ;;  %v4642_v0 = vadd.f32 %v1244_v35, %v1196_v6  ;;  %1295 = vmatmul.bf16.gmra.mxu0 %v4205_v27  ;;  %v3710_v6 = vld [vmem:[%s5152_s1 + $0x478] sm:$0xff] }
 0x182   :  { %3077 = vmatmul.msk.bf16.gmra.mxu1 %vm551_vm0, %v4437_v3  ;;  %2410 = vmatpush.bf16.msra.mxu3 %v3710_v6 }
 0x183   :  { %1698 = vmatmul.bf16.gmra.mxu2 %v4199_v24 }
 0x184   :  { %1747 = vmatmul.bf16.gmra.mxu3 %v4201_v25 }
 0x186   :  { %v1198_v50 = vpop.f32.mrf.mxu2  ;;  %v813_v54 = vpop.f32.mrf.mxu0 }
 0x187   :  { %v1247_v15 = vpop.f32.mrf.mxu3  ;;  %v1199_v7 = vadd.f32 %v1198_v50, %v1149_v40  ;;  %v1151_v22 = vpop.f32.mrf.mxu1  ;;  %v4662_v9 = vadd.f32 %v813_v54, %v4468_v59  ;;  %v3705_v59 = vld [vmem:[%s5152_s1 + $0x450] sm:$0xff] }
 0x188   :  { %2358 = vmatpush.bf16.msra.mxu2 %v3705_v59 }
 0x189   :  { %v4664_v35 = vadd.f32 %v1247_v15, %v1199_v7  ;;  %v3697_v15 = vld [vmem:[%s5152_s1 + $0x410] sm:$0xff] }
 0x18a   :  { %2309 = vmatpush.bf16.msra.mxu1 %v3697_v15 }
 0x18e   :  { %v1200_v11 = vpop.f32.mrf.mxu2  ;;  %v816_v24 = vpop.f32.mrf.mxu0 }
 0x18f   :  { %v1249_v25 = vpop.f32.mrf.mxu3  ;;  %v1201_v31 = vadd.f32 %v1200_v11, %v1151_v22  ;;  %v1154_v21 = vpop.f32.mrf.mxu1  ;;  %v4667_v40 = vadd.f32 %v816_v24, %v4481_v46  ;;  %v3689_v24 = vld [vmem:[%s5152_s1 + $0x3d0] sm:$0xff] }
 0x190   :  { %2260 = vmatpush.bf16.msra.mxu0 %v3689_v24 }
 0x191   :  { %5228 = vst [vmem:[#allocation31_spill] sm:$0xff] %v4667_v40  ;;  %v4669_v18 = vadd.f32 %v1249_v25, %v1201_v31  ;;  %1300 = vmatmul.bf16.gmra.mxu0 %v4253_v55 }
 0x192   :  { %3078 = vmatmul.msk.bf16.gmra.mxu1 %vm551_vm0, %v4466_v34 }
 0x193   :  { %1703 = vmatmul.bf16.gmra.mxu2 %v4247_v48 }
 0x194   :  { %1752 = vmatmul.bf16.gmra.mxu3 %v4249_v53 }
 0x196   :  { %v1203_v46 = vpop.f32.mrf.mxu2  ;;  %v818_v6 = vpop.f32.mrf.mxu0 }
 0x197   :  { %v1252_v25 = vpop.f32.mrf.mxu3  ;;  %v1204_v31 = vadd.f32 %v1203_v46, %v1154_v21  ;;  %v1156_v50 = vpop.f32.mrf.mxu1  ;;  %v4686_v7 = vadd.f32 %v818_v6, %v4489_v60 }
 0x199   :  { %v4688_v54 = vadd.f32 %v1252_v25, %v1204_v31 }
 0x19e   :  { %v1205_v22 = vpop.f32.mrf.mxu2  ;;  %v1266_v53 = vpop.f32.mrf.mxu0 }
 0x19f   :  { %v1254_v12 = vpop.f32.mrf.mxu3  ;;  %v1206_v11 = vadd.f32 %v1205_v22, %v1156_v50  ;;  %v1315_v40 = vpop.f32.mrf.mxu1  ;;  %v1267_v59 = vadd.f32 %v1266_v53, %v4508_v29  ;;  %v3704_v53 = vld [vmem:[%s5152_s1 + $0x448] sm:$0xff] }
 0x1a0   :  { %v3688_v29 = vld [vmem:[%s5152_s1 + $0x3c8] sm:$0xff]  ;;  %2359 = vmatpush.bf16.msra.mxu2 %v3704_v53 }
 0x1a1   :  { %v4691_v21 = vadd.f32 %v1254_v12, %v1206_v11  ;;  %v4693_v24 = vadd.f32 %v1315_v40, %v1267_v59  ;;  %1766 = vmatmul.bf16.vlgmr.msrb.gmra.mxu0 %v3909_v44  ;;  %v3709_v40 = vld [vmem:[%s5152_s1 + $0x470] sm:$0xff]  ;;  %v3696_v50 = vld [vmem:[%s5152_s1 + $0x408] sm:$0xff] }
 0x1a2   :  { %1815 = vmatmul.bf16.vlgmr.msrb.gmra.mxu1 %v3911_v45  ;;  %2261 = vmatpush.bf16.msra.mxu0 %v3688_v29 }
 0x1a3   :  { %3295 = vmatmul.msk.bf16.vlgmr.msrb.gmra.mxu2 %vm551_vm0, %v4274_v61  ;;  %2411 = vmatpush.bf16.msra.mxu3 %v3709_v40 }
 0x1a4   :  { %2218 = vmatmul.bf16.vlgmr.msrb.gmra.mxu3 %v3905_v42  ;;  %2310 = vmatpush.bf16.msra.mxu1 %v3696_v50 }
 0x1a6   :  { %v1669_v46 = vpop.f32.mrf.mxu2  ;;  %v1268_v31 = vpop.f32.mrf.mxu0 }
 0x1a7   :  { %v1718_v25 = vpop.f32.mrf.mxu3  ;;  %v1317_v6 = vpop.f32.mrf.mxu1  ;;  %v1269_v15 = vadd.f32 %v1268_v31, %v4516_v16  ;;  %v5232_v16 = vld [vmem:[#allocation5_spill] sm:$0xff] }
 0x1a8   :  { %v4711_v42 = vadd.f32 %v1718_v25, %v1669_v46 }
 0x1a9   :  { %v4717_v22 = vadd.f32 %v1317_v6, %v1269_v15  ;;  %v3703_v6 = vld [vmem:[%s5152_s1 + $0x440] sm:$0xff] }
 0x1aa   :  { %2360 = vmatpush.bf16.msra.mxu2 %v3703_v6 }
 0x1ae   :  { %v1671_v11 = vpop.f32.mrf.mxu2  ;;  %v1271_v29 = vpop.f32.mrf.mxu0 }
 0x1af   :  { %v1720_v59 = vpop.f32.mrf.mxu3  ;;  %v1320_v46 = vpop.f32.mrf.mxu1  ;;  %v1272_v40 = vadd.f32 %v1271_v29, %v4532_v37  ;;  %v3687_v37 = vld [vmem:[%s5152_s1 + $0x3c0] sm:$0xff] }
 0x1b0   :  { %v4721_v53 = vadd.f32 %v1720_v59, %v1671_v11  ;;  %2262 = vmatpush.bf16.msra.mxu0 %v3687_v37 }
 0x1b1   :  { %v4724_v25 = vadd.f32 %v1320_v46, %v1272_v40  ;;  %1771 = vmatmul.bf16.gmra.mxu0 %v3972_v1 }
 0x1b2   :  { %1820 = vmatmul.bf16.gmra.mxu1 %v3974_v2 }
 0x1b3   :  { %5229 = vst [vmem:[#allocation32_spill] sm:$0xff] %v4724_v25  ;;  %3296 = vmatmul.msk.bf16.gmra.mxu2 %vm551_vm0, %v4301_v36 }
 0x1b4   :  { %2223 = vmatmul.bf16.gmra.mxu3 %v3968_v63  ;;  %v3695_v63 = vld [vmem:[%s5152_s1 + $0x400] sm:$0xff] }
 0x1b5   :  { %2311 = vmatpush.bf16.msra.mxu1 %v3695_v63 }
 0x1b6   :  { %v1674_v50 = vpop.f32.mrf.mxu2  ;;  %v1273_v59 = vpop.f32.mrf.mxu0 }
 0x1b7   :  { %v1723_v15 = vpop.f32.mrf.mxu3  ;;  %v1322_v29 = vpop.f32.mrf.mxu1  ;;  %v1274_v46 = vadd.f32 %v1273_v59, %v4540_v43 }
 0x1b8   :  { %v4739_v11 = vadd.f32 %v1723_v15, %v1674_v50 }
 0x1b9   :  { %v4745_v40 = vadd.f32 %v1322_v29, %v1274_v46 }
 0x1be   :  { %v1676_v12 = vpop.f32.mrf.mxu2  ;;  %v1276_v37 = vpop.f32.mrf.mxu0 }
 0x1bf   :  { %v1725_v60 = vpop.f32.mrf.mxu3  ;;  %v1325_v50 = vpop.f32.mrf.mxu1  ;;  %v1277_v15 = vadd.f32 %v1276_v37, %v4559_v26  ;;  %v3686_v26 = vld [vmem:[%s5152_s1 + $0x3b8] sm:$0xff] }
 0x1c0   :  { %v4749_v6 = vadd.f32 %v1725_v60, %v1676_v12  ;;  %v3702_v60 = vld [vmem:[%s5152_s1 + $0x438] sm:$0xff]  ;;  %v3708_v12 = vld [vmem:[%s5152_s1 + $0x468] sm:$0xff]  ;;  %2263 = vmatpush.bf16.msra.mxu0 %v3686_v26 }
 0x1c1   :  { %v4752_v25 = vadd.f32 %v1325_v50, %v1277_v15  ;;  %1776 = vmatmul.bf16.gmra.mxu0 %v5232_v16  ;;  %2361 = vmatpush.bf16.msra.mxu2 %v3702_v60  ;;  %v3694_v50 = vld [vmem:[%s5152_s1 + $0x3f8] sm:$0xff] }
 0x1c2   :  { %1825 = vmatmul.bf16.gmra.mxu1 %v4019_v17  ;;  %2412 = vmatpush.bf16.msra.mxu3 %v3708_v12 }
 0x1c3   :  { %5231 = vst [vmem:[#allocation33_spill] sm:$0xff] %v4752_v25  ;;  %3297 = vmatmul.msk.bf16.gmra.mxu2 %vm551_vm0, %v4327_v13  ;;  %2312 = vmatpush.bf16.msra.mxu1 %v3694_v50  ;;  %v5235_v13 = vld [vmem:[#allocation7_spill] sm:$0xff] }
 0x1c4   :  { %2228 = vmatmul.bf16.gmra.mxu3 %v4013_v14 }
 0x1c6   :  { %v1679_v29 = vpop.f32.mrf.mxu2  ;;  %v1278_v46 = vpop.f32.mrf.mxu0 }
 0x1c7   :  { %v1728_v63 = vpop.f32.mrf.mxu3  ;;  %v1327_v37 = vpop.f32.mrf.mxu1  ;;  %v1279_v15 = vadd.f32 %v1278_v46, %v4567_v4 }
 0x1c8   :  { %v4770_v14 = vadd.f32 %v1728_v63, %v1679_v29 }
 0x1c9   :  { %v4776_v59 = vadd.f32 %v1327_v37, %v1279_v15 }
 0x1ce   :  { %v1681_v25 = vpop.f32.mrf.mxu2  ;;  %v1281_v29 = vpop.f32.mrf.mxu0 }
 0x1cf   :  { %v1730_v60 = vpop.f32.mrf.mxu3  ;;  %v1330_v63 = vpop.f32.mrf.mxu1  ;;  %v1282_v12 = vadd.f32 %v1281_v29, %v4583_v32  ;;  %v3685_v32 = vld [vmem:[%s5152_s1 + $0x3b0] sm:$0xff] }
 0x1d0   :  { %v4780_v26 = vadd.f32 %v1730_v60, %v1681_v25  ;;  %v3701_v25 = vld [vmem:[%s5152_s1 + $0x430] sm:$0xff]  ;;  %2264 = vmatpush.bf16.msra.mxu0 %v3685_v32 }
 0x1d1   :  { %v4783_v43 = vadd.f32 %v1330_v63, %v1282_v12  ;;  %1781 = vmatmul.bf16.gmra.mxu0 %v5235_v13  ;;  %2362 = vmatpush.bf16.msra.mxu2 %v3701_v25 }
 0x1d2   :  { %1830 = vmatmul.bf16.gmra.mxu1 %v4067_v33 }
 0x1d3   :  { %5234 = vst [vmem:[#allocation5_spill] sm:$0xff] %v4783_v43  ;;  %3298 = vmatmul.msk.bf16.gmra.mxu2 %vm551_vm0, %v4356_v62  ;;  %v5238_v62 = vld [vmem:[#allocation9_spill] sm:$0xff] }
 0x1d4   :  { %2233 = vmatmul.bf16.gmra.mxu3 %v4061_v30  ;;  %v3693_v30 = vld [vmem:[%s5152_s1 + $0x3f0] sm:$0xff] }
 0x1d5   :  { %2313 = vmatpush.bf16.msra.mxu1 %v3693_v30 }
 0x1d6   :  { %v1684_v37 = vpop.f32.mrf.mxu2  ;;  %v1283_v60 = vpop.f32.mrf.mxu0 }
 0x1d7   :  { %v1733_v50 = vpop.f32.mrf.mxu3  ;;  %v1332_v29 = vpop.f32.mrf.mxu1  ;;  %v1284_v63 = vadd.f32 %v1283_v60, %v4591_v51 }
 0x1d8   :  { %v4798_v15 = vadd.f32 %v1733_v50, %v1684_v37 }
 0x1d9   :  { %v4804_v12 = vadd.f32 %v1332_v29, %v1284_v63 }
 0x1de   :  { %v1686_v31 = vpop.f32.mrf.mxu2  ;;  %v1286_v32 = vpop.f32.mrf.mxu0 }
 0x1df   :  { %v1735_v43 = vpop.f32.mrf.mxu3  ;;  %v1335_v37 = vpop.f32.mrf.mxu1  ;;  %v1287_v50 = vadd.f32 %v1286_v32, %v4610_v23  ;;  %v3684_v23 = vld [vmem:[%s5152_s1 + $0x3a8] sm:$0xff] }
 0x1e0   :  { %v4808_v25 = vadd.f32 %v1735_v43, %v1686_v31  ;;  %v3700_v31 = vld [vmem:[%s5152_s1 + $0x428] sm:$0xff]  ;;  %v3707_v43 = vld [vmem:[%s5152_s1 + $0x460] sm:$0xff]  ;;  %2265 = vmatpush.bf16.msra.mxu0 %v3684_v23 }
 0x1e1   :  { %v4811_v4 = vadd.f32 %v1335_v37, %v1287_v50  ;;  %1786 = vmatmul.bf16.gmra.mxu0 %v5238_v62  ;;  %2363 = vmatpush.bf16.msra.mxu2 %v3700_v31  ;;  %v3692_v37 = vld [vmem:[%s5152_s1 + $0x3e8] sm:$0xff] }
 0x1e2   :  { %1835 = vmatmul.bf16.gmra.mxu1 %v4112_v52  ;;  %2413 = vmatpush.bf16.msra.mxu3 %v3707_v43 }
 0x1e3   :  { %5237 = vst [vmem:[#allocation7_spill] sm:$0xff] %v4811_v4  ;;  %3299 = vmatmul.msk.bf16.gmra.mxu2 %vm551_vm0, %v4382_v57  ;;  %2314 = vmatpush.bf16.msra.mxu1 %v3692_v37  ;;  %v5241_v57 = vld [vmem:[#allocation11_spill] sm:$0xff] }
 0x1e4   :  { %2238 = vmatmul.bf16.gmra.mxu3 %v4106_v49 }
 0x1e6   :  { %v1689_v29 = vpop.f32.mrf.mxu2  ;;  %v1288_v63 = vpop.f32.mrf.mxu0 }
 0x1e7   :  { %v1738_v30 = vpop.f32.mrf.mxu3  ;;  %v1337_v32 = vpop.f32.mrf.mxu1  ;;  %v1289_v50 = vadd.f32 %v1288_v63, %v4618_v38 }
 0x1e8   :  { %v4829_v49 = vadd.f32 %v1738_v30, %v1689_v29 }
 0x1e9   :  { %v4835_v60 = vadd.f32 %v1337_v32, %v1289_v50 }
 0x1ee   :  { %v1691_v4 = vpop.f32.mrf.mxu2  ;;  %v1291_v29 = vpop.f32.mrf.mxu0 }
 0x1ef   :  { %v1740_v31 = vpop.f32.mrf.mxu3  ;;  %v1340_v30 = vpop.f32.mrf.mxu1  ;;  %v1292_v43 = vadd.f32 %v1291_v29, %v4634_v47  ;;  %v3683_v47 = vld [vmem:[%s5152_s1 + $0x3a0] sm:$0xff] }
 0x1f0   :  { %v4839_v23 = vadd.f32 %v1740_v31, %v1691_v4  ;;  %v3699_v4 = vld [vmem:[%s5152_s1 + $0x420] sm:$0xff]  ;;  %2266 = vmatpush.bf16.msra.mxu0 %v3683_v47 }
 0x1f1   :  { %v4842_v51 = vadd.f32 %v1340_v30, %v1292_v43  ;;  %1791 = vmatmul.bf16.gmra.mxu0 %v5241_v57  ;;  %2364 = vmatpush.bf16.msra.mxu2 %v3699_v4 }
 0x1f2   :  { %1840 = vmatmul.bf16.gmra.mxu1 %v4160_v8 }
 0x1f3   :  { %5240 = vst [vmem:[#allocation9_spill] sm:$0xff] %v4842_v51  ;;  %3300 = vmatmul.msk.bf16.gmra.mxu2 %vm551_vm0, %v4411_v58  ;;  %v5244_v58 = vld [vmem:[#allocation14_spill] sm:$0xff] }
 0x1f4   :  { %2243 = vmatmul.bf16.gmra.mxu3 %v4154_v5  ;;  %v3691_v5 = vld [vmem:[%s5152_s1 + $0x3e0] sm:$0xff] }
 0x1f5   :  { %2315 = vmatpush.bf16.msra.mxu1 %v3691_v5 }
 0x1f6   :  { %v1694_v32 = vpop.f32.mrf.mxu2  ;;  %v1293_v31 = vpop.f32.mrf.mxu0 }
 0x1f7   :  { %v1743_v37 = vpop.f32.mrf.mxu3  ;;  %v1342_v29 = vpop.f32.mrf.mxu1  ;;  %v1294_v30 = vadd.f32 %v1293_v31, %v4642_v0  ;;  %v5245_v0 = vld [vmem:[#allocation12_spill] sm:$0xff]  ;;  %v5246_v31 = vld [vmem:[#allocation30_spill] sm:$0xff] }
 0x1f8   :  { %v4857_v50 = vadd.f32 %v1743_v37, %v1694_v32 }
 0x1f9   :  { %v4863_v43 = vadd.f32 %v1342_v29, %v1294_v30 }
 0x1fe   :  { %v1696_v46 = vpop.f32.mrf.mxu2  ;;  %v1296_v47 = vpop.f32.mrf.mxu0 }
 0x1ff   :  { %v1745_v51 = vpop.f32.mrf.mxu3  ;;  %v1345_v32 = vpop.f32.mrf.mxu1  ;;  %v1297_v37 = vadd.f32 %v1296_v47, %v4664_v35 }
 0x200   :  { %v4867_v4 = vadd.f32 %v1745_v51, %v1696_v46 }
 0x201   :  { %v4870_v38 = vadd.f32 %v1345_v32, %v1297_v37  ;;  %1796 = vmatmul.bf16.gmra.mxu0 %v5244_v58 }
 0x202   :  { %1845 = vmatmul.bf16.gmra.mxu1 %v4205_v27 }
 0x203   :  { %5243 = vst [vmem:[#allocation11_spill] sm:$0xff] %v4870_v38  ;;  %3301 = vmatmul.msk.bf16.gmra.mxu2 %vm551_vm0, %v4437_v3 }
 0x204   :  { %2248 = vmatmul.bf16.gmra.mxu3 %v5245_v0 }
 0x206   :  { %v1699_v46 = vpop.f32.mrf.mxu2  ;;  %v1298_v30 = vpop.f32.mrf.mxu0 }
 0x207   :  { %v1748_v51 = vpop.f32.mrf.mxu3  ;;  %v1347_v35 = vpop.f32.mrf.mxu1  ;;  %v1299_v47 = vadd.f32 %v1298_v30, %v4669_v18  ;;  %v5249_v18 = vld [vmem:[#allocation31_spill] sm:$0xff] }
 0x208   :  { %v4879_v5 = vadd.f32 %v1748_v51, %v1699_v46  ;;  %v5248_v46 = vld [vmem:[#allocation17_spill] sm:$0xff] }
 0x209   :  { %v4882_v32 = vadd.f32 %v1347_v35, %v1299_v47 }
 0x20e   :  { %v1701_v63 = vpop.f32.mrf.mxu2  ;;  %v1301_v0 = vpop.f32.mrf.mxu0 }
 0x20f   :  { %v1750_v3 = vpop.f32.mrf.mxu3  ;;  %v1350_v58 = vpop.f32.mrf.mxu1  ;;  %v1302_v29 = vadd.f32 %v1301_v0, %v4688_v54 }
 0x210   :  { %v4886_v27 = vadd.f32 %v1750_v3, %v1701_v63 }
 0x211   :  { %v4889_v38 = vadd.f32 %v1350_v58, %v1302_v29  ;;  %1801 = vmatmul.bf16.gmra.mxu0 %v5248_v46 }
 0x212   :  { %1850 = vmatmul.bf16.gmra.mxu1 %v4253_v55 }
 0x213   :  { %5247 = vst [vmem:[#allocation12_spill] sm:$0xff] %v4889_v38  ;;  %3302 = vmatmul.msk.bf16.gmra.mxu2 %vm551_vm0, %v4466_v34 }
 0x214   :  { %2253 = vmatmul.bf16.gmra.mxu3 %v4247_v48 }
 0x216   :  { %v1704_v3 = vpop.f32.mrf.mxu2  ;;  %v1303_v35 = vpop.f32.mrf.mxu0 }
 0x217   :  { %v1753_v63 = vpop.f32.mrf.mxu3  ;;  %v1352_v54 = vpop.f32.mrf.mxu1  ;;  %v1304_v58 = vadd.f32 %v1303_v35, %v4691_v21 }
 0x218   :  { %v4898_v30 = vadd.f32 %v1753_v63, %v1704_v3  ;;  %v5250_v3 = vld [vmem:[#allocation2_spill] sm:$0xff] }
 0x219   :  { %v4901_v29 = vadd.f32 %v1352_v54, %v1304_v58 }
 0x21b   :  { %v1370_v47 = vmax.f32 %v4686_v7, %v4901_v29  ;;  %v5081_v7 = vld [vmem:[%s5154_s2] ss:$0 sm:$0xff] }
 0x21e   :  { %v1706_v0 = vpop.f32.mrf.mxu2  ;;  %v1767_v48 = vpop.f32.mrf.mxu0 }
 0x21f   :  { %v1755_v37 = vpop.f32.mrf.mxu3  ;;  %v1816_v55 = vpop.f32.mrf.mxu1  ;;  %v1768_v51 = vadd.f32 %v1767_v48, %v4711_v42 }
 0x220   :  { %v4905_v34 = vadd.f32 %v1755_v37, %v1706_v0 }
 0x221   :  { %v1817_v38 = vadd.f32 %v1816_v55, %v1768_v51  ;;  %2267 = vmatmul.bf16.vlgmr.msra.gmra.mxu0 %v5250_v3  ;;  %v5251_v55 = vmax.f32 %v4487_v19, %v4693_v24 }
 0x222   :  { %2316 = vmatmul.bf16.vlgmr.msra.gmra.mxu1 %v3909_v44 }
 0x223   :  { %2365 = vmatmul.bf16.vlgmr.msra.gmra.mxu2 %v3911_v45 }
 0x224   :  { %3519 = vmatmul.msk.bf16.vlgmr.msra.gmra.mxu3 %vm551_vm0, %v4274_v61 }
 0x226   :  { %v1865_v21 = vpop.f32.mrf.mxu2  ;;  %v1769_v37 = vpop.f32.mrf.mxu0 }
 0x227   :  { %v4913_v63 = vpop.f32.mrf.mxu3  ;;  %v1866_v35 = vadd.f32 %v1865_v21, %v1817_v38  ;;  %v1818_v54 = vpop.f32.mrf.mxu1  ;;  %v1770_v58 = vadd.f32 %v1769_v37, %v4721_v53  ;;  %v5252_v38 = vmax.f32 %v4506_v28, %v4717_v22  ;;  %v5253_v37 = vld [vmem:[#allocation3_spill] sm:$0xff]  ;;  %v5254_v22 = vld [vmem:[#allocation25_spill] sm:$0xff] }
 0x229   :  { %v4919_v42 = vmax.f32 %v5251_v55, %v1866_v35  ;;  %v1819_v51 = vadd.f32 %v1818_v54, %v1770_v58  ;;  %v5255_v58 = vld [vmem:[#allocation32_spill] sm:$0xff] }
 0x22a   :  { %v5256_v55 = vmax.f32 %v5254_v22, %v5255_v58 }
 0x22e   :  { %v1867_v44 = vpop.f32.mrf.mxu2  ;;  %v1772_v48 = vpop.f32.mrf.mxu0 }
 0x22f   :  { %v4921_v0 = vpop.f32.mrf.mxu3  ;;  %v1868_v45 = vadd.f32 %v1867_v44, %v1819_v51  ;;  %v1821_v61 = vpop.f32.mrf.mxu1  ;;  %v1773_v3 = vadd.f32 %v1772_v48, %v4739_v11 }
 0x231   :  { %v4927_v21 = vmax.f32 %v5252_v38, %v1868_v45  ;;  %v1822_v53 = vadd.f32 %v1821_v61, %v1773_v3  ;;  %2272 = vmatmul.bf16.gmra.mxu0 %v5253_v37  ;;  %v5257_v3 = vmax.f32 %v4530_v20, %v4745_v40  ;;  %v5259_v37 = vld [vmem:[#allocation19_spill] sm:$0xff]  ;;  %v5260_v40 = vld [vmem:[#allocation26_spill] sm:$0xff] }
 0x232   :  { %2321 = vmatmul.bf16.gmra.mxu1 %v3972_v1 }
 0x233   :  { %2370 = vmatmul.bf16.gmra.mxu2 %v3974_v2 }
 0x234   :  { %3520 = vmatmul.msk.bf16.gmra.mxu3 %vm551_vm0, %v4301_v36 }
 0x236   :  { %v1870_v19 = vpop.f32.mrf.mxu2  ;;  %v1774_v11 = vpop.f32.mrf.mxu0 }
 0x237   :  { %v4934_v24 = vpop.f32.mrf.mxu3  ;;  %v1871_v35 = vadd.f32 %v1870_v19, %v1822_v53  ;;  %v1823_v54 = vpop.f32.mrf.mxu1  ;;  %v1775_v28 = vadd.f32 %v1774_v11, %v4749_v6  ;;  %v5258_v53 = vld [vmem:[#allocation4_spill] sm:$0xff] }
 0x239   :  { %v4940_v51 = vmax.f32 %v5256_v55, %v1871_v35  ;;  %v1824_v44 = vadd.f32 %v1823_v54, %v1775_v28  ;;  %v5261_v28 = vld [vmem:[#allocation33_spill] sm:$0xff] }
 0x23a   :  { %v5262_v22 = vmax.f32 %v5260_v40, %v5261_v28 }
 0x23e   :  { %v1872_v1 = vpop.f32.mrf.mxu2  ;;  %v1777_v48 = vpop.f32.mrf.mxu0 }
 0x23f   :  { %v4942_v45 = vpop.f32.mrf.mxu3  ;;  %v1873_v2 = vadd.f32 %v1872_v1, %v1824_v44  ;;  %v1826_v36 = vpop.f32.mrf.mxu1  ;;  %v1778_v61 = vadd.f32 %v1777_v48, %v4770_v14 }
 0x241   :  { %v4948_v38 = vmax.f32 %v5257_v3, %v1873_v2  ;;  %v1827_v6 = vadd.f32 %v1826_v36, %v1778_v61  ;;  %2277 = vmatmul.bf16.gmra.mxu0 %v5258_v53  ;;  %v5263_v36 = vmax.f32 %v4557_v39, %v4776_v59  ;;  %v5264_v3 = vld [vmem:[#allocation6_spill] sm:$0xff]  ;;  %v5266_v59 = vld [vmem:[#allocation27_spill] sm:$0xff] }
 0x242   :  { %2326 = vmatmul.bf16.gmra.mxu1 %v5232_v16 }
 0x243   :  { %2375 = vmatmul.bf16.gmra.mxu2 %v4019_v17 }
 0x244   :  { %3521 = vmatmul.msk.bf16.gmra.mxu3 %vm551_vm0, %v5259_v37 }
 0x246   :  { %v1875_v19 = vpop.f32.mrf.mxu2  ;;  %v1779_v14 = vpop.f32.mrf.mxu0 }
 0x247   :  { %v4955_v35 = vpop.f32.mrf.mxu3  ;;  %v1876_v11 = vadd.f32 %v1875_v19, %v1827_v6  ;;  %v1828_v54 = vpop.f32.mrf.mxu1  ;;  %v1780_v20 = vadd.f32 %v1779_v14, %v4780_v26  ;;  %v5265_v6 = vld [vmem:[#allocation20_spill] sm:$0xff]  ;;  %v5267_v14 = vld [vmem:[#allocation5_spill] sm:$0xff] }
 0x249   :  { %v4961_v58 = vmax.f32 %v5262_v22, %v1876_v11  ;;  %v1829_v55 = vadd.f32 %v1828_v54, %v1780_v20  ;;  %v5268_v54 = vmax.f32 %v5266_v59, %v5267_v14 }
 0x24e   :  { %v1877_v16 = vpop.f32.mrf.mxu2  ;;  %v1782_v1 = vpop.f32.mrf.mxu0 }
 0x24f   :  { %v4963_v44 = vpop.f32.mrf.mxu3  ;;  %v1878_v17 = vadd.f32 %v1877_v16, %v1829_v55  ;;  %v1831_v2 = vpop.f32.mrf.mxu1  ;;  %v1783_v48 = vadd.f32 %v1782_v1, %v4798_v15 }
 0x251   :  { %v4969_v61 = vmax.f32 %v5263_v36, %v1878_v17  ;;  %v1832_v26 = vadd.f32 %v1831_v2, %v1783_v48  ;;  %2282 = vmatmul.bf16.gmra.mxu0 %v5264_v3  ;;  %v5269_v17 = vmax.f32 %v4581_v10, %v4804_v12  ;;  %v5270_v2 = vld [vmem:[#allocation8_spill] sm:$0xff]  ;;  %v5271_v48 = vld [vmem:[#allocation21_spill] sm:$0xff] }
 0x252   :  { %2331 = vmatmul.bf16.gmra.mxu1 %v5235_v13  ;;  %v5272_v12 = vld [vmem:[#allocation28_spill] sm:$0xff] }
 0x253   :  { %2380 = vmatmul.bf16.gmra.mxu2 %v4067_v33 }
 0x254   :  { %3522 = vmatmul.msk.bf16.gmra.mxu3 %vm551_vm0, %v5265_v6 }
 0x256   :  { %v1880_v53 = vpop.f32.mrf.mxu2  ;;  %v1784_v15 = vpop.f32.mrf.mxu0 }
 0x257   :  { %v4976_v37 = vpop.f32.mrf.mxu3  ;;  %v1881_v19 = vadd.f32 %v1880_v53, %v1832_v26  ;;  %v1833_v11 = vpop.f32.mrf.mxu1  ;;  %v1785_v39 = vadd.f32 %v1784_v15, %v4808_v25  ;;  %v5273_v53 = vld [vmem:[#allocation7_spill] sm:$0xff] }
 0x259   :  { %v4982_v20 = vmax.f32 %v5268_v54, %v1881_v19  ;;  %v1834_v40 = vadd.f32 %v1833_v11, %v1785_v39  ;;  %v5274_v19 = vmax.f32 %v5272_v12, %v5273_v53  ;;  %v5281_v53 = vmax.f32 %v4632_v56, %v4863_v43  ;;  %v5286_v43 = vld [vmem:[#allocation11_spill] sm:$0xff] }
 0x25e   :  { %v1882_v13 = vpop.f32.mrf.mxu2  ;;  %v1787_v22 = vpop.f32.mrf.mxu0 }
 0x25f   :  { %v4984_v28 = vpop.f32.mrf.mxu3  ;;  %v1883_v33 = vadd.f32 %v1882_v13, %v1834_v40  ;;  %v1836_v55 = vpop.f32.mrf.mxu1  ;;  %v1788_v16 = vadd.f32 %v1787_v22, %v4829_v49  ;;  %v5275_v40 = vmax.f32 %v4608_v41, %v4835_v60  ;;  %v5277_v22 = vld [vmem:[#allocation22_spill] sm:$0xff]  ;;  %v5278_v60 = vld [vmem:[#allocation29_spill] sm:$0xff] }
 0x261   :  { %v4990_v1 = vmax.f32 %v5269_v17, %v1883_v33  ;;  %v1837_v25 = vadd.f32 %v1836_v55, %v1788_v16  ;;  %2287 = vmatmul.bf16.gmra.mxu0 %v5270_v2  ;;  %v5276_v33 = vld [vmem:[#allocation10_spill] sm:$0xff]  ;;  %v5279_v2 = vld [vmem:[#allocation9_spill] sm:$0xff] }
 0x262   :  { %2336 = vmatmul.bf16.gmra.mxu1 %v5238_v62 }
 0x263   :  { %2385 = vmatmul.bf16.gmra.mxu2 %v4112_v52 }
 0x264   :  { %3523 = vmatmul.msk.bf16.gmra.mxu3 %vm551_vm0, %v5271_v48  ;;  %v5280_v48 = vmax.f32 %v5278_v60, %v5279_v2 }
 0x266   :  { %v1885_v36 = vpop.f32.mrf.mxu2  ;;  %v1789_v49 = vpop.f32.mrf.mxu0 }
 0x267   :  { %v4997_v26 = vpop.f32.mrf.mxu3  ;;  %v1886_v3 = vadd.f32 %v1885_v36, %v1837_v25  ;;  %v1838_v6 = vpop.f32.mrf.mxu1  ;;  %v1790_v10 = vadd.f32 %v1789_v49, %v4839_v23 }
 0x269   :  { %v5003_v15 = vmax.f32 %v5274_v19, %v1886_v3  ;;  %v1839_v11 = vadd.f32 %v1838_v6, %v1790_v10 }
 0x26e   :  { %v1887_v62 = vpop.f32.mrf.mxu2  ;;  %v1792_v59 = vpop.f32.mrf.mxu0 }
 0x26f   :  { %v5005_v39 = vpop.f32.mrf.mxu3  ;;  %v1888_v52 = vadd.f32 %v1887_v62, %v1839_v11  ;;  %v1841_v14 = vpop.f32.mrf.mxu1  ;;  %v1793_v54 = vadd.f32 %v1792_v59, %v4857_v50  ;;  %v5282_v11 = vld [vmem:[#allocation13_spill] sm:$0xff]  ;;  %v5283_v62 = vld [vmem:[#allocation14_spill] sm:$0xff]  ;;  %v5285_v59 = vld [vmem:[#allocation23_spill] sm:$0xff] }
 0x271   :  { %v5011_v13 = vmax.f32 %v5275_v40, %v1888_v52  ;;  %v1842_v23 = vadd.f32 %v1841_v14, %v1793_v54  ;;  %2292 = vmatmul.bf16.gmra.mxu0 %v5276_v33  ;;  %v5284_v52 = vld [vmem:[#allocation15_spill] sm:$0xff]  ;;  %v5287_v33 = vmax.f32 %v5246_v31, %v5286_v43  ;;  %v5290_v31 = vld [vmem:[#allocation18_spill] sm:$0xff] }
 0x272   :  { %2341 = vmatmul.bf16.gmra.mxu1 %v5241_v57 }
 0x273   :  { %2390 = vmatmul.bf16.gmra.mxu2 %v4160_v8 }
 0x274   :  { %3524 = vmatmul.msk.bf16.gmra.mxu3 %vm551_vm0, %v5277_v22 }
 0x276   :  { %v1890_v55 = vpop.f32.mrf.mxu2  ;;  %v1794_v50 = vpop.f32.mrf.mxu0 }
 0x277   :  { %v5018_v16 = vpop.f32.mrf.mxu3  ;;  %v1891_v17 = vadd.f32 %v1890_v55, %v1842_v23  ;;  %v1843_v25 = vpop.f32.mrf.mxu1  ;;  %v1795_v41 = vadd.f32 %v1794_v50, %v4867_v4 }
 0x279   :  { %v5024_v36 = vmax.f32 %v5280_v48, %v1891_v17  ;;  %v1844_v3 = vadd.f32 %v1843_v25, %v1795_v41  ;;  %v5288_v48 = vmax.f32 %v4662_v9, %v4882_v32  ;;  %v5292_v32 = vld [vmem:[#allocation12_spill] sm:$0xff] }
 0x27e   :  { %v1892_v57 = vpop.f32.mrf.mxu2  ;;  %v1797_v6 = vpop.f32.mrf.mxu0 }
 0x27f   :  { %v5026_v49 = vpop.f32.mrf.mxu3  ;;  %v1893_v8 = vadd.f32 %v1892_v57, %v1844_v3  ;;  %v1846_v10 = vpop.f32.mrf.mxu1  ;;  %v1798_v12 = vadd.f32 %v1797_v6, %v4879_v5  ;;  %v5289_v57 = vld [vmem:[#allocation16_spill] sm:$0xff] }
 0x281   :  { %v5032_v19 = vmax.f32 %v5281_v53, %v1893_v8  ;;  %v1847_v4 = vadd.f32 %v1846_v10, %v1798_v12  ;;  %2297 = vmatmul.bf16.gmra.mxu0 %v5282_v11  ;;  %v5291_v8 = vld [vmem:[#allocation24_spill] sm:$0xff] }
 0x282   :  { %2346 = vmatmul.bf16.gmra.mxu1 %v5283_v62 }
 0x283   :  { %2395 = vmatmul.bf16.gmra.mxu2 %v5284_v52 }
 0x284   :  { %3525 = vmatmul.msk.bf16.gmra.mxu3 %vm551_vm0, %v5285_v59 }
 0x286   :  { %v1895_v14 = vpop.f32.mrf.mxu2  ;;  %v1799_v5 = vpop.f32.mrf.mxu0 }
 0x287   :  { %v5039_v54 = vpop.f32.mrf.mxu3  ;;  %v1896_v40 = vadd.f32 %v1895_v14, %v1847_v4  ;;  %v1848_v23 = vpop.f32.mrf.mxu1  ;;  %v1800_v56 = vadd.f32 %v1799_v5, %v4886_v27  ;;  %v5293_v4 = vmax.f32 %v5249_v18, %v5292_v32 }
 0x289   :  { %v5045_v22 = vmax.f32 %v5287_v33, %v1896_v40  ;;  %v1849_v55 = vadd.f32 %v1848_v23, %v1800_v56 }
 0x28e   :  { %v1897_v17 = vpop.f32.mrf.mxu2  ;;  %v1802_v41 = vpop.f32.mrf.mxu0 }
 0x28f   :  { %v5047_v50 = vpop.f32.mrf.mxu3  ;;  %v1898_v25 = vadd.f32 %v1897_v17, %v1849_v55  ;;  %v1851_v60 = vpop.f32.mrf.mxu1  ;;  %v1803_v2 = vadd.f32 %v1802_v41, %v4898_v30 }
 0x291   :  { %v5053_v3 = vmax.f32 %v5288_v48, %v1898_v25  ;;  %v1852_v27 = vadd.f32 %v1851_v60, %v1803_v2  ;;  %2302 = vmatmul.bf16.gmra.mxu0 %v5289_v57 }
 0x292   :  { %2351 = vmatmul.bf16.gmra.mxu1 %v5248_v46 }
 0x293   :  { %2400 = vmatmul.bf16.gmra.mxu2 %v5290_v31 }
 0x294   :  { %3526 = vmatmul.msk.bf16.gmra.mxu3 %vm551_vm0, %v5291_v8 }
 0x296   :  { %v1900_v6 = vpop.f32.mrf.mxu2  ;;  %v1804_v30 = vpop.f32.mrf.mxu0 }
 0x297   :  { %v5060_v10 = vpop.f32.mrf.mxu3  ;;  %v1901_v12 = vadd.f32 %v1900_v6, %v1852_v27  ;;  %v1853_v53 = vpop.f32.mrf.mxu1  ;;  %v1805_v9 = vadd.f32 %v1804_v30, %v4905_v34 }
 0x299   :  { %v5066_v11 = vmax.f32 %v5293_v4, %v1901_v12  ;;  %v1854_v62 = vadd.f32 %v1853_v53, %v1805_v9 }
 0x29e   :  { %v1902_v46 = vpop.f32.mrf.mxu2  ;;  %v2268_v14 = vpop.f32.mrf.mxu0 }
 0x29f   :  { %v5068_v52 = vpop.f32.mrf.mxu3  ;;  %v1903_v59 = vadd.f32 %v1902_v46, %v1854_v62  ;;  %v2317_v40 = vpop.f32.mrf.mxu1  ;;  %v2269_v23 = vadd.f32 %v2268_v14, %v4913_v63 }
 0x2a1   :  { %v5073_v5 = vmax.f32 %v1370_v47, %v1903_v59  ;;  %v2318_v34 = vadd.f32 %v2317_v40, %v2269_v23 }
 0x2a6   :  { %v2366_v56 = vpop.f32.mrf.mxu2  ;;  %v2270_v33 = vpop.f32.mrf.mxu0 }
 0x2a7   :  { %v2415_v43 = vpop.f32.mrf.mxu3  ;;  %v2367_v18 = vadd.f32 %v2366_v56, %v2318_v34  ;;  %v2319_v55 = vpop.f32.mrf.mxu1  ;;  %v2271_v17 = vadd.f32 %v2270_v33, %v4921_v0 }
 0x2a9   :  { %v2416_v25 = vadd.f32 %v2415_v43, %v2367_v18  ;;  %v2320_v41 = vadd.f32 %v2319_v55, %v2271_v17 }
 0x2ab   :  { %v2455_v48 = vmax.f32 %v4919_v42, %v2416_v25 }
 0x2ad   :  { %v2475_v31 = vadd.f32 %v5081_v7, %v2455_v48 }
 0x2ae   :  { %v2368_v60 = vpop.f32.mrf.mxu2  ;;  %v2273_v47 = vpop.f32.mrf.mxu0 }
 0x2af   :  { %v2417_v2 = vpop.f32.mrf.mxu3  ;;  %v2369_v29 = vadd.f32 %v2368_v60, %v2320_v41  ;;  %v2322_v63 = vpop.f32.mrf.mxu1  ;;  %v2274_v57 = vadd.f32 %v2273_v47, %v4934_v24  ;;  %v2491_v30 = vmax.f32 %v2475_v31, 0.0 }
 0x2b1   :  { %v2418_v27 = vadd.f32 %v2417_v2, %v2369_v29  ;;  %v2323_v6 = vadd.f32 %v2322_v63, %v2274_v57 }
 0x2b3   :  { %v2456_v0 = vmax.f32 %v4927_v21, %v2418_v27 }
 0x2b5   :  { %v2476_v8 = vadd.f32 %v5081_v7, %v2456_v0 }
 0x2b6   :  { %v2371_v12 = vpop.f32.mrf.mxu2  ;;  %v2275_v32 = vpop.f32.mrf.mxu0 }
 0x2b7   :  { %v2420_v42 = vpop.f32.mrf.mxu3  ;;  %v2492_v53 = vmax.f32 %v2476_v8, 0.0  ;;  %v2372_v9 = vadd.f32 %v2371_v12, %v2323_v6  ;;  %v2324_v4 = vpop.f32.mrf.mxu1  ;;  %v2276_v46 = vadd.f32 %v2275_v32, %v4942_v45 }
 0x2b9   :  { %v3714_v62 = vpack.c.bf16 %v2492_v53, %v2491_v30  ;;  %v2421_v24 = vadd.f32 %v2420_v42, %v2372_v9  ;;  %v2325_v59 = vadd.f32 %v2324_v4, %v2276_v46 }
 0x2bb   :  { %3715 = vst [vmem:[%s5155_s3] sm:$0xff] %v3714_v62   ;;  %v2457_v40 = vmax.f32 %v4940_v51, %v2421_v24 }
 0x2bd   :  { %v2477_v33 = vadd.f32 %v5081_v7, %v2457_v40 }
 0x2be   :  { %v2373_v21 = vpop.f32.mrf.mxu2  ;;  %v2278_v34 = vpop.f32.mrf.mxu0 }
 0x2bf   :  { %v2422_v14 = vpop.f32.mrf.mxu3  ;;  %v2374_v23 = vadd.f32 %v2373_v21, %v2325_v59  ;;  %v2327_v56 = vpop.f32.mrf.mxu1  ;;  %v2279_v18 = vadd.f32 %v2278_v34, %v4955_v35  ;;  %v2493_v60 = vmax.f32 %v2477_v33, 0.0 }
 0x2c1   :  { %v2423_v43 = vadd.f32 %v2422_v14, %v2374_v23  ;;  %v2328_v17 = vadd.f32 %v2327_v56, %v2279_v18 }
 0x2c3   :  { %v2458_v45 = vmax.f32 %v4948_v38, %v2423_v43 }
 0x2c5   :  { %v2478_v55 = vadd.f32 %v5081_v7, %v2458_v45 }
 0x2c6   :  { %v2376_v25 = vpop.f32.mrf.mxu2  ;;  %v2280_v29 = vpop.f32.mrf.mxu0 }
 0x2c7   :  { %v2425_v41 = vpop.f32.mrf.mxu3  ;;  %v2494_v2 = vmax.f32 %v2478_v55, 0.0  ;;  %v2377_v48 = vadd.f32 %v2376_v25, %v2328_v17  ;;  %v2329_v51 = vpop.f32.mrf.mxu1  ;;  %v2281_v63 = vadd.f32 %v2280_v29, %v4963_v44 }
 0x2c9   :  { %v3719_v47 = vpack.c.bf16 %v2494_v2, %v2493_v60  ;;  %v2426_v35 = vadd.f32 %v2425_v41, %v2377_v48  ;;  %v2330_v27 = vadd.f32 %v2329_v51, %v2281_v63 }
 0x2cb   :  { %3751 = vst [vmem:[%s5155_s3 + $0x8] sm:$0xff] %v3719_v47   ;;  %v2459_v31 = vmax.f32 %v4961_v58, %v2426_v35 }
 0x2cd   :  { %v2479_v30 = vadd.f32 %v5081_v7, %v2459_v31 }
 0x2ce   :  { %v2378_v38 = vpop.f32.mrf.mxu2  ;;  %v2283_v8 = vpop.f32.mrf.mxu0 }
 0x2cf   :  { %v2427_v57 = vpop.f32.mrf.mxu3  ;;  %v2379_v0 = vadd.f32 %v2378_v38, %v2330_v27  ;;  %v2332_v6 = vpop.f32.mrf.mxu1  ;;  %v2284_v42 = vadd.f32 %v2283_v8, %v4976_v37  ;;  %v2495_v62 = vmax.f32 %v2479_v30, 0.0 }
 0x2d1   :  { %v2428_v12 = vadd.f32 %v2427_v57, %v2379_v0  ;;  %v2333_v9 = vadd.f32 %v2332_v6, %v2284_v42 }
 0x2d3   :  { %v2460_v44 = vmax.f32 %v4969_v61, %v2428_v12 }
 0x2d5   :  { %v2480_v53 = vadd.f32 %v5081_v7, %v2460_v44 }
 0x2d6   :  { %v2381_v32 = vpop.f32.mrf.mxu2  ;;  %v2285_v59 = vpop.f32.mrf.mxu0 }
 0x2d7   :  { %v2430_v4 = vpop.f32.mrf.mxu3  ;;  %v2496_v46 = vmax.f32 %v2480_v53, 0.0  ;;  %v2382_v24 = vadd.f32 %v2381_v32, %v2333_v9  ;;  %v2334_v58 = vpop.f32.mrf.mxu1  ;;  %v2286_v14 = vadd.f32 %v2285_v59, %v4984_v28 }
 0x2d9   :  { %v3724_v21 = vpack.c.bf16 %v2496_v46, %v2495_v62  ;;  %v2431_v37 = vadd.f32 %v2430_v4, %v2382_v24  ;;  %v2335_v40 = vadd.f32 %v2334_v58, %v2286_v14 }
 0x2db   :  { %3752 = vst [vmem:[%s5155_s3 + $0x10] sm:$0xff] %v3724_v21   ;;  %v2461_v34 = vmax.f32 %v4982_v20, %v2431_v37 }
 0x2dd   :  { %v2481_v55 = vadd.f32 %v5081_v7, %v2461_v34 }
 0x2de   :  { %v2383_v61 = vpop.f32.mrf.mxu2  ;;  %v2288_v43 = vpop.f32.mrf.mxu0 }
 0x2df   :  { %v2432_v23 = vpop.f32.mrf.mxu3  ;;  %v2384_v56 = vadd.f32 %v2383_v61, %v2335_v40  ;;  %v2337_v18 = vpop.f32.mrf.mxu1  ;;  %v2289_v45 = vadd.f32 %v2288_v43, %v4997_v26  ;;  %v2497_v2 = vmax.f32 %v2481_v55, 0.0 }
 0x2e1   :  { %v2433_v33 = vadd.f32 %v2432_v23, %v2384_v56  ;;  %v2338_v25 = vadd.f32 %v2337_v18, %v2289_v45 }
 0x2e3   :  { %v2462_v28 = vmax.f32 %v4990_v1, %v2433_v33 }
 0x2e5   :  { %v2482_v17 = vadd.f32 %v5081_v7, %v2462_v28 }
 0x2e6   :  { %v2386_v41 = vpop.f32.mrf.mxu2  ;;  %v2290_v51 = vpop.f32.mrf.mxu0 }
 0x2e7   :  { %v2435_v60 = vpop.f32.mrf.mxu3  ;;  %v2498_v48 = vmax.f32 %v2482_v17, 0.0  ;;  %v2387_v29 = vadd.f32 %v2386_v41, %v2338_v25  ;;  %v2339_v20 = vpop.f32.mrf.mxu1  ;;  %v2291_v63 = vadd.f32 %v2290_v51, %v5005_v39 }
 0x2e9   :  { %v3729_v47 = vpack.c.bf16 %v2498_v48, %v2497_v2  ;;  %v2436_v26 = vadd.f32 %v2435_v60, %v2387_v29  ;;  %v2340_v35 = vadd.f32 %v2339_v20, %v2291_v63 }
 0x2eb   :  { %3753 = vst [vmem:[%s5155_s3 + $0x18] sm:$0xff] %v3729_v47   ;;  %v2463_v38 = vmax.f32 %v5003_v15, %v2436_v26 }
 0x2ed   :  { %v2483_v12 = vadd.f32 %v5081_v7, %v2463_v38 }
 0x2ee   :  { %v2388_v1 = vpop.f32.mrf.mxu2  ;;  %v2293_v31 = vpop.f32.mrf.mxu0 }
 0x2ef   :  { %v2437_v27 = vpop.f32.mrf.mxu3  ;;  %v2389_v57 = vadd.f32 %v2388_v1, %v2340_v35  ;;  %v2342_v0 = vpop.f32.mrf.mxu1  ;;  %v2294_v6 = vadd.f32 %v2293_v31, %v5018_v16  ;;  %v2499_v9 = vmax.f32 %v2483_v12, 0.0 }
 0x2f1   :  { %v2438_v8 = vadd.f32 %v2437_v27, %v2389_v57  ;;  %v2343_v30 = vadd.f32 %v2342_v0, %v2294_v6 }
 0x2f3   :  { %v2464_v39 = vmax.f32 %v5011_v13, %v2438_v8 }
 0x2f5   :  { %v2484_v42 = vadd.f32 %v5081_v7, %v2464_v39 }
 0x2f6   :  { %v2391_v44 = vpop.f32.mrf.mxu2  ;;  %v2295_v62 = vpop.f32.mrf.mxu0 }
 0x2f7   :  { %v2440_v53 = vpop.f32.mrf.mxu3  ;;  %v2500_v32 = vmax.f32 %v2484_v42, 0.0  ;;  %v2392_v4 = vadd.f32 %v2391_v44, %v2343_v30  ;;  %v2344_v15 = vpop.f32.mrf.mxu1  ;;  %v2296_v24 = vadd.f32 %v2295_v62, %v5026_v49 }
 0x2f9   :  { %v3734_v46 = vpack.c.bf16 %v2500_v32, %v2499_v9  ;;  %v2441_v16 = vadd.f32 %v2440_v53, %v2392_v4  ;;  %v2345_v59 = vadd.f32 %v2344_v15, %v2296_v24 }
 0x2fb   :  { %3754 = vst [vmem:[%s5155_s3 + $0x20] sm:$0xff] %v3734_v46   ;;  %v2465_v21 = vmax.f32 %v5024_v36, %v2441_v16 }
 0x2fd   :  { %v2485_v34 = vadd.f32 %v5081_v7, %v2465_v21 }
 0x2fe   :  { %v2393_v13 = vpop.f32.mrf.mxu2  ;;  %v2298_v37 = vpop.f32.mrf.mxu0 }
 0x2ff   :  { %v2442_v58 = vpop.f32.mrf.mxu3  ;;  %v2394_v14 = vadd.f32 %v2393_v13, %v2345_v59  ;;  %v2347_v40 = vpop.f32.mrf.mxu1  ;;  %v2299_v23 = vadd.f32 %v2298_v37, %v5039_v54  ;;  %v2501_v45 = vmax.f32 %v2485_v34, 0.0 }
 0x301   :  { %v2443_v61 = vadd.f32 %v2442_v58, %v2394_v14  ;;  %v2348_v43 = vadd.f32 %v2347_v40, %v2299_v23 }
 0x303   :  { %v2466_v49 = vmax.f32 %v5032_v19, %v2443_v61 }
 0x305   :  { %v2486_v56 = vadd.f32 %v5081_v7, %v2466_v49 }
 0x306   :  { %v2396_v18 = vpop.f32.mrf.mxu2  ;;  %v2300_v17 = vpop.f32.mrf.mxu0 }
 0x307   :  { %v2445_v33 = vpop.f32.mrf.mxu3  ;;  %v2502_v55 = vmax.f32 %v2486_v56, 0.0  ;;  %v2397_v28 = vadd.f32 %v2396_v18, %v2348_v43  ;;  %v2349_v36 = vpop.f32.mrf.mxu1  ;;  %v2301_v41 = vadd.f32 %v2300_v17, %v5047_v50 }
 0x309   :  { %v3739_v25 = vpack.c.bf16 %v2502_v55, %v2501_v45  ;;  %v2446_v54 = vadd.f32 %v2445_v33, %v2397_v28  ;;  %v2350_v60 = vadd.f32 %v2349_v36, %v2301_v41 }
 0x30b   :  { %3755 = vst [vmem:[%s5155_s3 + $0x28] sm:$0xff] %v3739_v25   ;;  %v2467_v48 = vmax.f32 %v5045_v22, %v2446_v54 }
 0x30d   :  { %v2487_v26 = vadd.f32 %v5081_v7, %v2467_v48 }
 0x30e   :  { %v2398_v19 = vpop.f32.mrf.mxu2  ;;  %v2303_v51 = vpop.f32.mrf.mxu0 }
 0x30f   :  { %v2447_v2 = vpop.f32.mrf.mxu3  ;;  %v2399_v29 = vadd.f32 %v2398_v19, %v2350_v60  ;;  %v2304_v47 = vadd.f32 %v2303_v51, %v5060_v10  ;;  %v2352_v63 = vpop.f32.mrf.mxu1  ;;  %v2503_v57 = vmax.f32 %v2487_v26, 0.0 }
 0x311   :  { %v2448_v20 = vadd.f32 %v2447_v2, %v2399_v29  ;;  %v2353_v1 = vadd.f32 %v2352_v63, %v2304_v47 }
 0x313   :  { %v2468_v50 = vmax.f32 %v5053_v3, %v2448_v20 }
 0x315   :  { %v2488_v35 = vadd.f32 %v5081_v7, %v2468_v50 }
 0x316   :  { %v2401_v27 = vpop.f32.mrf.mxu2  ;;  %v2305_v8 = vpop.f32.mrf.mxu0 }
 0x317   :  { %v2450_v38 = vpop.f32.mrf.mxu3  ;;  %v2504_v31 = vmax.f32 %v2488_v35, 0.0  ;;  %v2402_v0 = vadd.f32 %v2401_v27, %v2353_v1  ;;  %v2306_v6 = vadd.f32 %v2305_v8, %v5068_v52  ;;  %v2354_v12 = vpop.f32.mrf.mxu1 }
 0x319   :  { %v3744_v22 = vpack.c.bf16 %v2504_v31, %v2503_v57  ;;  %v2451_v10 = vadd.f32 %v2450_v38, %v2402_v0  ;;  %v2355_v39 = vadd.f32 %v2354_v12, %v2306_v6 }
 0x31b   :  { %3756 = vst [vmem:[%s5155_s3 + $0x30] sm:$0xff] %v3744_v22   ;;  %v2469_v42 = vmax.f32 %v5066_v11, %v2451_v10 }
 0x31d   :  { %v2489_v9 = vadd.f32 %v5081_v7, %v2469_v42 }
 0x31e   :  { %v2403_v3 = vpop.f32.mrf.mxu2 }
 0x31f   :  { %v2404_v30 = vadd.f32 %v2403_v3, %v2355_v39  ;;  %v2452_v44 = vpop.f32.mrf.mxu3  ;;  %v2505_v52 = vmax.f32 %v2489_v9, 0.0 }
 0x321   :  { %v2453_v53 = vadd.f32 %v2452_v44, %v2404_v30 }
 0x323   :  { %v2470_v32 = vmax.f32 %v5073_v5, %v2453_v53 }
 0x325   :  { %v2490_v4 = vadd.f32 %v5081_v7, %v2470_v32 }
 0x327   :  { %v2506_v62 = vmax.f32 %v2490_v4, 0.0 }
 0x329   :  { %v3749_v15 = vpack.c.bf16 %v2506_v62, %v2505_v52 }
 0x32b   :  { %3757 = vst [vmem:[%s5155_s3 + $0x38] sm:$0xff] %v3749_v15  }

// kernel: convnet_forward.5
= control target key start
LH: loop header
LB: loop body
LE: loop exit
PB: predicated region body
PF: predicated region fallthrough
CT: control target
= control target key end

     0   :  { %s9473_s0 = inlined_call_operand.vmem [shape: bf16[2,8192], index: 0, kind: input, shape index: {}]   ;;  %s9474_s1 = inlined_call_operand.vmem [shape: bf16[8192,128], index: 1, kind: input, shape index: {}]   ;;  %s9475_s2 = inlined_call_operand.vmem [shape: f32[1,128], index: 2, kind: input, shape index: {}]   ;;  %s9476_s3 = inlined_call_operand.vmem [shape: bf16[128,128], index: 3, kind: input, shape index: {}]   ;;  %s9477_s4 = inlined_call_operand.vmem [shape: f32[1,128], index: 4, kind: input, shape index: {}]   ;;  %s9478_s5 = inlined_call_operand.hbm [shape: f32[2,128], index: 5, kind: output, shape index: {}]  }
   0x1   :  { %v7292_v0 = vld [vmem:[%s9474_s1 + $0x38] sm:$0xff]  ;;  %v7291_v4 = vld [vmem:[%s9474_s1 + $0x30] sm:$0xff]  ;;  %v7290_v8 = vld [vmem:[%s9474_s1 + $0x28] sm:$0xff] }
   0x2   :  { %v7300_v1 = vld [vmem:[%s9474_s1 + $0x78] sm:$0xff]  ;;  %4273 = vmatpush.bf16.msra.mxu0 %v7292_v0  ;;  %v7299_v5 = vld [vmem:[%s9474_s1 + $0x70] sm:$0xff]  ;;  %v7298_v9 = vld [vmem:[%s9474_s1 + $0x68] sm:$0xff] }
   0x3   :  { %v7308_v2 = vld [vmem:[%s9474_s1 + $0xb8] sm:$0xff]  ;;  %4286 = vmatpush.bf16.msra.mxu1 %v7300_v1  ;;  %v7307_v6 = vld [vmem:[%s9474_s1 + $0xb0] sm:$0xff]  ;;  %v7306_v10 = vld [vmem:[%s9474_s1 + $0xa8] sm:$0xff] }
   0x4   :  { %v7316_v3 = vld [vmem:[%s9474_s1 + $0xf8] sm:$0xff]  ;;  %4299 = vmatpush.bf16.msra.mxu2 %v7308_v2  ;;  %v7315_v7 = vld [vmem:[%s9474_s1 + $0xf0] sm:$0xff]  ;;  %v7314_v11 = vld [vmem:[%s9474_s1 + $0xe8] sm:$0xff] }
   0x5   :  { %4312 = vmatpush.bf16.msra.mxu3 %v7316_v3  ;;  %v7289_v12 = vld [vmem:[%s9474_s1 + $0x20] sm:$0xff]  ;;  %v7288_v16 = vld [vmem:[%s9474_s1 + $0x18] sm:$0xff]  ;;  %v7287_v20 = vld [vmem:[%s9474_s1 + $0x10] sm:$0xff] }
   0x6   :  { %4274 = vmatpush.bf16.msra.mxu0 %v7291_v4  ;;  %v7297_v13 = vld [vmem:[%s9474_s1 + $0x60] sm:$0xff]  ;;  %v7296_v17 = vld [vmem:[%s9474_s1 + $0x58] sm:$0xff]  ;;  %v7295_v21 = vld [vmem:[%s9474_s1 + $0x50] sm:$0xff] }
   0x7   :  { %4287 = vmatpush.bf16.msra.mxu1 %v7299_v5  ;;  %v7305_v14 = vld [vmem:[%s9474_s1 + $0xa0] sm:$0xff]  ;;  %v7304_v18 = vld [vmem:[%s9474_s1 + $0x98] sm:$0xff]  ;;  %v7303_v23 = vld [vmem:[%s9474_s1 + $0x90] sm:$0xff] }
   0x8   :  { %4300 = vmatpush.bf16.msra.mxu2 %v7307_v6  ;;  %v7313_v15 = vld [vmem:[%s9474_s1 + $0xe0] sm:$0xff]  ;;  %v7312_v19 = vld [vmem:[%s9474_s1 + $0xd8] sm:$0xff]  ;;  %v7311_v24 = vld [vmem:[%s9474_s1 + $0xd0] sm:$0xff] }
   0x9   :  { %4313 = vmatpush.bf16.msra.mxu3 %v7315_v7  ;;  %v21_v22 = vld [vmem:[%s9473_s0] sm:$0xff] }
   0xa   :  { %4275 = vmatpush.bf16.msra.mxu0 %v7290_v8  ;;  %1058 = vst [vmem:[#allocation1] ss:$9 sm:$0xff] %v21_v22 }
   0xb   :  { %4288 = vmatpush.bf16.msra.mxu1 %v7298_v9 }
   0xc   :  { %4301 = vmatpush.bf16.msra.mxu2 %v7306_v10 }
   0xd   :  { %4314 = vmatpush.bf16.msra.mxu3 %v7314_v11 }
   0xe   :  { %4276 = vmatpush.bf16.msra.mxu0 %v7289_v12 }
   0xf   :  { %4289 = vmatpush.bf16.msra.mxu1 %v7297_v13 }
  0x10   :  { %4302 = vmatpush.bf16.msra.mxu2 %v7305_v14 }
  0x11   :  { %4315 = vmatpush.bf16.msra.mxu3 %v7313_v15 }
  0x12   :  { %4277 = vmatpush.bf16.msra.mxu0 %v7288_v16 }
  0x13   :  { %4290 = vmatpush.bf16.msra.mxu1 %v7296_v17 }
  0x14   :  { %4303 = vmatpush.bf16.msra.mxu2 %v7304_v18 }
  0x15   :  { %4316 = vmatpush.bf16.msra.mxu3 %v7312_v19 }
  0x16   :  { %10 = vsyncpa [#allocation3], 0  ;;  %4278 = vmatpush.bf16.msra.mxu0 %v7287_v20  ;;  %v7286_v25 = vld [vmem:[%s9474_s1 + $0x8] sm:$0xff]  ;;  %v7285_v29 = vld [vmem:[%s9474_s1] sm:$0xff]  ;;  %s7834_s18 = smov [#allocation2]   ;;  %s5196_s22 = sshll.u32 %s9478_s5, 4  ;;  %s5197_s22 = int_to_ptr.hbm [resolvable:$true] %s5196_s22 }
  0x17   :  { %4291 = vmatpush.bf16.msra.mxu1 %v7295_v21  ;;  %v7294_v26 = vld [vmem:[%s9474_s1 + $0x48] sm:$0xff]  ;;  %v7293_v30 = vld [vmem:[%s9474_s1 + $0x40] sm:$0xff]  ;;  %v7324_v33 = vld [vmem:[%s9474_s1 + $0x138] sm:$0xff]  ;;  %s5194_s19 = sshll.u32 %s7834_s18, 4  ;;  %s5195_s19 = int_to_ptr.vmem [resolvable:$true] %s5194_s19 }
  0x18   :  { %4304 = vmatpush.bf16.msra.mxu2 %v7303_v23  ;;  %v7302_v27 = vld [vmem:[%s9474_s1 + $0x88] sm:$0xff]  ;;  %v7301_v31 = vld [vmem:[%s9474_s1 + $0x80] sm:$0xff]  ;;  %v7332_v34 = vld [vmem:[%s9474_s1 + $0x178] sm:$0xff] }
  0x19   :  { %4317 = vmatpush.bf16.msra.mxu3 %v7311_v24  ;;  %v7310_v28 = vld [vmem:[%s9474_s1 + $0xc8] sm:$0xff]  ;;  %v7309_v32 = vld [vmem:[%s9474_s1 + $0xc0] sm:$0xff]  ;;  %v7340_v35 = vld [vmem:[%s9474_s1 + $0x1b8] sm:$0xff] }
  0x1a   :  { %4279 = vmatpush.bf16.msra.mxu0 %v7286_v25  ;;  %v7348_v36 = vld [vmem:[%s9474_s1 + $0x1f8] sm:$0xff]  ;;  %v7323_v37 = vld [vmem:[%s9474_s1 + $0x130] sm:$0xff]  ;;  %v1059_v39 = vld [vmem:[#allocation1] sm:$0xff] }
  0x1b   :  { %4292 = vmatpush.bf16.msra.mxu1 %v7294_v26  ;;  %v1061_v38 = vld [vmem:[#allocation1 + $0x12] sm:$0xff]  ;;  %v1062_v41 = vld [vmem:[#allocation1 + $0x1b] sm:$0xff]  ;;  %v1060_v42 = vld [vmem:[#allocation1 + $0x9] sm:$0xff] }
  0x1c   :  { %4305 = vmatpush.bf16.msra.mxu2 %v7302_v27  ;;  %v7331_v40 = vld [vmem:[%s9474_s1 + $0x170] sm:$0xff]  ;;  %v7322_v45 = vld [vmem:[%s9474_s1 + $0x128] sm:$0xff]  ;;  %v7321_v49 = vld [vmem:[%s9474_s1 + $0x120] sm:$0xff] }
  0x1d   :  { %4318 = vmatpush.bf16.msra.mxu3 %v7310_v28  ;;  %v7339_v43 = vld [vmem:[%s9474_s1 + $0x1b0] sm:$0xff]  ;;  %v7330_v46 = vld [vmem:[%s9474_s1 + $0x168] sm:$0xff]  ;;  %v7329_v50 = vld [vmem:[%s9474_s1 + $0x160] sm:$0xff] }
  0x1e   :  { %4280 = vmatpush.bf16.msra.mxu0 %v7285_v29  ;;  %v7347_v44 = vld [vmem:[%s9474_s1 + $0x1f0] sm:$0xff]  ;;  %v7338_v47 = vld [vmem:[%s9474_s1 + $0x1a8] sm:$0xff]  ;;  %v1066_v54 = vld [vmem:[#allocation1 + $0x3f] sm:$0xff] }
  0x1f   :  { %4293 = vmatpush.bf16.msra.mxu1 %v7293_v30  ;;  %v7346_v48 = vld [vmem:[%s9474_s1 + $0x1e8] sm:$0xff]  ;;  %v1065_v51 = vld [vmem:[#allocation1 + $0x36] sm:$0xff]  ;;  %v7337_v56 = vld [vmem:[%s9474_s1 + $0x1a0] sm:$0xff] }
  0x20   :  { %4306 = vmatpush.bf16.msra.mxu2 %v7301_v31  ;;  %v22_v52 = vld [vmem:[%s9473_s0 + $0x8] sm:$0xff]  ;;  %v7345_v57 = vld [vmem:[%s9474_s1 + $0x1e0] sm:$0xff]  ;;  %v7320_v58 = vld [vmem:[%s9474_s1 + $0x118] sm:$0xff] }
  0x21   :  { %4319 = vmatpush.bf16.msra.mxu3 %v7309_v32  ;;  %4281 = vmatmul.bf16.vlgmr.msra.gmra.mxu0 %v1059_v39  ;;  %v1063_v53 = vld [vmem:[#allocation1 + $0x24] sm:$0xff]  ;;  %v1064_v55 = vld [vmem:[#allocation1 + $0x2d] sm:$0xff]  ;;  %v7328_v59 = vld [vmem:[%s9474_s1 + $0x158] sm:$0xff] }
  0x22   :  { %4325 = vmatpush.bf16.msrb.mxu0 %v7324_v33  ;;  %4294 = vmatmul.bf16.vlgmr.msra.gmra.mxu1 %v1060_v42  ;;  %1068 = vst [vmem:[#allocation1] ss:$9 sm:$0xff] %v22_v52  ;;  %v7336_v60 = vld [vmem:[%s9474_s1 + $0x198] sm:$0xff]  ;;  %v7319_v62 = vld [vmem:[%s9474_s1 + $0x110] sm:$0xff]  ;;  %v7318_v2 = vld [vmem:[%s9474_s1 + $0x108] sm:$0xff] }
  0x23   :  { %4338 = vmatpush.bf16.msrb.mxu1 %v7332_v34  ;;  %4307 = vmatmul.bf16.vlgmr.msra.gmra.mxu2 %v1061_v38  ;;  %v7344_v61 = vld [vmem:[%s9474_s1 + $0x1d8] sm:$0xff]  ;;  %v7327_v63 = vld [vmem:[%s9474_s1 + $0x150] sm:$0xff]  ;;  %v7326_v3 = vld [vmem:[%s9474_s1 + $0x148] sm:$0xff] }
  0x24   :  { %4351 = vmatpush.bf16.msrb.mxu2 %v7340_v35  ;;  %4320 = vmatmul.bf16.vlgmr.msra.gmra.mxu3 %v1062_v41  ;;  %v7335_v0 = vld [vmem:[%s9474_s1 + $0x190] sm:$0xff]  ;;  %v7334_v4 = vld [vmem:[%s9474_s1 + $0x188] sm:$0xff]  ;;  %v7317_v6 = vld [vmem:[%s9474_s1 + $0x100] sm:$0xff] }
  0x25   :  { %4364 = vmatpush.bf16.msrb.mxu3 %v7348_v36  ;;  %v7343_v1 = vld [vmem:[%s9474_s1 + $0x1d0] sm:$0xff]  ;;  %v7342_v5 = vld [vmem:[%s9474_s1 + $0x1c8] sm:$0xff]  ;;  %v7325_v7 = vld [vmem:[%s9474_s1 + $0x140] sm:$0xff] }
  0x26   :  { %4326 = vmatpush.bf16.msrb.mxu0 %v7323_v37  ;;  %v7333_v8 = vld [vmem:[%s9474_s1 + $0x180] sm:$0xff]  ;;  %v7356_v10 = vld [vmem:[%s9474_s1 + $0x238] sm:$0xff]  ;;  %v7355_v14 = vld [vmem:[%s9474_s1 + $0x230] sm:$0xff] }
  0x27   :  { %4339 = vmatpush.bf16.msrb.mxu1 %v7331_v40  ;;  %v7341_v9 = vld [vmem:[%s9474_s1 + $0x1c0] sm:$0xff]  ;;  %v7364_v11 = vld [vmem:[%s9474_s1 + $0x278] sm:$0xff]  ;;  %v7363_v15 = vld [vmem:[%s9474_s1 + $0x270] sm:$0xff] }
  0x28   :  { %4352 = vmatpush.bf16.msrb.mxu2 %v7339_v43  ;;  %v7372_v12 = vld [vmem:[%s9474_s1 + $0x2b8] sm:$0xff]  ;;  %v7371_v16 = vld [vmem:[%s9474_s1 + $0x2b0] sm:$0xff]  ;;  %v7354_v18 = vld [vmem:[%s9474_s1 + $0x228] sm:$0xff] }
  0x29   :  { %4365 = vmatpush.bf16.msrb.mxu3 %v7347_v44  ;;  %v7380_v13 = vld [vmem:[%s9474_s1 + $0x2f8] sm:$0xff]  ;;  %v7379_v17 = vld [vmem:[%s9474_s1 + $0x2f0] sm:$0xff]  ;;  %v7362_v19 = vld [vmem:[%s9474_s1 + $0x268] sm:$0xff] }
  0x2a   :  { %4327 = vmatpush.bf16.msrb.mxu0 %v7322_v45  ;;  %v7370_v20 = vld [vmem:[%s9474_s1 + $0x2a8] sm:$0xff]  ;;  %v7353_v22 = vld [vmem:[%s9474_s1 + $0x220] sm:$0xff]  ;;  %v7352_v26 = vld [vmem:[%s9474_s1 + $0x218] sm:$0xff] }
  0x2b   :  { %4340 = vmatpush.bf16.msrb.mxu1 %v7330_v46  ;;  %v7378_v21 = vld [vmem:[%s9474_s1 + $0x2e8] sm:$0xff]  ;;  %v7361_v23 = vld [vmem:[%s9474_s1 + $0x260] sm:$0xff]  ;;  %v7360_v27 = vld [vmem:[%s9474_s1 + $0x258] sm:$0xff] }
  0x2c   :  { %4353 = vmatpush.bf16.msrb.mxu2 %v7338_v47  ;;  %v7369_v24 = vld [vmem:[%s9474_s1 + $0x2a0] sm:$0xff]  ;;  %v7368_v28 = vld [vmem:[%s9474_s1 + $0x298] sm:$0xff]  ;;  %v7351_v30 = vld [vmem:[%s9474_s1 + $0x210] sm:$0xff] }
  0x2d   :  { %4366 = vmatpush.bf16.msrb.mxu3 %v7346_v48  ;;  %v7377_v25 = vld [vmem:[%s9474_s1 + $0x2e0] sm:$0xff]  ;;  %v7376_v29 = vld [vmem:[%s9474_s1 + $0x2d8] sm:$0xff]  ;;  %v7359_v31 = vld [vmem:[%s9474_s1 + $0x250] sm:$0xff] }
  0x2e   :  { %4328 = vmatpush.bf16.msrb.mxu0 %v7321_v49  ;;  %v7367_v32 = vld [vmem:[%s9474_s1 + $0x290] sm:$0xff]  ;;  %v7350_v34 = vld [vmem:[%s9474_s1 + $0x208] sm:$0xff]  ;;  %v7349_v38 = vld [vmem:[%s9474_s1 + $0x200] sm:$0xff] }
  0x2f   :  { %4341 = vmatpush.bf16.msrb.mxu1 %v7329_v50  ;;  %v7375_v33 = vld [vmem:[%s9474_s1 + $0x2d0] sm:$0xff]  ;;  %v7358_v35 = vld [vmem:[%s9474_s1 + $0x248] sm:$0xff]  ;;  %v7357_v39 = vld [vmem:[%s9474_s1 + $0x240] sm:$0xff] }
  0x30   :  { %4354 = vmatpush.bf16.msrb.mxu2 %v7337_v56  ;;  %v7366_v36 = vld [vmem:[%s9474_s1 + $0x288] sm:$0xff]  ;;  %v7365_v40 = vld [vmem:[%s9474_s1 + $0x280] sm:$0xff]  ;;  %v7388_v42 = vld [vmem:[%s9474_s1 + $0x338] sm:$0xff] }
  0x31   :  { %4367 = vmatpush.bf16.msrb.mxu3 %v7345_v57  ;;  %v7374_v37 = vld [vmem:[%s9474_s1 + $0x2c8] sm:$0xff]  ;;  %v7373_v41 = vld [vmem:[%s9474_s1 + $0x2c0] sm:$0xff]  ;;  %v7396_v43 = vld [vmem:[%s9474_s1 + $0x378] sm:$0xff] }
  0x32   :  { %4329 = vmatpush.bf16.msrb.mxu0 %v7320_v58  ;;  %v7404_v44 = vld [vmem:[%s9474_s1 + $0x3b8] sm:$0xff]  ;;  %v1069_v46 = vld [vmem:[#allocation1] sm:$0xff]  ;;  %v1070_v48 = vld [vmem:[#allocation1 + $0x9] sm:$0xff] }
  0x33   :  { %4342 = vmatpush.bf16.msrb.mxu1 %v7328_v59  ;;  %v7412_v45 = vld [vmem:[%s9474_s1 + $0x3f8] sm:$0xff]  ;;  %v7387_v50 = vld [vmem:[%s9474_s1 + $0x330] sm:$0xff]  ;;  %v7402_v56 = vld [vmem:[%s9474_s1 + $0x3a8] sm:$0xff] }
  0x34   :  { %4355 = vmatpush.bf16.msrb.mxu2 %v7336_v60  ;;  %v1071_v47 = vld [vmem:[#allocation1 + $0x12] sm:$0xff]  ;;  %v1072_v49 = vld [vmem:[#allocation1 + $0x1b] sm:$0xff]  ;;  %v7410_v57 = vld [vmem:[%s9474_s1 + $0x3e8] sm:$0xff] }
  0x35   :  { %4368 = vmatpush.bf16.msrb.mxu3 %v7344_v61  ;;  %v7403_v52 = vld [vmem:[%s9474_s1 + $0x3b0] sm:$0xff]  ;;  %v7385_v58 = vld [vmem:[%s9474_s1 + $0x320] sm:$0xff] }
  0x36   :  { %4330 = vmatpush.bf16.msrb.mxu0 %v7319_v62  ;;  %v7393_v59 = vld [vmem:[%s9474_s1 + $0x360] sm:$0xff]  ;;  %v7384_v62 = vld [vmem:[%s9474_s1 + $0x318] sm:$0xff] }
  0x37   :  { %4343 = vmatpush.bf16.msrb.mxu1 %v7327_v63  ;;  %v7401_v60 = vld [vmem:[%s9474_s1 + $0x3a0] sm:$0xff]  ;;  %v7392_v63 = vld [vmem:[%s9474_s1 + $0x358] sm:$0xff] }
  0x38   :  { %4356 = vmatpush.bf16.msrb.mxu2 %v7335_v0  ;;  %v7409_v61 = vld [vmem:[%s9474_s1 + $0x3e0] sm:$0xff]  ;;  %v7400_v0 = vld [vmem:[%s9474_s1 + $0x398] sm:$0xff] }
  0x39   :  { %4369 = vmatpush.bf16.msrb.mxu3 %v7343_v1  ;;  %v7408_v1 = vld [vmem:[%s9474_s1 + $0x3d8] sm:$0xff] }
  0x3a   :  { %4331 = vmatpush.bf16.msrb.mxu0 %v7318_v2  ;;  %v7383_v2 = vld [vmem:[%s9474_s1 + $0x310] sm:$0xff] }
  0x3b   :  { %4344 = vmatpush.bf16.msrb.mxu1 %v7326_v3  ;;  %v7391_v3 = vld [vmem:[%s9474_s1 + $0x350] sm:$0xff] }
  0x3c   :  { %4357 = vmatpush.bf16.msrb.mxu2 %v7334_v4  ;;  %v7399_v4 = vld [vmem:[%s9474_s1 + $0x390] sm:$0xff] }
  0x3d   :  { %4370 = vmatpush.bf16.msrb.mxu3 %v7342_v5  ;;  %v7407_v5 = vld [vmem:[%s9474_s1 + $0x3d0] sm:$0xff] }
  0x3e   :  { %4332 = vmatpush.bf16.msrb.mxu0 %v7317_v6  ;;  %v7382_v6 = vld [vmem:[%s9474_s1 + $0x308] sm:$0xff] }
  0x3f   :  { %4345 = vmatpush.bf16.msrb.mxu1 %v7325_v7  ;;  %v7390_v7 = vld [vmem:[%s9474_s1 + $0x348] sm:$0xff] }
  0x40   :  { %4358 = vmatpush.bf16.msrb.mxu2 %v7333_v8  ;;  %v7398_v8 = vld [vmem:[%s9474_s1 + $0x388] sm:$0xff] }
  0x41   :  { %4371 = vmatpush.bf16.msrb.mxu3 %v7341_v9  ;;  %4333 = vmatmul.bf16.vlgmr.msrb.gmra.mxu0 %v1063_v53  ;;  %v7411_v53 = vld [vmem:[%s9474_s1 + $0x3f0] sm:$0xff]  ;;  %v7406_v9 = vld [vmem:[%s9474_s1 + $0x3c8] sm:$0xff] }
  0x42   :  { %4377 = vmatpush.bf16.msra.mxu0 %v7356_v10  ;;  %4346 = vmatmul.bf16.vlgmr.msrb.gmra.mxu1 %v1064_v55  ;;  %v7394_v55 = vld [vmem:[%s9474_s1 + $0x368] sm:$0xff] }
  0x43   :  { %4390 = vmatpush.bf16.msra.mxu1 %v7364_v11  ;;  %4359 = vmatmul.bf16.vlgmr.msrb.gmra.mxu2 %v1065_v51  ;;  %v7395_v51 = vld [vmem:[%s9474_s1 + $0x370] sm:$0xff]  ;;  %v1073_v10 = vld [vmem:[#allocation1 + $0x24] sm:$0xff] }
  0x44   :  { %4403 = vmatpush.bf16.msra.mxu2 %v7372_v12  ;;  %4372 = vmatmul.bf16.vlgmr.msrb.gmra.mxu3 %v1066_v54  ;;  %v7386_v54 = vld [vmem:[%s9474_s1 + $0x328] sm:$0xff]  ;;  %v1075_v11 = vld [vmem:[#allocation1 + $0x36] sm:$0xff] }
  0x45   :  { %4416 = vmatpush.bf16.msra.mxu3 %v7380_v13  ;;  %v1074_v12 = vld [vmem:[#allocation1 + $0x2d] sm:$0xff]  ;;  %v1076_v13 = vld [vmem:[#allocation1 + $0x3f] sm:$0xff] }
  0x46   :  { %4378 = vmatpush.bf16.msra.mxu0 %v7355_v14  ;;  %v23_v14 = vld [vmem:[%s9473_s0 + $0x10] sm:$0xff] }
  0x47   :  { %4391 = vmatpush.bf16.msra.mxu1 %v7363_v15  ;;  %1078 = vst [vmem:[#allocation1] ss:$9 sm:$0xff] %v23_v14  ;;  %v7381_v15 = vld [vmem:[%s9474_s1 + $0x300] sm:$0xff]  ;;  %v7464_v14 = vld [vmem:[%s9474_s1 + $0x598] sm:$0xff] }
  0x48   :  { %4404 = vmatpush.bf16.msra.mxu2 %v7371_v16  ;;  %v7389_v16 = vld [vmem:[%s9474_s1 + $0x340] sm:$0xff] }
  0x49   :  { %4417 = vmatpush.bf16.msra.mxu3 %v7379_v17  ;;  %v7397_v17 = vld [vmem:[%s9474_s1 + $0x380] sm:$0xff] }
  0x4a   :  { %4379 = vmatpush.bf16.msra.mxu0 %v7354_v18  ;;  %v7405_v18 = vld [vmem:[%s9474_s1 + $0x3c0] sm:$0xff] }
  0x4b   :  { %4392 = vmatpush.bf16.msra.mxu1 %v7362_v19  ;;  %v7420_v19 = vld [vmem:[%s9474_s1 + $0x438] sm:$0xff] }
  0x4c   :  { %4405 = vmatpush.bf16.msra.mxu2 %v7370_v20  ;;  %v7428_v20 = vld [vmem:[%s9474_s1 + $0x478] sm:$0xff] }
  0x4d   :  { %4418 = vmatpush.bf16.msra.mxu3 %v7378_v21  ;;  %v7436_v21 = vld [vmem:[%s9474_s1 + $0x4b8] sm:$0xff] }
  0x4e   :  { %4380 = vmatpush.bf16.msra.mxu0 %v7353_v22  ;;  %v7444_v22 = vld [vmem:[%s9474_s1 + $0x4f8] sm:$0xff] }
  0x4f   :  { %4393 = vmatpush.bf16.msra.mxu1 %v7361_v23  ;;  %v7419_v23 = vld [vmem:[%s9474_s1 + $0x430] sm:$0xff] }
  0x50   :  { %4406 = vmatpush.bf16.msra.mxu2 %v7369_v24  ;;  %v7427_v24 = vld [vmem:[%s9474_s1 + $0x470] sm:$0xff] }
  0x51   :  { %4419 = vmatpush.bf16.msra.mxu3 %v7377_v25  ;;  %v7435_v25 = vld [vmem:[%s9474_s1 + $0x4b0] sm:$0xff] }
  0x52   :  { %4381 = vmatpush.bf16.msra.mxu0 %v7352_v26  ;;  %v7443_v26 = vld [vmem:[%s9474_s1 + $0x4f0] sm:$0xff] }
  0x53   :  { %4394 = vmatpush.bf16.msra.mxu1 %v7360_v27  ;;  %v7418_v27 = vld [vmem:[%s9474_s1 + $0x428] sm:$0xff] }
  0x54   :  { %4407 = vmatpush.bf16.msra.mxu2 %v7368_v28  ;;  %v7426_v28 = vld [vmem:[%s9474_s1 + $0x468] sm:$0xff] }
  0x55   :  { %4420 = vmatpush.bf16.msra.mxu3 %v7376_v29  ;;  %v7434_v29 = vld [vmem:[%s9474_s1 + $0x4a8] sm:$0xff] }
  0x56   :  { %4382 = vmatpush.bf16.msra.mxu0 %v7351_v30  ;;  %v7442_v30 = vld [vmem:[%s9474_s1 + $0x4e8] sm:$0xff] }
  0x57   :  { %4395 = vmatpush.bf16.msra.mxu1 %v7359_v31  ;;  %v7417_v31 = vld [vmem:[%s9474_s1 + $0x420] sm:$0xff] }
  0x58   :  { %4408 = vmatpush.bf16.msra.mxu2 %v7367_v32  ;;  %v7425_v32 = vld [vmem:[%s9474_s1 + $0x460] sm:$0xff] }
  0x59   :  { %4421 = vmatpush.bf16.msra.mxu3 %v7375_v33  ;;  %v7433_v33 = vld [vmem:[%s9474_s1 + $0x4a0] sm:$0xff] }
  0x5a   :  { %4383 = vmatpush.bf16.msra.mxu0 %v7350_v34  ;;  %v7441_v34 = vld [vmem:[%s9474_s1 + $0x4e0] sm:$0xff] }
  0x5b   :  { %4396 = vmatpush.bf16.msra.mxu1 %v7358_v35  ;;  %v7416_v35 = vld [vmem:[%s9474_s1 + $0x418] sm:$0xff] }
  0x5c   :  { %4409 = vmatpush.bf16.msra.mxu2 %v7366_v36  ;;  %v7424_v36 = vld [vmem:[%s9474_s1 + $0x458] sm:$0xff] }
  0x5d   :  { %4422 = vmatpush.bf16.msra.mxu3 %v7374_v37  ;;  %v7432_v37 = vld [vmem:[%s9474_s1 + $0x498] sm:$0xff] }
  0x5e   :  { %4384 = vmatpush.bf16.msra.mxu0 %v7349_v38  ;;  %v7440_v38 = vld [vmem:[%s9474_s1 + $0x4d8] sm:$0xff] }
  0x5f   :  { %4397 = vmatpush.bf16.msra.mxu1 %v7357_v39  ;;  %v7415_v39 = vld [vmem:[%s9474_s1 + $0x410] sm:$0xff] }
  0x60   :  { %4410 = vmatpush.bf16.msra.mxu2 %v7365_v40  ;;  %v7423_v40 = vld [vmem:[%s9474_s1 + $0x450] sm:$0xff] }
  0x61   :  { %4423 = vmatpush.bf16.msra.mxu3 %v7373_v41  ;;  %4385 = vmatmul.bf16.vlgmr.msra.gmra.mxu0 %v1069_v46  ;;  %v7431_v41 = vld [vmem:[%s9474_s1 + $0x490] sm:$0xff]  ;;  %v7438_v46 = vld [vmem:[%s9474_s1 + $0x4c8] sm:$0xff] }
  0x62   :  { %4429 = vmatpush.bf16.msrb.mxu0 %v7388_v42  ;;  %4398 = vmatmul.bf16.vlgmr.msra.gmra.mxu1 %v1070_v48  ;;  %v7439_v42 = vld [vmem:[%s9474_s1 + $0x4d0] sm:$0xff]  ;;  %v7421_v48 = vld [vmem:[%s9474_s1 + $0x440] sm:$0xff] }
  0x63   :  { %4442 = vmatpush.bf16.msrb.mxu1 %v7396_v43  ;;  %4411 = vmatmul.bf16.vlgmr.msra.gmra.mxu2 %v1071_v47  ;;  %v7414_v43 = vld [vmem:[%s9474_s1 + $0x408] sm:$0xff]  ;;  %v7413_v47 = vld [vmem:[%s9474_s1 + $0x400] sm:$0xff] }
  0x64   :  { %4455 = vmatpush.bf16.msrb.mxu2 %v7404_v44  ;;  %4424 = vmatmul.bf16.vlgmr.msra.gmra.mxu3 %v1072_v49  ;;  %v7422_v44 = vld [vmem:[%s9474_s1 + $0x448] sm:$0xff]  ;;  %v7429_v49 = vld [vmem:[%s9474_s1 + $0x480] sm:$0xff] }
  0x65   :  { %4468 = vmatpush.bf16.msrb.mxu3 %v7412_v45  ;;  %v7430_v45 = vld [vmem:[%s9474_s1 + $0x488] sm:$0xff] }
  0x66   :  { %4430 = vmatpush.bf16.msrb.mxu0 %v7387_v50  ;;  %v7437_v50 = vld [vmem:[%s9474_s1 + $0x4c0] sm:$0xff] }
  0x67   :  { %4443 = vmatpush.bf16.msrb.mxu1 %v7395_v51  ;;  %v7452_v51 = vld [vmem:[%s9474_s1 + $0x538] sm:$0xff] }
  0x68   :  { %4456 = vmatpush.bf16.msrb.mxu2 %v7403_v52  ;;  %v7460_v52 = vld [vmem:[%s9474_s1 + $0x578] sm:$0xff] }
  0x69   :  { %4469 = vmatpush.bf16.msrb.mxu3 %v7411_v53  ;;  %v7468_v53 = vld [vmem:[%s9474_s1 + $0x5b8] sm:$0xff] }
  0x6a   :  { %4431 = vmatpush.bf16.msrb.mxu0 %v7386_v54  ;;  %v7476_v54 = vld [vmem:[%s9474_s1 + $0x5f8] sm:$0xff] }
  0x6b   :  { %4444 = vmatpush.bf16.msrb.mxu1 %v7394_v55  ;;  %v1079_v55 = vld [vmem:[#allocation1] sm:$0xff] }
  0x6c   :  { %4457 = vmatpush.bf16.msrb.mxu2 %v7402_v56  ;;  %v1081_v56 = vld [vmem:[#allocation1 + $0x12] sm:$0xff] }
  0x6d   :  { %4470 = vmatpush.bf16.msrb.mxu3 %v7410_v57  ;;  %v1080_v57 = vld [vmem:[#allocation1 + $0x9] sm:$0xff] }
  0x6e   :  { %4432 = vmatpush.bf16.msrb.mxu0 %v7385_v58  ;;  %v1082_v58 = vld [vmem:[#allocation1 + $0x1b] sm:$0xff] }
  0x6f   :  { %4445 = vmatpush.bf16.msrb.mxu1 %v7393_v59  ;;  %v7451_v59 = vld [vmem:[%s9474_s1 + $0x530] sm:$0xff] }
  0x70   :  { %4458 = vmatpush.bf16.msrb.mxu2 %v7401_v60  ;;  %v7459_v60 = vld [vmem:[%s9474_s1 + $0x570] sm:$0xff] }
  0x71   :  { %4471 = vmatpush.bf16.msrb.mxu3 %v7409_v61  ;;  %v7467_v61 = vld [vmem:[%s9474_s1 + $0x5b0] sm:$0xff] }
  0x72   :  { %4433 = vmatpush.bf16.msrb.mxu0 %v7384_v62  ;;  %v7475_v62 = vld [vmem:[%s9474_s1 + $0x5f0] sm:$0xff] }
  0x73   :  { %4446 = vmatpush.bf16.msrb.mxu1 %v7392_v63  ;;  %v7450_v63 = vld [vmem:[%s9474_s1 + $0x528] sm:$0xff] }
  0x74   :  { %4459 = vmatpush.bf16.msrb.mxu2 %v7400_v0  ;;  %v7458_v0 = vld [vmem:[%s9474_s1 + $0x568] sm:$0xff] }
  0x75   :  { %4472 = vmatpush.bf16.msrb.mxu3 %v7408_v1  ;;  %v7806_v1 = vld [vmem:[%s9475_s2] ss:$0 sm:$0xff] }
  0x76   :  { %4434 = vmatpush.bf16.msrb.mxu0 %v7383_v2  ;;  %v7466_v2 = vld [vmem:[%s9474_s1 + $0x5a8] sm:$0xff] }
  0x77   :  { %4447 = vmatpush.bf16.msrb.mxu1 %v7391_v3  ;;  %v7474_v3 = vld [vmem:[%s9474_s1 + $0x5e8] sm:$0xff] }
  0x78   :  { %4460 = vmatpush.bf16.msrb.mxu2 %v7399_v4 }
  0x79   :  { %4473 = vmatpush.bf16.msrb.mxu3 %v7407_v5  ;;  %v7449_v5 = vld [vmem:[%s9474_s1 + $0x520] sm:$0xff] }
  0x7a   :  { %4435 = vmatpush.bf16.msrb.mxu0 %v7382_v6  ;;  %v7457_v6 = vld [vmem:[%s9474_s1 + $0x560] sm:$0xff] }
  0x7b   :  { %4448 = vmatpush.bf16.msrb.mxu1 %v7390_v7 }
  0x7c   :  { %4461 = vmatpush.bf16.msrb.mxu2 %v7398_v8 }
  0x7d   :  { %4474 = vmatpush.bf16.msrb.mxu3 %v7406_v9  ;;  %v7465_v9 = vld [vmem:[%s9474_s1 + $0x5a0] sm:$0xff] }
  0x7e   :  { %4436 = vmatpush.bf16.msrb.mxu0 %v7381_v15  ;;  %v7472_v15 = vld [vmem:[%s9474_s1 + $0x5d8] sm:$0xff] }
  0x7f   :  { %4449 = vmatpush.bf16.msrb.mxu1 %v7389_v16 }
  0x80   :  { %4462 = vmatpush.bf16.msrb.mxu2 %v7397_v17 }
  0x81   :  { %4475 = vmatpush.bf16.msrb.mxu3 %v7405_v18  ;;  %4437 = vmatmul.bf16.vlgmr.msrb.gmra.mxu0 %v1073_v10  ;;  %v7473_v10 = vld [vmem:[%s9474_s1 + $0x5e0] sm:$0xff] }
  0x82   :  { %4481 = vmatpush.bf16.msra.mxu0 %v7420_v19  ;;  %4450 = vmatmul.bf16.vlgmr.msrb.gmra.mxu1 %v1074_v12  ;;  %v7448_v12 = vld [vmem:[%s9474_s1 + $0x518] sm:$0xff] }
  0x83   :  { %4494 = vmatpush.bf16.msra.mxu1 %v7428_v20  ;;  %4463 = vmatmul.bf16.vlgmr.msrb.gmra.mxu2 %v1075_v11  ;;  %v7447_v20 = vld [vmem:[%s9474_s1 + $0x510] sm:$0xff] }
  0x84   :  { %4507 = vmatpush.bf16.msra.mxu2 %v7436_v21  ;;  %4476 = vmatmul.bf16.vlgmr.msrb.gmra.mxu3 %v1076_v13  ;;  %v7456_v13 = vld [vmem:[%s9474_s1 + $0x558] sm:$0xff]  ;;  %v7455_v21 = vld [vmem:[%s9474_s1 + $0x550] sm:$0xff] }
  0x85   :  { %4520 = vmatpush.bf16.msra.mxu3 %v7444_v22 }
  0x86   :  { %4482 = vmatpush.bf16.msra.mxu0 %v7419_v23 }
  0x87   :  { %4495 = vmatpush.bf16.msra.mxu1 %v7427_v24  ;;  %v7463_v24 = vld [vmem:[%s9474_s1 + $0x590] sm:$0xff] }
  0x88   :  { %4508 = vmatpush.bf16.msra.mxu2 %v7435_v25  ;;  %v7471_v25 = vld [vmem:[%s9474_s1 + $0x5d0] sm:$0xff] }
  0x89   :  { %4521 = vmatpush.bf16.msra.mxu3 %v7443_v26  ;;  %v7446_v26 = vld [vmem:[%s9474_s1 + $0x508] sm:$0xff] }
  0x8a   :  { %4483 = vmatpush.bf16.msra.mxu0 %v7418_v27  ;;  %v7454_v27 = vld [vmem:[%s9474_s1 + $0x548] sm:$0xff] }
  0x8b   :  { %4496 = vmatpush.bf16.msra.mxu1 %v7426_v28  ;;  %v7462_v28 = vld [vmem:[%s9474_s1 + $0x588] sm:$0xff] }
  0x8c   :  { %4509 = vmatpush.bf16.msra.mxu2 %v7434_v29  ;;  %v7470_v29 = vld [vmem:[%s9474_s1 + $0x5c8] sm:$0xff] }
  0x8d   :  { %4522 = vmatpush.bf16.msra.mxu3 %v7442_v30  ;;  %v1083_v30 = vld [vmem:[#allocation1 + $0x24] sm:$0xff] }
  0x8e   :  { %4484 = vmatpush.bf16.msra.mxu0 %v7417_v31  ;;  %v1085_v31 = vld [vmem:[#allocation1 + $0x36] sm:$0xff] }
  0x8f   :  { %4497 = vmatpush.bf16.msra.mxu1 %v7425_v32 }
  0x90   :  { %4510 = vmatpush.bf16.msra.mxu2 %v7433_v33  ;;  %v1084_v33 = vld [vmem:[#allocation1 + $0x2d] sm:$0xff] }
  0x91   :  { %4523 = vmatpush.bf16.msra.mxu3 %v7441_v34  ;;  %v1086_v34 = vld [vmem:[#allocation1 + $0x3f] sm:$0xff] }
  0x92   :  { %4485 = vmatpush.bf16.msra.mxu0 %v7416_v35 }
  0x93   :  { %4498 = vmatpush.bf16.msra.mxu1 %v7424_v36  ;;  %v24_v36 = vld [vmem:[%s9473_s0 + $0x18] sm:$0xff] }
  0x94   :  { %4511 = vmatpush.bf16.msra.mxu2 %v7432_v37  ;;  %1088 = vst [vmem:[#allocation1] ss:$9 sm:$0xff] %v24_v36  ;;  %v7445_v37 = vld [vmem:[%s9474_s1 + $0x500] sm:$0xff]  ;;  %v7538_v36 = vld [vmem:[%s9474_s1 + $0x7e8] sm:$0xff] }
  0x95   :  { %4524 = vmatpush.bf16.msra.mxu3 %v7440_v38  ;;  %v7453_v38 = vld [vmem:[%s9474_s1 + $0x540] sm:$0xff] }
  0x96   :  { %4486 = vmatpush.bf16.msra.mxu0 %v7415_v39  ;;  %v7461_v39 = vld [vmem:[%s9474_s1 + $0x580] sm:$0xff] }
  0x97   :  { %4499 = vmatpush.bf16.msra.mxu1 %v7423_v40  ;;  %v7469_v40 = vld [vmem:[%s9474_s1 + $0x5c0] sm:$0xff] }
  0x98   :  { %4512 = vmatpush.bf16.msra.mxu2 %v7431_v41  ;;  %v7484_v41 = vld [vmem:[%s9474_s1 + $0x638] sm:$0xff] }
  0x99   :  { %4525 = vmatpush.bf16.msra.mxu3 %v7439_v42  ;;  %v7492_v42 = vld [vmem:[%s9474_s1 + $0x678] sm:$0xff] }
  0x9a   :  { %4487 = vmatpush.bf16.msra.mxu0 %v7414_v43  ;;  %v7500_v43 = vld [vmem:[%s9474_s1 + $0x6b8] sm:$0xff] }
  0x9b   :  { %4500 = vmatpush.bf16.msra.mxu1 %v7422_v44  ;;  %v7508_v44 = vld [vmem:[%s9474_s1 + $0x6f8] sm:$0xff] }
  0x9c   :  { %4513 = vmatpush.bf16.msra.mxu2 %v7430_v45  ;;  %v7483_v45 = vld [vmem:[%s9474_s1 + $0x630] sm:$0xff] }
  0x9d   :  { %4526 = vmatpush.bf16.msra.mxu3 %v7438_v46  ;;  %v7491_v46 = vld [vmem:[%s9474_s1 + $0x670] sm:$0xff] }
  0x9e   :  { %4488 = vmatpush.bf16.msra.mxu0 %v7413_v47  ;;  %v4282_v4 = vpop.f32.mrf.mxu0  ;;  %v7499_v47 = vld [vmem:[%s9474_s1 + $0x6b0] sm:$0xff] }
  0x9f   :  { %4501 = vmatpush.bf16.msra.mxu1 %v7421_v48  ;;  %v4283_v7 = vadd.f32 %v7806_v1, %v4282_v4  ;;  %v4295_v8 = vpop.f32.mrf.mxu1  ;;  %v7507_v48 = vld [vmem:[%s9474_s1 + $0x6f0] sm:$0xff] }
  0xa0   :  { %4514 = vmatpush.bf16.msra.mxu2 %v7429_v49  ;;  %v7482_v49 = vld [vmem:[%s9474_s1 + $0x628] sm:$0xff] }
  0xa1   :  { %4527 = vmatpush.bf16.msra.mxu3 %v7437_v50  ;;  %4489 = vmatmul.bf16.vlgmr.msra.gmra.mxu0 %v1079_v55  ;;  %v4296_v11 = vadd.f32 %v4295_v8, %v4283_v7  ;;  %v7490_v50 = vld [vmem:[%s9474_s1 + $0x668] sm:$0xff]  ;;  %v7489_v55 = vld [vmem:[%s9474_s1 + $0x660] sm:$0xff] }
  0xa2   :  { %4533 = vmatpush.bf16.msrb.mxu0 %v7452_v51  ;;  %4502 = vmatmul.bf16.vlgmr.msra.gmra.mxu1 %v1080_v57  ;;  %v7498_v51 = vld [vmem:[%s9474_s1 + $0x6a8] sm:$0xff] }
  0xa3   :  { %4546 = vmatpush.bf16.msrb.mxu1 %v7460_v52  ;;  %4515 = vmatmul.bf16.vlgmr.msra.gmra.mxu2 %v1081_v56  ;;  %v7506_v52 = vld [vmem:[%s9474_s1 + $0x6e8] sm:$0xff] }
  0xa4   :  { %4559 = vmatpush.bf16.msrb.mxu2 %v7468_v53  ;;  %4528 = vmatmul.bf16.vlgmr.msra.gmra.mxu3 %v1082_v58  ;;  %v7497_v58 = vld [vmem:[%s9474_s1 + $0x6a0] sm:$0xff] }
  0xa5   :  { %4572 = vmatpush.bf16.msrb.mxu3 %v7476_v54  ;;  %v7481_v54 = vld [vmem:[%s9474_s1 + $0x620] sm:$0xff] }
  0xa6   :  { %4534 = vmatpush.bf16.msrb.mxu0 %v7451_v59  ;;  %v4308_v16 = vpop.f32.mrf.mxu2  ;;  %v4284_v19 = vpop.f32.mrf.mxu0  ;;  %v7505_v59 = vld [vmem:[%s9474_s1 + $0x6e0] sm:$0xff] }
  0xa7   :  { %4547 = vmatpush.bf16.msrb.mxu1 %v7459_v60  ;;  %v4309_v17 = vadd.f32 %v4308_v16, %v4296_v11  ;;  %v4321_v18 = vpop.f32.mrf.mxu3  ;;  %v4297_v23 = vpop.f32.mrf.mxu1  ;;  %v7478_v11 = vld [vmem:[%s9474_s1 + $0x608] sm:$0xff]  ;;  %v7493_v19 = vld [vmem:[%s9474_s1 + $0x680] sm:$0xff] }
  0xa8   :  { %4560 = vmatpush.bf16.msrb.mxu2 %v7467_v61  ;;  %v7480_v61 = vld [vmem:[%s9474_s1 + $0x618] sm:$0xff] }
  0xa9   :  { %4573 = vmatpush.bf16.msrb.mxu3 %v7475_v62  ;;  %v8423_v22 = vadd.f32 %v4321_v18, %v4309_v17  ;;  %v7488_v62 = vld [vmem:[%s9474_s1 + $0x658] sm:$0xff]  ;;  %v7477_v17 = vld [vmem:[%s9474_s1 + $0x600] sm:$0xff] }
  0xaa   :  { %4535 = vmatpush.bf16.msrb.mxu0 %v7450_v63  ;;  %v7496_v63 = vld [vmem:[%s9474_s1 + $0x698] sm:$0xff]  ;;  %v7485_v18 = vld [vmem:[%s9474_s1 + $0x640] sm:$0xff] }
  0xab   :  { %4548 = vmatpush.bf16.msrb.mxu1 %v7458_v0  ;;  %v7504_v0 = vld [vmem:[%s9474_s1 + $0x6d8] sm:$0xff] }
  0xac   :  { %4561 = vmatpush.bf16.msrb.mxu2 %v7466_v2  ;;  %v7532_v23 = vld [vmem:[%s9474_s1 + $0x7b8] sm:$0xff] }
  0xad   :  { %4574 = vmatpush.bf16.msrb.mxu3 %v7474_v3 }
  0xae   :  { %4536 = vmatpush.bf16.msrb.mxu0 %v7449_v5  ;;  %v4310_v32 = vpop.f32.mrf.mxu2  ;;  %v7479_v5 = vld [vmem:[%s9474_s1 + $0x610] sm:$0xff] }
  0xaf   :  { %4549 = vmatpush.bf16.msrb.mxu1 %v7457_v6  ;;  %v4323_v35 = vpop.f32.mrf.mxu3  ;;  %v7487_v6 = vld [vmem:[%s9474_s1 + $0x650] sm:$0xff] }
  0xb0   :  { %4562 = vmatpush.bf16.msrb.mxu2 %v7465_v9  ;;  %v7495_v9 = vld [vmem:[%s9474_s1 + $0x690] sm:$0xff]  ;;  %v7530_v35 = vld [vmem:[%s9474_s1 + $0x7a8] sm:$0xff] }
  0xb1   :  { %4575 = vmatpush.bf16.msrb.mxu3 %v7473_v10  ;;  %v7503_v10 = vld [vmem:[%s9474_s1 + $0x6d0] sm:$0xff] }
  0xb2   :  { %4537 = vmatpush.bf16.msrb.mxu0 %v7448_v12  ;;  %v7486_v12 = vld [vmem:[%s9474_s1 + $0x648] sm:$0xff]  ;;  %v7539_v32 = vld [vmem:[%s9474_s1 + $0x7f0] sm:$0xff] }
  0xb3   :  { %4550 = vmatpush.bf16.msrb.mxu1 %v7456_v13  ;;  %v7494_v13 = vld [vmem:[%s9474_s1 + $0x688] sm:$0xff] }
  0xb4   :  { %4563 = vmatpush.bf16.msrb.mxu2 %v7464_v14  ;;  %v7502_v14 = vld [vmem:[%s9474_s1 + $0x6c8] sm:$0xff] }
  0xb5   :  { %4576 = vmatpush.bf16.msrb.mxu3 %v7472_v15 }
  0xb6   :  { %4538 = vmatpush.bf16.msrb.mxu0 %v7447_v20  ;;  %v7501_v20 = vld [vmem:[%s9474_s1 + $0x6c0] sm:$0xff] }
  0xb7   :  { %4551 = vmatpush.bf16.msrb.mxu1 %v7455_v21  ;;  %v7516_v21 = vld [vmem:[%s9474_s1 + $0x738] sm:$0xff] }
  0xb8   :  { %4564 = vmatpush.bf16.msrb.mxu2 %v7463_v24  ;;  %v7540_v24 = vld [vmem:[%s9474_s1 + $0x7f8] sm:$0xff] }
  0xb9   :  { %4577 = vmatpush.bf16.msrb.mxu3 %v7471_v25  ;;  %v1089_v25 = vld [vmem:[#allocation1] sm:$0xff] }
  0xba   :  { %4539 = vmatpush.bf16.msrb.mxu0 %v7446_v26  ;;  %v1091_v26 = vld [vmem:[#allocation1 + $0x12] sm:$0xff] }
  0xbb   :  { %4552 = vmatpush.bf16.msrb.mxu1 %v7454_v27  ;;  %v1090_v27 = vld [vmem:[#allocation1 + $0x9] sm:$0xff] }
  0xbc   :  { %4565 = vmatpush.bf16.msrb.mxu2 %v7462_v28  ;;  %v1092_v28 = vld [vmem:[#allocation1 + $0x1b] sm:$0xff] }
  0xbd   :  { %4578 = vmatpush.bf16.msrb.mxu3 %v7470_v29  ;;  %v7515_v29 = vld [vmem:[%s9474_s1 + $0x730] sm:$0xff] }
  0xbe   :  { %4540 = vmatpush.bf16.msrb.mxu0 %v7445_v37  ;;  %v4334_v53 = vpop.f32.mrf.mxu0 }
  0xbf   :  { %4553 = vmatpush.bf16.msrb.mxu1 %v7453_v38  ;;  %v4335_v56 = vadd.f32 %v4334_v53, %v8423_v22  ;;  %v4347_v57 = vpop.f32.mrf.mxu1  ;;  %v7524_v22 = vld [vmem:[%s9474_s1 + $0x778] sm:$0xff] }
  0xc0   :  { %4566 = vmatpush.bf16.msrb.mxu2 %v7461_v39  ;;  %v7513_v39 = vld [vmem:[%s9474_s1 + $0x720] sm:$0xff] }
  0xc1   :  { %4579 = vmatpush.bf16.msrb.mxu3 %v7469_v40  ;;  %4541 = vmatmul.bf16.vlgmr.msrb.gmra.mxu0 %v1083_v30  ;;  %v4348_v60 = vadd.f32 %v4347_v57, %v4335_v56  ;;  %v7523_v30 = vld [vmem:[%s9474_s1 + $0x770] sm:$0xff]  ;;  %v7521_v40 = vld [vmem:[%s9474_s1 + $0x760] sm:$0xff] }
  0xc2   :  { %4585 = vmatpush.bf16.msra.mxu0 %v7484_v41  ;;  %4554 = vmatmul.bf16.vlgmr.msrb.gmra.mxu1 %v1084_v33  ;;  %v7514_v33 = vld [vmem:[%s9474_s1 + $0x728] sm:$0xff]  ;;  %v7527_v57 = vld [vmem:[%s9474_s1 + $0x790] sm:$0xff] }
  0xc3   :  { %4598 = vmatpush.bf16.msra.mxu1 %v7492_v42  ;;  %4567 = vmatmul.bf16.vlgmr.msrb.gmra.mxu2 %v1085_v31  ;;  %v7531_v31 = vld [vmem:[%s9474_s1 + $0x7b0] sm:$0xff]  ;;  %v7529_v42 = vld [vmem:[%s9474_s1 + $0x7a0] sm:$0xff] }
  0xc4   :  { %4611 = vmatpush.bf16.msra.mxu2 %v7500_v43  ;;  %4580 = vmatmul.bf16.vlgmr.msrb.gmra.mxu3 %v1086_v34  ;;  %v7522_v34 = vld [vmem:[%s9474_s1 + $0x768] sm:$0xff]  ;;  %v7537_v43 = vld [vmem:[%s9474_s1 + $0x7e0] sm:$0xff] }
  0xc5   :  { %4624 = vmatpush.bf16.msra.mxu3 %v7508_v44 }
  0xc6   :  { %4586 = vmatpush.bf16.msra.mxu0 %v7483_v45  ;;  %v4360_v1 = vpop.f32.mrf.mxu2  ;;  %v4336_v4 = vpop.f32.mrf.mxu0  ;;  %v7512_v45 = vld [vmem:[%s9474_s1 + $0x718] sm:$0xff] }
  0xc7   :  { %4599 = vmatpush.bf16.msra.mxu1 %v7491_v46  ;;  %v4361_v2 = vadd.f32 %v4360_v1, %v4348_v60  ;;  %v4373_v3 = vpop.f32.mrf.mxu3  ;;  %v4349_v8 = vpop.f32.mrf.mxu1  ;;  %v7520_v46 = vld [vmem:[%s9474_s1 + $0x758] sm:$0xff]  ;;  %v7518_v60 = vld [vmem:[%s9474_s1 + $0x748] sm:$0xff] }
  0xc8   :  { %4612 = vmatpush.bf16.msra.mxu2 %v7499_v47  ;;  %v7528_v47 = vld [vmem:[%s9474_s1 + $0x798] sm:$0xff]  ;;  %v7525_v8 = vld [vmem:[%s9474_s1 + $0x780] sm:$0xff] }
  0xc9   :  { %4625 = vmatpush.bf16.msra.mxu3 %v7507_v48  ;;  %v4374_v7 = vadd.f32 %v4373_v3, %v4361_v2  ;;  %v7536_v48 = vld [vmem:[%s9474_s1 + $0x7d8] sm:$0xff]  ;;  %v1094_v2 = vld [vmem:[#allocation1 + $0x2d] sm:$0xff] }
  0xca   :  { %4587 = vmatpush.bf16.msra.mxu0 %v7482_v49  ;;  %v1096_v3 = vld [vmem:[#allocation1 + $0x3f] sm:$0xff] }
  0xcb   :  { %4600 = vmatpush.bf16.msra.mxu1 %v7490_v50 }
  0xcc   :  { %4613 = vmatpush.bf16.msra.mxu2 %v7498_v51 }
  0xcd   :  { %4626 = vmatpush.bf16.msra.mxu3 %v7506_v52 }
  0xce   :  { %4588 = vmatpush.bf16.msra.mxu0 %v7481_v54  ;;  %v4362_v15 = vpop.f32.mrf.mxu2  ;;  %v7511_v54 = vld [vmem:[%s9474_s1 + $0x710] sm:$0xff] }
  0xcf   :  { %4601 = vmatpush.bf16.msra.mxu1 %v7489_v55  ;;  %v4375_v16 = vpop.f32.mrf.mxu3  ;;  %v7519_v55 = vld [vmem:[%s9474_s1 + $0x750] sm:$0xff] }
  0xd0   :  { %4614 = vmatpush.bf16.msra.mxu2 %v7497_v58  ;;  %v7535_v58 = vld [vmem:[%s9474_s1 + $0x7d0] sm:$0xff] }
  0xd1   :  { %4627 = vmatpush.bf16.msra.mxu3 %v7505_v59  ;;  %v7510_v59 = vld [vmem:[%s9474_s1 + $0x708] sm:$0xff]  ;;  %v7555_v15 = vld [vmem:[%s9474_s1 + $0x870] sm:$0xff] }
  0xd2   :  { %4589 = vmatpush.bf16.msra.mxu0 %v7480_v61  ;;  %v7526_v61 = vld [vmem:[%s9474_s1 + $0x788] sm:$0xff]  ;;  %v7563_v16 = vld [vmem:[%s9474_s1 + $0x8b0] sm:$0xff] }
  0xd3   :  { %4602 = vmatpush.bf16.msra.mxu1 %v7488_v62  ;;  %v7534_v62 = vld [vmem:[%s9474_s1 + $0x7c8] sm:$0xff] }
  0xd4   :  { %4615 = vmatpush.bf16.msra.mxu2 %v7496_v63  ;;  %v1093_v63 = vld [vmem:[#allocation1 + $0x24] sm:$0xff] }
  0xd5   :  { %4628 = vmatpush.bf16.msra.mxu3 %v7504_v0  ;;  %v1095_v0 = vld [vmem:[#allocation1 + $0x36] sm:$0xff] }
  0xd6   :  { %4590 = vmatpush.bf16.msra.mxu0 %v7479_v5  ;;  %v25_v5 = vld [vmem:[%s9473_s0 + $0x20] sm:$0xff] }
  0xd7   :  { %4603 = vmatpush.bf16.msra.mxu1 %v7487_v6  ;;  %1098 = vst [vmem:[#allocation1] ss:$9 sm:$0xff] %v25_v5  ;;  %v7509_v6 = vld [vmem:[%s9474_s1 + $0x700] sm:$0xff]  ;;  %v7602_v5 = vld [vmem:[%s9474_s1 + $0x9e8] sm:$0xff] }
  0xd8   :  { %4616 = vmatpush.bf16.msra.mxu2 %v7495_v9  ;;  %v7533_v9 = vld [vmem:[%s9474_s1 + $0x7c0] sm:$0xff] }
  0xd9   :  { %4629 = vmatpush.bf16.msra.mxu3 %v7503_v10  ;;  %v7548_v10 = vld [vmem:[%s9474_s1 + $0x838] sm:$0xff] }
  0xda   :  { %4591 = vmatpush.bf16.msra.mxu0 %v7478_v11  ;;  %v7556_v11 = vld [vmem:[%s9474_s1 + $0x878] sm:$0xff] }
  0xdb   :  { %4604 = vmatpush.bf16.msra.mxu1 %v7486_v12  ;;  %v7564_v12 = vld [vmem:[%s9474_s1 + $0x8b8] sm:$0xff] }
  0xdc   :  { %4617 = vmatpush.bf16.msra.mxu2 %v7494_v13  ;;  %v7572_v13 = vld [vmem:[%s9474_s1 + $0x8f8] sm:$0xff] }
  0xdd   :  { %4630 = vmatpush.bf16.msra.mxu3 %v7502_v14  ;;  %v7547_v14 = vld [vmem:[%s9474_s1 + $0x830] sm:$0xff] }
  0xde   :  { %4592 = vmatpush.bf16.msra.mxu0 %v7477_v17  ;;  %v4386_v37 = vpop.f32.mrf.mxu0  ;;  %v7571_v17 = vld [vmem:[%s9474_s1 + $0x8f0] sm:$0xff] }
  0xdf   :  { %4605 = vmatpush.bf16.msra.mxu1 %v7485_v18  ;;  %v4387_v38 = vadd.f32 %v4386_v37, %v4374_v7  ;;  %v4399_v41 = vpop.f32.mrf.mxu1  ;;  %v7517_v7 = vld [vmem:[%s9474_s1 + $0x740] sm:$0xff]  ;;  %v7546_v18 = vld [vmem:[%s9474_s1 + $0x828] sm:$0xff] }
  0xe0   :  { %4618 = vmatpush.bf16.msra.mxu2 %v7493_v19  ;;  %v7554_v19 = vld [vmem:[%s9474_s1 + $0x868] sm:$0xff] }
  0xe1   :  { %4631 = vmatpush.bf16.msra.mxu3 %v7501_v20  ;;  %4593 = vmatmul.bf16.vlgmr.msra.gmra.mxu0 %v1089_v25  ;;  %v4400_v44 = vadd.f32 %v4399_v41, %v4387_v38  ;;  %v7562_v20 = vld [vmem:[%s9474_s1 + $0x8a8] sm:$0xff]  ;;  %v7553_v25 = vld [vmem:[%s9474_s1 + $0x860] sm:$0xff] }
  0xe2   :  { %4637 = vmatpush.bf16.msrb.mxu0 %v7516_v21  ;;  %4606 = vmatmul.bf16.vlgmr.msra.gmra.mxu1 %v1090_v27  ;;  %v7570_v21 = vld [vmem:[%s9474_s1 + $0x8e8] sm:$0xff]  ;;  %v7561_v27 = vld [vmem:[%s9474_s1 + $0x8a0] sm:$0xff] }
  0xe3   :  { %4650 = vmatpush.bf16.msrb.mxu1 %v7524_v22  ;;  %4619 = vmatmul.bf16.vlgmr.msra.gmra.mxu2 %v1091_v26 }
  0xe4   :  { %4663 = vmatpush.bf16.msrb.mxu2 %v7532_v23  ;;  %4632 = vmatmul.bf16.vlgmr.msra.gmra.mxu3 %v1092_v28  ;;  %v7569_v28 = vld [vmem:[%s9474_s1 + $0x8e0] sm:$0xff] }
  0xe5   :  { %4676 = vmatpush.bf16.msrb.mxu3 %v7540_v24  ;;  %v7545_v24 = vld [vmem:[%s9474_s1 + $0x820] sm:$0xff] }
  0xe6   :  { %4638 = vmatpush.bf16.msrb.mxu0 %v7515_v29  ;;  %v4412_v49 = vpop.f32.mrf.mxu2  ;;  %v4388_v52 = vpop.f32.mrf.mxu0 }
  0xe7   :  { %4651 = vmatpush.bf16.msrb.mxu1 %v7523_v30  ;;  %v4413_v50 = vadd.f32 %v4412_v49, %v4400_v44  ;;  %v4425_v51 = vpop.f32.mrf.mxu3  ;;  %v4401_v56 = vpop.f32.mrf.mxu1  ;;  %v7544_v30 = vld [vmem:[%s9474_s1 + $0x818] sm:$0xff]  ;;  %v7542_v44 = vld [vmem:[%s9474_s1 + $0x808] sm:$0xff]  ;;  %v7557_v52 = vld [vmem:[%s9474_s1 + $0x880] sm:$0xff] }
  0xe8   :  { %4664 = vmatpush.bf16.msrb.mxu2 %v7531_v31  ;;  %v7552_v31 = vld [vmem:[%s9474_s1 + $0x858] sm:$0xff] }
  0xe9   :  { %4677 = vmatpush.bf16.msrb.mxu3 %v7539_v32  ;;  %v8615_v53 = vadd.f32 %v4425_v51, %v4413_v50  ;;  %v7560_v32 = vld [vmem:[%s9474_s1 + $0x898] sm:$0xff]  ;;  %v7541_v50 = vld [vmem:[%s9474_s1 + $0x800] sm:$0xff] }
  0xea   :  { %4639 = vmatpush.bf16.msrb.mxu0 %v7514_v33  ;;  %v7568_v33 = vld [vmem:[%s9474_s1 + $0x8d8] sm:$0xff]  ;;  %v7549_v51 = vld [vmem:[%s9474_s1 + $0x840] sm:$0xff] }
  0xeb   :  { %4652 = vmatpush.bf16.msrb.mxu1 %v7522_v34  ;;  %v7596_v56 = vld [vmem:[%s9474_s1 + $0x9b8] sm:$0xff] }
  0xec   :  { %4665 = vmatpush.bf16.msrb.mxu2 %v7530_v35 }
  0xed   :  { %4678 = vmatpush.bf16.msrb.mxu3 %v7538_v36 }
  0xee   :  { %4640 = vmatpush.bf16.msrb.mxu0 %v7513_v39  ;;  %v4414_v1 = vpop.f32.mrf.mxu2  ;;  %v7543_v39 = vld [vmem:[%s9474_s1 + $0x810] sm:$0xff] }
  0xef   :  { %4653 = vmatpush.bf16.msrb.mxu1 %v7521_v40  ;;  %v4427_v4 = vpop.f32.mrf.mxu3  ;;  %v7551_v40 = vld [vmem:[%s9474_s1 + $0x850] sm:$0xff] }
  0xf0   :  { %4666 = vmatpush.bf16.msrb.mxu2 %v7529_v42  ;;  %v7559_v42 = vld [vmem:[%s9474_s1 + $0x890] sm:$0xff]  ;;  %v7594_v4 = vld [vmem:[%s9474_s1 + $0x9a8] sm:$0xff] }
  0xf1   :  { %4679 = vmatpush.bf16.msrb.mxu3 %v7537_v43  ;;  %v7567_v43 = vld [vmem:[%s9474_s1 + $0x8d0] sm:$0xff] }
  0xf2   :  { %4641 = vmatpush.bf16.msrb.mxu0 %v7512_v45  ;;  %v7550_v45 = vld [vmem:[%s9474_s1 + $0x848] sm:$0xff]  ;;  %v7603_v1 = vld [vmem:[%s9474_s1 + $0x9f0] sm:$0xff] }
  0xf3   :  { %4654 = vmatpush.bf16.msrb.mxu1 %v7520_v46  ;;  %v7558_v46 = vld [vmem:[%s9474_s1 + $0x888] sm:$0xff] }
  0xf4   :  { %4667 = vmatpush.bf16.msrb.mxu2 %v7528_v47  ;;  %v7566_v47 = vld [vmem:[%s9474_s1 + $0x8c8] sm:$0xff] }
  0xf5   :  { %4680 = vmatpush.bf16.msrb.mxu3 %v7536_v48 }
  0xf6   :  { %4642 = vmatpush.bf16.msrb.mxu0 %v7511_v54  ;;  %v7580_v54 = vld [vmem:[%s9474_s1 + $0x938] sm:$0xff] }
  0xf7   :  { %4655 = vmatpush.bf16.msrb.mxu1 %v7519_v55  ;;  %v7588_v55 = vld [vmem:[%s9474_s1 + $0x978] sm:$0xff] }
  0xf8   :  { %4668 = vmatpush.bf16.msrb.mxu2 %v7527_v57  ;;  %v7604_v57 = vld [vmem:[%s9474_s1 + $0x9f8] sm:$0xff] }
  0xf9   :  { %4681 = vmatpush.bf16.msrb.mxu3 %v7535_v58  ;;  %v1099_v58 = vld [vmem:[#allocation1] sm:$0xff] }
  0xfa   :  { %4643 = vmatpush.bf16.msrb.mxu0 %v7510_v59  ;;  %v1101_v59 = vld [vmem:[#allocation1 + $0x12] sm:$0xff] }
  0xfb   :  { %4656 = vmatpush.bf16.msrb.mxu1 %v7518_v60  ;;  %v1100_v60 = vld [vmem:[#allocation1 + $0x9] sm:$0xff] }
  0xfc   :  { %4669 = vmatpush.bf16.msrb.mxu2 %v7526_v61  ;;  %v1102_v61 = vld [vmem:[#allocation1 + $0x1b] sm:$0xff] }
  0xfd   :  { %4682 = vmatpush.bf16.msrb.mxu3 %v7534_v62  ;;  %v7579_v62 = vld [vmem:[%s9474_s1 + $0x930] sm:$0xff] }
  0xfe   :  { %4644 = vmatpush.bf16.msrb.mxu0 %v7509_v6  ;;  %v4438_v22 = vpop.f32.mrf.mxu0 }
  0xff   :  { %4657 = vmatpush.bf16.msrb.mxu1 %v7517_v7  ;;  %v4439_v23 = vadd.f32 %v4438_v22, %v8615_v53  ;;  %v4451_v26 = vpop.f32.mrf.mxu1  ;;  %v7565_v53 = vld [vmem:[%s9474_s1 + $0x8c0] sm:$0xff] }
 0x100   :  { %4670 = vmatpush.bf16.msrb.mxu2 %v7525_v8  ;;  %v7577_v8 = vld [vmem:[%s9474_s1 + $0x920] sm:$0xff] }
 0x101   :  { %4683 = vmatpush.bf16.msrb.mxu3 %v7533_v9  ;;  %4645 = vmatmul.bf16.vlgmr.msrb.gmra.mxu0 %v1093_v63  ;;  %v4452_v29 = vadd.f32 %v4451_v26, %v4439_v23  ;;  %v7587_v63 = vld [vmem:[%s9474_s1 + $0x970] sm:$0xff]  ;;  %v7585_v9 = vld [vmem:[%s9474_s1 + $0x960] sm:$0xff] }
 0x102   :  { %4689 = vmatpush.bf16.msra.mxu0 %v7548_v10  ;;  %4658 = vmatmul.bf16.vlgmr.msrb.gmra.mxu1 %v1094_v2  ;;  %v7578_v2 = vld [vmem:[%s9474_s1 + $0x928] sm:$0xff]  ;;  %v7575_v23 = vld [vmem:[%s9474_s1 + $0x910] sm:$0xff] }
 0x103   :  { %4702 = vmatpush.bf16.msra.mxu1 %v7556_v11  ;;  %4671 = vmatmul.bf16.vlgmr.msrb.gmra.mxu2 %v1095_v0  ;;  %v7595_v0 = vld [vmem:[%s9474_s1 + $0x9b0] sm:$0xff]  ;;  %v7593_v11 = vld [vmem:[%s9474_s1 + $0x9a0] sm:$0xff] }
 0x104   :  { %4715 = vmatpush.bf16.msra.mxu2 %v7564_v12  ;;  %4684 = vmatmul.bf16.vlgmr.msrb.gmra.mxu3 %v1096_v3  ;;  %v7586_v3 = vld [vmem:[%s9474_s1 + $0x968] sm:$0xff]  ;;  %v7601_v12 = vld [vmem:[%s9474_s1 + $0x9e0] sm:$0xff]  ;;  %v7591_v26 = vld [vmem:[%s9474_s1 + $0x990] sm:$0xff] }
 0x105   :  { %4728 = vmatpush.bf16.msra.mxu3 %v7572_v13 }
 0x106   :  { %4690 = vmatpush.bf16.msra.mxu0 %v7547_v14  ;;  %v4464_v34 = vpop.f32.mrf.mxu2  ;;  %v4440_v37 = vpop.f32.mrf.mxu0  ;;  %v7576_v14 = vld [vmem:[%s9474_s1 + $0x918] sm:$0xff] }
 0x107   :  { %4703 = vmatpush.bf16.msra.mxu1 %v7555_v15  ;;  %v4465_v35 = vadd.f32 %v4464_v34, %v4452_v29  ;;  %v4477_v36 = vpop.f32.mrf.mxu3  ;;  %v4453_v41 = vpop.f32.mrf.mxu1  ;;  %v7584_v15 = vld [vmem:[%s9474_s1 + $0x958] sm:$0xff]  ;;  %v7582_v29 = vld [vmem:[%s9474_s1 + $0x948] sm:$0xff] }
 0x108   :  { %4716 = vmatpush.bf16.msra.mxu2 %v7563_v16  ;;  %v7592_v16 = vld [vmem:[%s9474_s1 + $0x998] sm:$0xff]  ;;  %v7589_v41 = vld [vmem:[%s9474_s1 + $0x980] sm:$0xff] }
 0x109   :  { %4729 = vmatpush.bf16.msra.mxu3 %v7571_v17  ;;  %v4478_v38 = vadd.f32 %v4477_v36, %v4465_v35  ;;  %v7600_v17 = vld [vmem:[%s9474_s1 + $0x9d8] sm:$0xff]  ;;  %v1104_v35 = vld [vmem:[#allocation1 + $0x2d] sm:$0xff] }
 0x10a   :  { %4691 = vmatpush.bf16.msra.mxu0 %v7546_v18  ;;  %v1106_v36 = vld [vmem:[#allocation1 + $0x3f] sm:$0xff] }
 0x10b   :  { %4704 = vmatpush.bf16.msra.mxu1 %v7554_v19 }
 0x10c   :  { %4717 = vmatpush.bf16.msra.mxu2 %v7562_v20 }
 0x10d   :  { %4730 = vmatpush.bf16.msra.mxu3 %v7570_v21 }
 0x10e   :  { %4692 = vmatpush.bf16.msra.mxu0 %v7545_v24  ;;  %v4466_v48 = vpop.f32.mrf.mxu2  ;;  %v7583_v24 = vld [vmem:[%s9474_s1 + $0x950] sm:$0xff] }
 0x10f   :  { %4705 = vmatpush.bf16.msra.mxu1 %v7553_v25  ;;  %v4479_v49 = vpop.f32.mrf.mxu3  ;;  %v7619_v48 = vld [vmem:[%s9474_s1 + $0xa70] sm:$0xff] }
 0x110   :  { %4718 = vmatpush.bf16.msra.mxu2 %v7561_v27  ;;  %v7599_v27 = vld [vmem:[%s9474_s1 + $0x9d0] sm:$0xff] }
 0x111   :  { %4731 = vmatpush.bf16.msra.mxu3 %v7569_v28  ;;  %v7574_v28 = vld [vmem:[%s9474_s1 + $0x908] sm:$0xff]  ;;  %v7627_v49 = vld [vmem:[%s9474_s1 + $0xab0] sm:$0xff] }
 0x112   :  { %4693 = vmatpush.bf16.msra.mxu0 %v7544_v30  ;;  %v7590_v30 = vld [vmem:[%s9474_s1 + $0x988] sm:$0xff] }
 0x113   :  { %4706 = vmatpush.bf16.msra.mxu1 %v7552_v31  ;;  %v7598_v31 = vld [vmem:[%s9474_s1 + $0x9c8] sm:$0xff] }
 0x114   :  { %4719 = vmatpush.bf16.msra.mxu2 %v7560_v32  ;;  %v1103_v32 = vld [vmem:[#allocation1 + $0x24] sm:$0xff] }
 0x115   :  { %4732 = vmatpush.bf16.msra.mxu3 %v7568_v33  ;;  %v1105_v33 = vld [vmem:[#allocation1 + $0x36] sm:$0xff] }
 0x116   :  { %4694 = vmatpush.bf16.msra.mxu0 %v7543_v39  ;;  %v7573_v39 = vld [vmem:[%s9474_s1 + $0x900] sm:$0xff] }
 0x117   :  { %4707 = vmatpush.bf16.msra.mxu1 %v7551_v40  ;;  %v7581_v40 = vld [vmem:[%s9474_s1 + $0x940] sm:$0xff] }
 0x118   :  { %4720 = vmatpush.bf16.msra.mxu2 %v7559_v42  ;;  %v7597_v42 = vld [vmem:[%s9474_s1 + $0x9c0] sm:$0xff] }
 0x119   :  { %4733 = vmatpush.bf16.msra.mxu3 %v7567_v43  ;;  %v7612_v43 = vld [vmem:[%s9474_s1 + $0xa38] sm:$0xff] }
 0x11a   :  { %4695 = vmatpush.bf16.msra.mxu0 %v7542_v44  ;;  %v7620_v44 = vld [vmem:[%s9474_s1 + $0xa78] sm:$0xff] }
 0x11b   :  { %4708 = vmatpush.bf16.msra.mxu1 %v7550_v45  ;;  %v7628_v45 = vld [vmem:[%s9474_s1 + $0xab8] sm:$0xff] }
 0x11c   :  { %4721 = vmatpush.bf16.msra.mxu2 %v7558_v46  ;;  %v7636_v46 = vld [vmem:[%s9474_s1 + $0xaf8] sm:$0xff] }
 0x11d   :  { %4734 = vmatpush.bf16.msra.mxu3 %v7566_v47  ;;  %v7611_v47 = vld [vmem:[%s9474_s1 + $0xa30] sm:$0xff] }
 0x11e   :  { %4696 = vmatpush.bf16.msra.mxu0 %v7541_v50  ;;  %v4490_v6 = vpop.f32.mrf.mxu0  ;;  %v7635_v50 = vld [vmem:[%s9474_s1 + $0xaf0] sm:$0xff] }
 0x11f   :  { %4709 = vmatpush.bf16.msra.mxu1 %v7549_v51  ;;  %v4491_v7 = vadd.f32 %v4490_v6, %v4478_v38  ;;  %v4503_v10 = vpop.f32.mrf.mxu1  ;;  %v26_v38 = vld [vmem:[%s9473_s0 + $0x28] sm:$0xff] }
 0x120   :  { %4722 = vmatpush.bf16.msra.mxu2 %v7557_v52  ;;  %1108 = vst [vmem:[#allocation1] ss:$9 sm:$0xff] %v26_v38  ;;  %v7610_v51 = vld [vmem:[%s9474_s1 + $0xa28] sm:$0xff] }
 0x121   :  { %4735 = vmatpush.bf16.msra.mxu3 %v7565_v53  ;;  %4697 = vmatmul.bf16.vlgmr.msra.gmra.mxu0 %v1099_v58  ;;  %v4504_v13 = vadd.f32 %v4503_v10, %v4491_v7  ;;  %v7618_v52 = vld [vmem:[%s9474_s1 + $0xa68] sm:$0xff]  ;;  %v7617_v58 = vld [vmem:[%s9474_s1 + $0xa60] sm:$0xff] }
 0x122   :  { %4741 = vmatpush.bf16.msrb.mxu0 %v7580_v54  ;;  %4710 = vmatmul.bf16.vlgmr.msra.gmra.mxu1 %v1100_v60  ;;  %v7626_v53 = vld [vmem:[%s9474_s1 + $0xaa8] sm:$0xff]  ;;  %v7625_v60 = vld [vmem:[%s9474_s1 + $0xaa0] sm:$0xff] }
 0x123   :  { %4754 = vmatpush.bf16.msrb.mxu1 %v7588_v55  ;;  %4723 = vmatmul.bf16.vlgmr.msra.gmra.mxu2 %v1101_v59  ;;  %v7634_v54 = vld [vmem:[%s9474_s1 + $0xae8] sm:$0xff] }
 0x124   :  { %4767 = vmatpush.bf16.msrb.mxu2 %v7596_v56  ;;  %4736 = vmatmul.bf16.vlgmr.msra.gmra.mxu3 %v1102_v61  ;;  %v7633_v61 = vld [vmem:[%s9474_s1 + $0xae0] sm:$0xff]  ;;  %v7666_v38 = vld [vmem:[%s9474_s1 + $0xbe8] sm:$0xff] }
 0x125   :  { %4780 = vmatpush.bf16.msrb.mxu3 %v7604_v57  ;;  %v7609_v57 = vld [vmem:[%s9474_s1 + $0xa20] sm:$0xff] }
 0x126   :  { %4742 = vmatpush.bf16.msrb.mxu0 %v7579_v62  ;;  %v4516_v18 = vpop.f32.mrf.mxu2  ;;  %v4492_v21 = vpop.f32.mrf.mxu0 }
 0x127   :  { %4755 = vmatpush.bf16.msrb.mxu1 %v7587_v63  ;;  %v4517_v19 = vadd.f32 %v4516_v18, %v4504_v13  ;;  %v4529_v20 = vpop.f32.mrf.mxu3  ;;  %v4505_v25 = vpop.f32.mrf.mxu1  ;;  %v7608_v63 = vld [vmem:[%s9474_s1 + $0xa18] sm:$0xff]  ;;  %v7606_v13 = vld [vmem:[%s9474_s1 + $0xa08] sm:$0xff]  ;;  %v7621_v21 = vld [vmem:[%s9474_s1 + $0xa80] sm:$0xff] }
 0x128   :  { %4768 = vmatpush.bf16.msrb.mxu2 %v7595_v0  ;;  %v7616_v0 = vld [vmem:[%s9474_s1 + $0xa58] sm:$0xff] }
 0x129   :  { %4781 = vmatpush.bf16.msrb.mxu3 %v7603_v1  ;;  %v8813_v22 = vadd.f32 %v4529_v20, %v4517_v19  ;;  %v7624_v1 = vld [vmem:[%s9474_s1 + $0xa98] sm:$0xff]  ;;  %v7605_v19 = vld [vmem:[%s9474_s1 + $0xa00] sm:$0xff] }
 0x12a   :  { %4743 = vmatpush.bf16.msrb.mxu0 %v7578_v2  ;;  %v7632_v2 = vld [vmem:[%s9474_s1 + $0xad8] sm:$0xff]  ;;  %v7613_v20 = vld [vmem:[%s9474_s1 + $0xa40] sm:$0xff] }
 0x12b   :  { %4756 = vmatpush.bf16.msrb.mxu1 %v7586_v3  ;;  %v7660_v25 = vld [vmem:[%s9474_s1 + $0xbb8] sm:$0xff] }
 0x12c   :  { %4769 = vmatpush.bf16.msrb.mxu2 %v7594_v4 }
 0x12d   :  { %4782 = vmatpush.bf16.msrb.mxu3 %v7602_v5 }
 0x12e   :  { %4744 = vmatpush.bf16.msrb.mxu0 %v7577_v8  ;;  %v4518_v34 = vpop.f32.mrf.mxu2  ;;  %v7607_v8 = vld [vmem:[%s9474_s1 + $0xa10] sm:$0xff] }
 0x12f   :  { %4757 = vmatpush.bf16.msrb.mxu1 %v7585_v9  ;;  %v4531_v37 = vpop.f32.mrf.mxu3  ;;  %v7615_v9 = vld [vmem:[%s9474_s1 + $0xa50] sm:$0xff] }
 0x130   :  { %4770 = vmatpush.bf16.msrb.mxu2 %v7593_v11  ;;  %v7623_v11 = vld [vmem:[%s9474_s1 + $0xa90] sm:$0xff]  ;;  %v7658_v37 = vld [vmem:[%s9474_s1 + $0xba8] sm:$0xff] }
 0x131   :  { %4783 = vmatpush.bf16.msrb.mxu3 %v7601_v12  ;;  %v7631_v12 = vld [vmem:[%s9474_s1 + $0xad0] sm:$0xff] }
 0x132   :  { %4745 = vmatpush.bf16.msrb.mxu0 %v7576_v14  ;;  %v7614_v14 = vld [vmem:[%s9474_s1 + $0xa48] sm:$0xff]  ;;  %v7667_v34 = vld [vmem:[%s9474_s1 + $0xbf0] sm:$0xff] }
 0x133   :  { %4758 = vmatpush.bf16.msrb.mxu1 %v7584_v15  ;;  %v7622_v15 = vld [vmem:[%s9474_s1 + $0xa88] sm:$0xff] }
 0x134   :  { %4771 = vmatpush.bf16.msrb.mxu2 %v7592_v16  ;;  %v7630_v16 = vld [vmem:[%s9474_s1 + $0xac8] sm:$0xff] }
 0x135   :  { %4784 = vmatpush.bf16.msrb.mxu3 %v7600_v17 }
 0x136   :  { %4746 = vmatpush.bf16.msrb.mxu0 %v7575_v23  ;;  %v7644_v23 = vld [vmem:[%s9474_s1 + $0xb38] sm:$0xff] }
 0x137   :  { %4759 = vmatpush.bf16.msrb.mxu1 %v7583_v24  ;;  %v7652_v24 = vld [vmem:[%s9474_s1 + $0xb78] sm:$0xff] }
 0x138   :  { %4772 = vmatpush.bf16.msrb.mxu2 %v7591_v26  ;;  %v7668_v26 = vld [vmem:[%s9474_s1 + $0xbf8] sm:$0xff] }
 0x139   :  { %4785 = vmatpush.bf16.msrb.mxu3 %v7599_v27  ;;  %v1109_v27 = vld [vmem:[#allocation1] sm:$0xff] }
 0x13a   :  { %4747 = vmatpush.bf16.msrb.mxu0 %v7574_v28  ;;  %v1111_v28 = vld [vmem:[#allocation1 + $0x12] sm:$0xff] }
 0x13b   :  { %4760 = vmatpush.bf16.msrb.mxu1 %v7582_v29  ;;  %v1110_v29 = vld [vmem:[#allocation1 + $0x9] sm:$0xff] }
 0x13c   :  { %4773 = vmatpush.bf16.msrb.mxu2 %v7590_v30  ;;  %v1112_v30 = vld [vmem:[#allocation1 + $0x1b] sm:$0xff] }
 0x13d   :  { %4786 = vmatpush.bf16.msrb.mxu3 %v7598_v31  ;;  %v7643_v31 = vld [vmem:[%s9474_s1 + $0xb30] sm:$0xff] }
 0x13e   :  { %4748 = vmatpush.bf16.msrb.mxu0 %v7573_v39  ;;  %v4542_v55 = vpop.f32.mrf.mxu0 }
 0x13f   :  { %4761 = vmatpush.bf16.msrb.mxu1 %v7581_v40  ;;  %v4543_v56 = vadd.f32 %v4542_v55, %v8813_v22  ;;  %v4555_v59 = vpop.f32.mrf.mxu1  ;;  %v7629_v22 = vld [vmem:[%s9474_s1 + $0xac0] sm:$0xff] }
 0x140   :  { %4774 = vmatpush.bf16.msrb.mxu2 %v7589_v41  ;;  %v7641_v41 = vld [vmem:[%s9474_s1 + $0xb20] sm:$0xff] }
 0x141   :  { %4787 = vmatpush.bf16.msrb.mxu3 %v7597_v42  ;;  %4749 = vmatmul.bf16.vlgmr.msrb.gmra.mxu0 %v1103_v32  ;;  %v4556_v62 = vadd.f32 %v4555_v59, %v4543_v56  ;;  %v7651_v32 = vld [vmem:[%s9474_s1 + $0xb70] sm:$0xff]  ;;  %v7649_v42 = vld [vmem:[%s9474_s1 + $0xb60] sm:$0xff] }
 0x142   :  { %4793 = vmatpush.bf16.msra.mxu0 %v7612_v43  ;;  %4762 = vmatmul.bf16.vlgmr.msrb.gmra.mxu1 %v1104_v35  ;;  %v7642_v35 = vld [vmem:[%s9474_s1 + $0xb28] sm:$0xff]  ;;  %v7639_v56 = vld [vmem:[%s9474_s1 + $0xb10] sm:$0xff] }
 0x143   :  { %4806 = vmatpush.bf16.msra.mxu1 %v7620_v44  ;;  %4775 = vmatmul.bf16.vlgmr.msrb.gmra.mxu2 %v1105_v33  ;;  %v7659_v33 = vld [vmem:[%s9474_s1 + $0xbb0] sm:$0xff]  ;;  %v7657_v44 = vld [vmem:[%s9474_s1 + $0xba0] sm:$0xff] }
 0x144   :  { %4819 = vmatpush.bf16.msra.mxu2 %v7628_v45  ;;  %4788 = vmatmul.bf16.vlgmr.msrb.gmra.mxu3 %v1106_v36  ;;  %v7650_v36 = vld [vmem:[%s9474_s1 + $0xb68] sm:$0xff]  ;;  %v7665_v45 = vld [vmem:[%s9474_s1 + $0xbe0] sm:$0xff]  ;;  %v7655_v59 = vld [vmem:[%s9474_s1 + $0xb90] sm:$0xff] }
 0x145   :  { %4832 = vmatpush.bf16.msra.mxu3 %v7636_v46 }
 0x146   :  { %4794 = vmatpush.bf16.msra.mxu0 %v7611_v47  ;;  %v4568_v3 = vpop.f32.mrf.mxu2  ;;  %v4544_v6 = vpop.f32.mrf.mxu0  ;;  %v7640_v47 = vld [vmem:[%s9474_s1 + $0xb18] sm:$0xff] }
 0x147   :  { %4807 = vmatpush.bf16.msra.mxu1 %v7619_v48  ;;  %v4569_v4 = vadd.f32 %v4568_v3, %v4556_v62  ;;  %v4581_v5 = vpop.f32.mrf.mxu3  ;;  %v4557_v10 = vpop.f32.mrf.mxu1  ;;  %v7648_v48 = vld [vmem:[%s9474_s1 + $0xb58] sm:$0xff]  ;;  %v7646_v62 = vld [vmem:[%s9474_s1 + $0xb48] sm:$0xff] }
 0x148   :  { %4820 = vmatpush.bf16.msra.mxu2 %v7627_v49  ;;  %v7656_v49 = vld [vmem:[%s9474_s1 + $0xb98] sm:$0xff]  ;;  %v7653_v10 = vld [vmem:[%s9474_s1 + $0xb80] sm:$0xff] }
 0x149   :  { %4833 = vmatpush.bf16.msra.mxu3 %v7635_v50  ;;  %v4582_v7 = vadd.f32 %v4581_v5, %v4569_v4  ;;  %v7664_v50 = vld [vmem:[%s9474_s1 + $0xbd8] sm:$0xff]  ;;  %v1114_v4 = vld [vmem:[#allocation1 + $0x2d] sm:$0xff] }
 0x14a   :  { %4795 = vmatpush.bf16.msra.mxu0 %v7610_v51  ;;  %v1116_v5 = vld [vmem:[#allocation1 + $0x3f] sm:$0xff] }
 0x14b   :  { %4808 = vmatpush.bf16.msra.mxu1 %v7618_v52 }
 0x14c   :  { %4821 = vmatpush.bf16.msra.mxu2 %v7626_v53 }
 0x14d   :  { %4834 = vmatpush.bf16.msra.mxu3 %v7634_v54 }
 0x14e   :  { %4796 = vmatpush.bf16.msra.mxu0 %v7609_v57  ;;  %v4570_v17 = vpop.f32.mrf.mxu2  ;;  %v7647_v57 = vld [vmem:[%s9474_s1 + $0xb50] sm:$0xff] }
 0x14f   :  { %4809 = vmatpush.bf16.msra.mxu1 %v7617_v58  ;;  %v4583_v18 = vpop.f32.mrf.mxu3  ;;  %v7683_v17 = vld [vmem:[%s9474_s1 + $0xc70] sm:$0xff] }
 0x150   :  { %4822 = vmatpush.bf16.msra.mxu2 %v7625_v60  ;;  %v7663_v60 = vld [vmem:[%s9474_s1 + $0xbd0] sm:$0xff] }
 0x151   :  { %4835 = vmatpush.bf16.msra.mxu3 %v7633_v61  ;;  %v7638_v61 = vld [vmem:[%s9474_s1 + $0xb08] sm:$0xff]  ;;  %v7691_v18 = vld [vmem:[%s9474_s1 + $0xcb0] sm:$0xff] }
 0x152   :  { %4797 = vmatpush.bf16.msra.mxu0 %v7608_v63  ;;  %v7654_v63 = vld [vmem:[%s9474_s1 + $0xb88] sm:$0xff] }
 0x153   :  { %4810 = vmatpush.bf16.msra.mxu1 %v7616_v0  ;;  %v7662_v0 = vld [vmem:[%s9474_s1 + $0xbc8] sm:$0xff] }
 0x154   :  { %4823 = vmatpush.bf16.msra.mxu2 %v7624_v1  ;;  %v1113_v1 = vld [vmem:[#allocation1 + $0x24] sm:$0xff] }
 0x155   :  { %4836 = vmatpush.bf16.msra.mxu3 %v7632_v2  ;;  %v1115_v2 = vld [vmem:[#allocation1 + $0x36] sm:$0xff] }
 0x156   :  { %4798 = vmatpush.bf16.msra.mxu0 %v7607_v8  ;;  %v7637_v8 = vld [vmem:[%s9474_s1 + $0xb00] sm:$0xff] }
 0x157   :  { %4811 = vmatpush.bf16.msra.mxu1 %v7615_v9  ;;  %v7645_v9 = vld [vmem:[%s9474_s1 + $0xb40] sm:$0xff] }
 0x158   :  { %4824 = vmatpush.bf16.msra.mxu2 %v7623_v11  ;;  %v7661_v11 = vld [vmem:[%s9474_s1 + $0xbc0] sm:$0xff] }
 0x159   :  { %4837 = vmatpush.bf16.msra.mxu3 %v7631_v12  ;;  %v7676_v12 = vld [vmem:[%s9474_s1 + $0xc38] sm:$0xff] }
 0x15a   :  { %4799 = vmatpush.bf16.msra.mxu0 %v7606_v13  ;;  %v7684_v13 = vld [vmem:[%s9474_s1 + $0xc78] sm:$0xff] }
 0x15b   :  { %4812 = vmatpush.bf16.msra.mxu1 %v7614_v14  ;;  %v7692_v14 = vld [vmem:[%s9474_s1 + $0xcb8] sm:$0xff] }
 0x15c   :  { %4825 = vmatpush.bf16.msra.mxu2 %v7622_v15  ;;  %v7700_v15 = vld [vmem:[%s9474_s1 + $0xcf8] sm:$0xff] }
 0x15d   :  { %4838 = vmatpush.bf16.msra.mxu3 %v7630_v16  ;;  %v7675_v16 = vld [vmem:[%s9474_s1 + $0xc30] sm:$0xff] }
 0x15e   :  { %4800 = vmatpush.bf16.msra.mxu0 %v7605_v19  ;;  %v4594_v39 = vpop.f32.mrf.mxu0  ;;  %v7699_v19 = vld [vmem:[%s9474_s1 + $0xcf0] sm:$0xff] }
 0x15f   :  { %4813 = vmatpush.bf16.msra.mxu1 %v7613_v20  ;;  %v4595_v40 = vadd.f32 %v4594_v39, %v4582_v7  ;;  %v4607_v43 = vpop.f32.mrf.mxu1  ;;  %v27_v7 = vld [vmem:[%s9473_s0 + $0x30] sm:$0xff]  ;;  %v7674_v20 = vld [vmem:[%s9474_s1 + $0xc28] sm:$0xff] }
 0x160   :  { %4826 = vmatpush.bf16.msra.mxu2 %v7621_v21  ;;  %1118 = vst [vmem:[#allocation1] ss:$9 sm:$0xff] %v27_v7  ;;  %v7682_v21 = vld [vmem:[%s9474_s1 + $0xc68] sm:$0xff] }
 0x161   :  { %4839 = vmatpush.bf16.msra.mxu3 %v7629_v22  ;;  %4801 = vmatmul.bf16.vlgmr.msra.gmra.mxu0 %v1109_v27  ;;  %v4608_v46 = vadd.f32 %v4607_v43, %v4595_v40  ;;  %v7690_v22 = vld [vmem:[%s9474_s1 + $0xca8] sm:$0xff]  ;;  %v7681_v27 = vld [vmem:[%s9474_s1 + $0xc60] sm:$0xff] }
 0x162   :  { %4845 = vmatpush.bf16.msrb.mxu0 %v7644_v23  ;;  %4814 = vmatmul.bf16.vlgmr.msra.gmra.mxu1 %v1110_v29  ;;  %v7698_v23 = vld [vmem:[%s9474_s1 + $0xce8] sm:$0xff]  ;;  %v7689_v29 = vld [vmem:[%s9474_s1 + $0xca0] sm:$0xff] }
 0x163   :  { %4858 = vmatpush.bf16.msrb.mxu1 %v7652_v24  ;;  %4827 = vmatmul.bf16.vlgmr.msra.gmra.mxu2 %v1111_v28  ;;  %v7730_v7 = vld [vmem:[%s9474_s1 + $0xde8] sm:$0xff] }
 0x164   :  { %4871 = vmatpush.bf16.msrb.mxu2 %v7660_v25  ;;  %4840 = vmatmul.bf16.vlgmr.msra.gmra.mxu3 %v1112_v30  ;;  %v7697_v30 = vld [vmem:[%s9474_s1 + $0xce0] sm:$0xff] }
 0x165   :  { %4884 = vmatpush.bf16.msrb.mxu3 %v7668_v26  ;;  %v7673_v26 = vld [vmem:[%s9474_s1 + $0xc20] sm:$0xff] }
 0x166   :  { %4846 = vmatpush.bf16.msrb.mxu0 %v7643_v31  ;;  %v4620_v51 = vpop.f32.mrf.mxu2  ;;  %v4596_v54 = vpop.f32.mrf.mxu0 }
 0x167   :  { %4859 = vmatpush.bf16.msrb.mxu1 %v7651_v32  ;;  %v4621_v52 = vadd.f32 %v4620_v51, %v4608_v46  ;;  %v4633_v53 = vpop.f32.mrf.mxu3  ;;  %v4609_v58 = vpop.f32.mrf.mxu1  ;;  %v7672_v32 = vld [vmem:[%s9474_s1 + $0xc18] sm:$0xff]  ;;  %v7670_v46 = vld [vmem:[%s9474_s1 + $0xc08] sm:$0xff]  ;;  %v7685_v54 = vld [vmem:[%s9474_s1 + $0xc80] sm:$0xff] }
 0x168   :  { %4872 = vmatpush.bf16.msrb.mxu2 %v7659_v33  ;;  %v7680_v33 = vld [vmem:[%s9474_s1 + $0xc58] sm:$0xff] }
 0x169   :  { %4885 = vmatpush.bf16.msrb.mxu3 %v7667_v34  ;;  %v9011_v55 = vadd.f32 %v4633_v53, %v4621_v52  ;;  %v7688_v34 = vld [vmem:[%s9474_s1 + $0xc98] sm:$0xff]  ;;  %v7669_v52 = vld [vmem:[%s9474_s1 + $0xc00] sm:$0xff] }
 0x16a   :  { %4847 = vmatpush.bf16.msrb.mxu0 %v7642_v35  ;;  %v7696_v35 = vld [vmem:[%s9474_s1 + $0xcd8] sm:$0xff]  ;;  %v7677_v53 = vld [vmem:[%s9474_s1 + $0xc40] sm:$0xff] }
 0x16b   :  { %4860 = vmatpush.bf16.msrb.mxu1 %v7650_v36  ;;  %v7724_v58 = vld [vmem:[%s9474_s1 + $0xdb8] sm:$0xff] }
 0x16c   :  { %4873 = vmatpush.bf16.msrb.mxu2 %v7658_v37 }
 0x16d   :  { %4886 = vmatpush.bf16.msrb.mxu3 %v7666_v38 }
 0x16e   :  { %4848 = vmatpush.bf16.msrb.mxu0 %v7641_v41  ;;  %v4622_v3 = vpop.f32.mrf.mxu2  ;;  %v7671_v41 = vld [vmem:[%s9474_s1 + $0xc10] sm:$0xff] }
 0x16f   :  { %4861 = vmatpush.bf16.msrb.mxu1 %v7649_v42  ;;  %v4635_v6 = vpop.f32.mrf.mxu3  ;;  %v7679_v42 = vld [vmem:[%s9474_s1 + $0xc50] sm:$0xff] }
 0x170   :  { %4874 = vmatpush.bf16.msrb.mxu2 %v7657_v44  ;;  %v7687_v44 = vld [vmem:[%s9474_s1 + $0xc90] sm:$0xff]  ;;  %v7722_v6 = vld [vmem:[%s9474_s1 + $0xda8] sm:$0xff] }
 0x171   :  { %4887 = vmatpush.bf16.msrb.mxu3 %v7665_v45  ;;  %v7695_v45 = vld [vmem:[%s9474_s1 + $0xcd0] sm:$0xff] }
 0x172   :  { %4849 = vmatpush.bf16.msrb.mxu0 %v7640_v47  ;;  %v7678_v47 = vld [vmem:[%s9474_s1 + $0xc48] sm:$0xff]  ;;  %v7731_v3 = vld [vmem:[%s9474_s1 + $0xdf0] sm:$0xff] }
 0x173   :  { %4862 = vmatpush.bf16.msrb.mxu1 %v7648_v48  ;;  %v7686_v48 = vld [vmem:[%s9474_s1 + $0xc88] sm:$0xff] }
 0x174   :  { %4875 = vmatpush.bf16.msrb.mxu2 %v7656_v49  ;;  %v7694_v49 = vld [vmem:[%s9474_s1 + $0xcc8] sm:$0xff] }
 0x175   :  { %4888 = vmatpush.bf16.msrb.mxu3 %v7664_v50 }
 0x176   :  { %4850 = vmatpush.bf16.msrb.mxu0 %v7639_v56  ;;  %v7708_v56 = vld [vmem:[%s9474_s1 + $0xd38] sm:$0xff] }
 0x177   :  { %4863 = vmatpush.bf16.msrb.mxu1 %v7647_v57  ;;  %v7716_v57 = vld [vmem:[%s9474_s1 + $0xd78] sm:$0xff] }
 0x178   :  { %4876 = vmatpush.bf16.msrb.mxu2 %v7655_v59  ;;  %v7732_v59 = vld [vmem:[%s9474_s1 + $0xdf8] sm:$0xff] }
 0x179   :  { %4889 = vmatpush.bf16.msrb.mxu3 %v7663_v60  ;;  %v1119_v60 = vld [vmem:[#allocation1] sm:$0xff] }
 0x17a   :  { %4851 = vmatpush.bf16.msrb.mxu0 %v7638_v61  ;;  %v1121_v61 = vld [vmem:[#allocation1 + $0x12] sm:$0xff] }
 0x17b   :  { %4864 = vmatpush.bf16.msrb.mxu1 %v7646_v62  ;;  %v1120_v62 = vld [vmem:[#allocation1 + $0x9] sm:$0xff] }
 0x17c   :  { %4877 = vmatpush.bf16.msrb.mxu2 %v7654_v63  ;;  %v1122_v63 = vld [vmem:[#allocation1 + $0x1b] sm:$0xff] }
 0x17d   :  { %4890 = vmatpush.bf16.msrb.mxu3 %v7662_v0  ;;  %v7707_v0 = vld [vmem:[%s9474_s1 + $0xd30] sm:$0xff] }
 0x17e   :  { %4852 = vmatpush.bf16.msrb.mxu0 %v7637_v8  ;;  %v4646_v24 = vpop.f32.mrf.mxu0 }
 0x17f   :  { %4865 = vmatpush.bf16.msrb.mxu1 %v7645_v9  ;;  %v4647_v25 = vadd.f32 %v4646_v24, %v9011_v55  ;;  %v4659_v28 = vpop.f32.mrf.mxu1  ;;  %v7693_v55 = vld [vmem:[%s9474_s1 + $0xcc0] sm:$0xff] }
 0x180   :  { %4878 = vmatpush.bf16.msrb.mxu2 %v7653_v10  ;;  %v7705_v10 = vld [vmem:[%s9474_s1 + $0xd20] sm:$0xff] }
 0x181   :  { %4891 = vmatpush.bf16.msrb.mxu3 %v7661_v11  ;;  %4853 = vmatmul.bf16.vlgmr.msrb.gmra.mxu0 %v1113_v1  ;;  %v4660_v31 = vadd.f32 %v4659_v28, %v4647_v25  ;;  %v7715_v1 = vld [vmem:[%s9474_s1 + $0xd70] sm:$0xff]  ;;  %v7713_v11 = vld [vmem:[%s9474_s1 + $0xd60] sm:$0xff] }
 0x182   :  { %4897 = vmatpush.bf16.msra.mxu0 %v7676_v12  ;;  %4866 = vmatmul.bf16.vlgmr.msrb.gmra.mxu1 %v1114_v4  ;;  %v7706_v4 = vld [vmem:[%s9474_s1 + $0xd28] sm:$0xff]  ;;  %v7703_v25 = vld [vmem:[%s9474_s1 + $0xd10] sm:$0xff] }
 0x183   :  { %4910 = vmatpush.bf16.msra.mxu1 %v7684_v13  ;;  %4879 = vmatmul.bf16.vlgmr.msrb.gmra.mxu2 %v1115_v2  ;;  %v7723_v2 = vld [vmem:[%s9474_s1 + $0xdb0] sm:$0xff]  ;;  %v7721_v13 = vld [vmem:[%s9474_s1 + $0xda0] sm:$0xff] }
 0x184   :  { %4923 = vmatpush.bf16.msra.mxu2 %v7692_v14  ;;  %4892 = vmatmul.bf16.vlgmr.msrb.gmra.mxu3 %v1116_v5  ;;  %v7714_v5 = vld [vmem:[%s9474_s1 + $0xd68] sm:$0xff]  ;;  %v7729_v14 = vld [vmem:[%s9474_s1 + $0xde0] sm:$0xff]  ;;  %v7719_v28 = vld [vmem:[%s9474_s1 + $0xd90] sm:$0xff] }
 0x185   :  { %4936 = vmatpush.bf16.msra.mxu3 %v7700_v15 }
 0x186   :  { %4898 = vmatpush.bf16.msra.mxu0 %v7675_v16  ;;  %v4672_v36 = vpop.f32.mrf.mxu2  ;;  %v4648_v39 = vpop.f32.mrf.mxu0  ;;  %v7704_v16 = vld [vmem:[%s9474_s1 + $0xd18] sm:$0xff] }
 0x187   :  { %4911 = vmatpush.bf16.msra.mxu1 %v7683_v17  ;;  %v4673_v37 = vadd.f32 %v4672_v36, %v4660_v31  ;;  %v4685_v38 = vpop.f32.mrf.mxu3  ;;  %v4661_v43 = vpop.f32.mrf.mxu1  ;;  %v7712_v17 = vld [vmem:[%s9474_s1 + $0xd58] sm:$0xff]  ;;  %v7710_v31 = vld [vmem:[%s9474_s1 + $0xd48] sm:$0xff] }
 0x188   :  { %4924 = vmatpush.bf16.msra.mxu2 %v7691_v18  ;;  %v7720_v18 = vld [vmem:[%s9474_s1 + $0xd98] sm:$0xff]  ;;  %v7717_v43 = vld [vmem:[%s9474_s1 + $0xd80] sm:$0xff] }
 0x189   :  { %4937 = vmatpush.bf16.msra.mxu3 %v7699_v19  ;;  %v4686_v40 = vadd.f32 %v4685_v38, %v4673_v37  ;;  %v7728_v19 = vld [vmem:[%s9474_s1 + $0xdd8] sm:$0xff]  ;;  %v1124_v37 = vld [vmem:[#allocation1 + $0x2d] sm:$0xff] }
 0x18a   :  { %4899 = vmatpush.bf16.msra.mxu0 %v7674_v20  ;;  %v1126_v38 = vld [vmem:[#allocation1 + $0x3f] sm:$0xff] }
 0x18b   :  { %4912 = vmatpush.bf16.msra.mxu1 %v7682_v21 }
 0x18c   :  { %4925 = vmatpush.bf16.msra.mxu2 %v7690_v22 }
 0x18d   :  { %4938 = vmatpush.bf16.msra.mxu3 %v7698_v23 }
 0x18e   :  { %4900 = vmatpush.bf16.msra.mxu0 %v7673_v26  ;;  %v4674_v50 = vpop.f32.mrf.mxu2  ;;  %v7711_v26 = vld [vmem:[%s9474_s1 + $0xd50] sm:$0xff] }
 0x18f   :  { %4913 = vmatpush.bf16.msra.mxu1 %v7681_v27  ;;  %v4687_v51 = vpop.f32.mrf.mxu3  ;;  %v7747_v50 = vld [vmem:[%s9474_s1 + $0xe70] sm:$0xff] }
 0x190   :  { %4926 = vmatpush.bf16.msra.mxu2 %v7689_v29  ;;  %v7727_v29 = vld [vmem:[%s9474_s1 + $0xdd0] sm:$0xff] }
 0x191   :  { %4939 = vmatpush.bf16.msra.mxu3 %v7697_v30  ;;  %v7702_v30 = vld [vmem:[%s9474_s1 + $0xd08] sm:$0xff]  ;;  %v7755_v51 = vld [vmem:[%s9474_s1 + $0xeb0] sm:$0xff] }
 0x192   :  { %4901 = vmatpush.bf16.msra.mxu0 %v7672_v32  ;;  %v7718_v32 = vld [vmem:[%s9474_s1 + $0xd88] sm:$0xff] }
 0x193   :  { %4914 = vmatpush.bf16.msra.mxu1 %v7680_v33  ;;  %v7726_v33 = vld [vmem:[%s9474_s1 + $0xdc8] sm:$0xff] }
 0x194   :  { %4927 = vmatpush.bf16.msra.mxu2 %v7688_v34  ;;  %v1123_v34 = vld [vmem:[#allocation1 + $0x24] sm:$0xff] }
 0x195   :  { %4940 = vmatpush.bf16.msra.mxu3 %v7696_v35  ;;  %v1125_v35 = vld [vmem:[#allocation1 + $0x36] sm:$0xff] }
 0x196   :  { %4902 = vmatpush.bf16.msra.mxu0 %v7671_v41  ;;  %v7701_v41 = vld [vmem:[%s9474_s1 + $0xd00] sm:$0xff] }
 0x197   :  { %4915 = vmatpush.bf16.msra.mxu1 %v7679_v42  ;;  %v7709_v42 = vld [vmem:[%s9474_s1 + $0xd40] sm:$0xff] }
 0x198   :  { %4928 = vmatpush.bf16.msra.mxu2 %v7687_v44  ;;  %v7725_v44 = vld [vmem:[%s9474_s1 + $0xdc0] sm:$0xff] }
 0x199   :  { %4941 = vmatpush.bf16.msra.mxu3 %v7695_v45  ;;  %v7740_v45 = vld [vmem:[%s9474_s1 + $0xe38] sm:$0xff] }
 0x19a   :  { %4903 = vmatpush.bf16.msra.mxu0 %v7670_v46  ;;  %v7748_v46 = vld [vmem:[%s9474_s1 + $0xe78] sm:$0xff] }
 0x19b   :  { %4916 = vmatpush.bf16.msra.mxu1 %v7678_v47  ;;  %v7756_v47 = vld [vmem:[%s9474_s1 + $0xeb8] sm:$0xff] }
 0x19c   :  { %4929 = vmatpush.bf16.msra.mxu2 %v7686_v48  ;;  %v7764_v48 = vld [vmem:[%s9474_s1 + $0xef8] sm:$0xff] }
 0x19d   :  { %4942 = vmatpush.bf16.msra.mxu3 %v7694_v49  ;;  %v7739_v49 = vld [vmem:[%s9474_s1 + $0xe30] sm:$0xff] }
 0x19e   :  { %4904 = vmatpush.bf16.msra.mxu0 %v7669_v52  ;;  %v4698_v8 = vpop.f32.mrf.mxu0  ;;  %v7763_v52 = vld [vmem:[%s9474_s1 + $0xef0] sm:$0xff] }
 0x19f   :  { %4917 = vmatpush.bf16.msra.mxu1 %v7677_v53  ;;  %v4699_v9 = vadd.f32 %v4698_v8, %v4686_v40  ;;  %v4711_v12 = vpop.f32.mrf.mxu1  ;;  %v28_v40 = vld [vmem:[%s9473_s0 + $0x38] sm:$0xff]  ;;  %v7738_v53 = vld [vmem:[%s9474_s1 + $0xe28] sm:$0xff] }
 0x1a0   :  { %4930 = vmatpush.bf16.msra.mxu2 %v7685_v54  ;;  %1128 = vst [vmem:[#allocation1] ss:$9 sm:$0xff] %v28_v40  ;;  %v7746_v54 = vld [vmem:[%s9474_s1 + $0xe68] sm:$0xff] }
 0x1a1   :  { %4943 = vmatpush.bf16.msra.mxu3 %v7693_v55  ;;  %4905 = vmatmul.bf16.vlgmr.msra.gmra.mxu0 %v1119_v60  ;;  %v4712_v15 = vadd.f32 %v4711_v12, %v4699_v9  ;;  %v7754_v55 = vld [vmem:[%s9474_s1 + $0xea8] sm:$0xff]  ;;  %v7745_v60 = vld [vmem:[%s9474_s1 + $0xe60] sm:$0xff] }
 0x1a2   :  { %4949 = vmatpush.bf16.msrb.mxu0 %v7708_v56  ;;  %4918 = vmatmul.bf16.vlgmr.msra.gmra.mxu1 %v1120_v62  ;;  %v7762_v56 = vld [vmem:[%s9474_s1 + $0xee8] sm:$0xff]  ;;  %v7753_v62 = vld [vmem:[%s9474_s1 + $0xea0] sm:$0xff] }
 0x1a3   :  { %4962 = vmatpush.bf16.msrb.mxu1 %v7716_v57  ;;  %4931 = vmatmul.bf16.vlgmr.msra.gmra.mxu2 %v1121_v61  ;;  %v7794_v40 = vld [vmem:[%s9474_s1 + $0xfe8] sm:$0xff] }
 0x1a4   :  { %4975 = vmatpush.bf16.msrb.mxu2 %v7724_v58  ;;  %4944 = vmatmul.bf16.vlgmr.msra.gmra.mxu3 %v1122_v63  ;;  %v7761_v63 = vld [vmem:[%s9474_s1 + $0xee0] sm:$0xff] }
 0x1a5   :  { %4988 = vmatpush.bf16.msrb.mxu3 %v7732_v59  ;;  %v7737_v59 = vld [vmem:[%s9474_s1 + $0xe20] sm:$0xff] }
 0x1a6   :  { %4950 = vmatpush.bf16.msrb.mxu0 %v7707_v0  ;;  %v4724_v20 = vpop.f32.mrf.mxu2  ;;  %v4700_v23 = vpop.f32.mrf.mxu0 }
 0x1a7   :  { %4963 = vmatpush.bf16.msrb.mxu1 %v7715_v1  ;;  %v4725_v21 = vadd.f32 %v4724_v20, %v4712_v15  ;;  %v4737_v22 = vpop.f32.mrf.mxu3  ;;  %v4713_v27 = vpop.f32.mrf.mxu1  ;;  %v7736_v1 = vld [vmem:[%s9474_s1 + $0xe18] sm:$0xff]  ;;  %v7734_v15 = vld [vmem:[%s9474_s1 + $0xe08] sm:$0xff]  ;;  %v7749_v23 = vld [vmem:[%s9474_s1 + $0xe80] sm:$0xff] }
 0x1a8   :  { %4976 = vmatpush.bf16.msrb.mxu2 %v7723_v2  ;;  %v7744_v2 = vld [vmem:[%s9474_s1 + $0xe58] sm:$0xff] }
 0x1a9   :  { %4989 = vmatpush.bf16.msrb.mxu3 %v7731_v3  ;;  %v9209_v24 = vadd.f32 %v4737_v22, %v4725_v21  ;;  %v7752_v3 = vld [vmem:[%s9474_s1 + $0xe98] sm:$0xff]  ;;  %v7733_v21 = vld [vmem:[%s9474_s1 + $0xe00] sm:$0xff] }
 0x1aa   :  { %4951 = vmatpush.bf16.msrb.mxu0 %v7706_v4  ;;  %v7760_v4 = vld [vmem:[%s9474_s1 + $0xed8] sm:$0xff]  ;;  %v7741_v22 = vld [vmem:[%s9474_s1 + $0xe40] sm:$0xff] }
 0x1ab   :  { %4964 = vmatpush.bf16.msrb.mxu1 %v7714_v5  ;;  %v7788_v27 = vld [vmem:[%s9474_s1 + $0xfb8] sm:$0xff] }
 0x1ac   :  { %4977 = vmatpush.bf16.msrb.mxu2 %v7722_v6 }
 0x1ad   :  { %4990 = vmatpush.bf16.msrb.mxu3 %v7730_v7 }
 0x1ae   :  { %4952 = vmatpush.bf16.msrb.mxu0 %v7705_v10  ;;  %v4726_v36 = vpop.f32.mrf.mxu2  ;;  %v7735_v10 = vld [vmem:[%s9474_s1 + $0xe10] sm:$0xff] }
 0x1af   :  { %4965 = vmatpush.bf16.msrb.mxu1 %v7713_v11  ;;  %v4739_v39 = vpop.f32.mrf.mxu3  ;;  %v7743_v11 = vld [vmem:[%s9474_s1 + $0xe50] sm:$0xff] }
 0x1b0   :  { %4978 = vmatpush.bf16.msrb.mxu2 %v7721_v13  ;;  %v7751_v13 = vld [vmem:[%s9474_s1 + $0xe90] sm:$0xff]  ;;  %v7786_v39 = vld [vmem:[%s9474_s1 + $0xfa8] sm:$0xff] }
 0x1b1   :  { %4991 = vmatpush.bf16.msrb.mxu3 %v7729_v14  ;;  %v7759_v14 = vld [vmem:[%s9474_s1 + $0xed0] sm:$0xff] }
 0x1b2   :  { %4953 = vmatpush.bf16.msrb.mxu0 %v7704_v16  ;;  %v7742_v16 = vld [vmem:[%s9474_s1 + $0xe48] sm:$0xff]  ;;  %v7795_v36 = vld [vmem:[%s9474_s1 + $0xff0] sm:$0xff] }
 0x1b3   :  { %4966 = vmatpush.bf16.msrb.mxu1 %v7712_v17  ;;  %v7750_v17 = vld [vmem:[%s9474_s1 + $0xe88] sm:$0xff] }
 0x1b4   :  { %4979 = vmatpush.bf16.msrb.mxu2 %v7720_v18  ;;  %v7758_v18 = vld [vmem:[%s9474_s1 + $0xec8] sm:$0xff] }
 0x1b5   :  { %4992 = vmatpush.bf16.msrb.mxu3 %v7728_v19 }
 0x1b6   :  { %4954 = vmatpush.bf16.msrb.mxu0 %v7703_v25  ;;  %v7772_v25 = vld [vmem:[%s9474_s1 + $0xf38] sm:$0xff] }
 0x1b7   :  { %4967 = vmatpush.bf16.msrb.mxu1 %v7711_v26  ;;  %v7780_v26 = vld [vmem:[%s9474_s1 + $0xf78] sm:$0xff] }
 0x1b8   :  { %4980 = vmatpush.bf16.msrb.mxu2 %v7719_v28  ;;  %v7796_v28 = vld [vmem:[%s9474_s1 + $0xff8] sm:$0xff] }
 0x1b9   :  { %4993 = vmatpush.bf16.msrb.mxu3 %v7727_v29  ;;  %v1129_v29 = vld [vmem:[#allocation1] sm:$0xff] }
 0x1ba   :  { %4955 = vmatpush.bf16.msrb.mxu0 %v7702_v30  ;;  %v1131_v30 = vld [vmem:[#allocation1 + $0x12] sm:$0xff] }
 0x1bb   :  { %4968 = vmatpush.bf16.msrb.mxu1 %v7710_v31  ;;  %v1130_v31 = vld [vmem:[#allocation1 + $0x9] sm:$0xff] }
 0x1bc   :  { %4981 = vmatpush.bf16.msrb.mxu2 %v7718_v32  ;;  %v1132_v32 = vld [vmem:[#allocation1 + $0x1b] sm:$0xff] }
 0x1bd   :  { %4994 = vmatpush.bf16.msrb.mxu3 %v7726_v33  ;;  %v7771_v33 = vld [vmem:[%s9474_s1 + $0xf30] sm:$0xff] }
 0x1be   :  { %4956 = vmatpush.bf16.msrb.mxu0 %v7701_v41  ;;  %v4750_v57 = vpop.f32.mrf.mxu0 }
 0x1bf   :  { %4969 = vmatpush.bf16.msrb.mxu1 %v7709_v42  ;;  %v4751_v58 = vadd.f32 %v4750_v57, %v9209_v24  ;;  %v4763_v61 = vpop.f32.mrf.mxu1  ;;  %v7757_v24 = vld [vmem:[%s9474_s1 + $0xec0] sm:$0xff] }
 0x1c0   :  { %4982 = vmatpush.bf16.msrb.mxu2 %v7717_v43  ;;  %v7769_v43 = vld [vmem:[%s9474_s1 + $0xf20] sm:$0xff] }
 0x1c1   :  { %4995 = vmatpush.bf16.msrb.mxu3 %v7725_v44  ;;  %4957 = vmatmul.bf16.vlgmr.msrb.gmra.mxu0 %v1123_v34  ;;  %v4764_v0 = vadd.f32 %v4763_v61, %v4751_v58  ;;  %v7779_v34 = vld [vmem:[%s9474_s1 + $0xf70] sm:$0xff]  ;;  %v7777_v44 = vld [vmem:[%s9474_s1 + $0xf60] sm:$0xff] }
 0x1c2   :  { %5001 = vmatpush.bf16.msra.mxu0 %v7740_v45  ;;  %4970 = vmatmul.bf16.vlgmr.msrb.gmra.mxu1 %v1124_v37  ;;  %v7770_v37 = vld [vmem:[%s9474_s1 + $0xf28] sm:$0xff]  ;;  %v7767_v58 = vld [vmem:[%s9474_s1 + $0xf10] sm:$0xff] }
 0x1c3   :  { %5014 = vmatpush.bf16.msra.mxu1 %v7748_v46  ;;  %4983 = vmatmul.bf16.vlgmr.msrb.gmra.mxu2 %v1125_v35  ;;  %v7787_v35 = vld [vmem:[%s9474_s1 + $0xfb0] sm:$0xff]  ;;  %v7785_v46 = vld [vmem:[%s9474_s1 + $0xfa0] sm:$0xff] }
 0x1c4   :  { %5027 = vmatpush.bf16.msra.mxu2 %v7756_v47  ;;  %4996 = vmatmul.bf16.vlgmr.msrb.gmra.mxu3 %v1126_v38  ;;  %v7778_v38 = vld [vmem:[%s9474_s1 + $0xf68] sm:$0xff]  ;;  %v7793_v47 = vld [vmem:[%s9474_s1 + $0xfe0] sm:$0xff]  ;;  %v7783_v61 = vld [vmem:[%s9474_s1 + $0xf90] sm:$0xff] }
 0x1c5   :  { %5040 = vmatpush.bf16.msra.mxu3 %v7764_v48 }
 0x1c6   :  { %5002 = vmatpush.bf16.msra.mxu0 %v7739_v49  ;;  %v4776_v5 = vpop.f32.mrf.mxu2  ;;  %v4752_v8 = vpop.f32.mrf.mxu0  ;;  %v7768_v49 = vld [vmem:[%s9474_s1 + $0xf18] sm:$0xff] }
 0x1c7   :  { %5015 = vmatpush.bf16.msra.mxu1 %v7747_v50  ;;  %v4777_v6 = vadd.f32 %v4776_v5, %v4764_v0  ;;  %v4789_v7 = vpop.f32.mrf.mxu3  ;;  %v4765_v12 = vpop.f32.mrf.mxu1  ;;  %v7776_v50 = vld [vmem:[%s9474_s1 + $0xf58] sm:$0xff]  ;;  %v7774_v0 = vld [vmem:[%s9474_s1 + $0xf48] sm:$0xff]  ;;  %v7765_v5 = vld [vmem:[%s9474_s1 + $0xf00] sm:$0xff] }
 0x1c8   :  { %5028 = vmatpush.bf16.msra.mxu2 %v7755_v51  ;;  %v7784_v51 = vld [vmem:[%s9474_s1 + $0xf98] sm:$0xff]  ;;  %v7789_v8 = vld [vmem:[%s9474_s1 + $0xfc0] sm:$0xff] }
 0x1c9   :  { %5041 = vmatpush.bf16.msra.mxu3 %v7763_v52  ;;  %v4790_v9 = vadd.f32 %v4789_v7, %v4777_v6  ;;  %v7792_v52 = vld [vmem:[%s9474_s1 + $0xfd8] sm:$0xff]  ;;  %v7773_v6 = vld [vmem:[%s9474_s1 + $0xf40] sm:$0xff] }
 0x1ca   :  { %5003 = vmatpush.bf16.msra.mxu0 %v7738_v53  ;;  %v7781_v7 = vld [vmem:[%s9474_s1 + $0xf80] sm:$0xff] }
 0x1cb   :  { %5016 = vmatpush.bf16.msra.mxu1 %v7746_v54  ;;  %v1136_v12 = vld [vmem:[#allocation1 + $0x3f] sm:$0xff] }
 0x1cc   :  { %5029 = vmatpush.bf16.msra.mxu2 %v7754_v55 }
 0x1cd   :  { %5042 = vmatpush.bf16.msra.mxu3 %v7762_v56 }
 0x1ce   :  { %5004 = vmatpush.bf16.msra.mxu0 %v7737_v59  ;;  %v4778_v19 = vpop.f32.mrf.mxu2  ;;  %v7775_v59 = vld [vmem:[%s9474_s1 + $0xf50] sm:$0xff] }
 0x1cf   :  { %5017 = vmatpush.bf16.msra.mxu1 %v7745_v60  ;;  %v4791_v20 = vpop.f32.mrf.mxu3 }
 0x1d0   :  { %5030 = vmatpush.bf16.msra.mxu2 %v7753_v62  ;;  %v7791_v62 = vld [vmem:[%s9474_s1 + $0xfd0] sm:$0xff] }
 0x1d1   :  { %5043 = vmatpush.bf16.msra.mxu3 %v7761_v63  ;;  %v7766_v63 = vld [vmem:[%s9474_s1 + $0xf08] sm:$0xff] }
 0x1d2   :  { %5005 = vmatpush.bf16.msra.mxu0 %v7736_v1  ;;  %v7782_v1 = vld [vmem:[%s9474_s1 + $0xf88] sm:$0xff] }
 0x1d3   :  { %5018 = vmatpush.bf16.msra.mxu1 %v7744_v2  ;;  %v7790_v2 = vld [vmem:[%s9474_s1 + $0xfc8] sm:$0xff] }
 0x1d4   :  { %5031 = vmatpush.bf16.msra.mxu2 %v7752_v3 }
 0x1d5   :  { %5044 = vmatpush.bf16.msra.mxu3 %v7760_v4 }
 0x1d6   :  { %5006 = vmatpush.bf16.msra.mxu0 %v7735_v10  ;;  %v1134_v10 = vld [vmem:[#allocation1 + $0x2d] sm:$0xff] }
 0x1d7   :  { %5019 = vmatpush.bf16.msra.mxu1 %v7743_v11  ;;  %v1135_v11 = vld [vmem:[#allocation1 + $0x36] sm:$0xff] }
 0x1d8   :  { %5032 = vmatpush.bf16.msra.mxu2 %v7751_v13 }
 0x1d9   :  { %5045 = vmatpush.bf16.msra.mxu3 %v7759_v14 }
 0x1da   :  { %5007 = vmatpush.bf16.msra.mxu0 %v7734_v15 }
 0x1db   :  { %5020 = vmatpush.bf16.msra.mxu1 %v7742_v16 }
 0x1dc   :  { %5033 = vmatpush.bf16.msra.mxu2 %v7750_v17 }
 0x1dd   :  { %5046 = vmatpush.bf16.msra.mxu3 %v7758_v18 }
 0x1de   :  { %5008 = vmatpush.bf16.msra.mxu0 %v7733_v21  ;;  %v4802_v41 = vpop.f32.mrf.mxu0 }
 0x1df   :  { %5021 = vmatpush.bf16.msra.mxu1 %v7741_v22  ;;  %v4803_v42 = vadd.f32 %v4802_v41, %v4790_v9  ;;  %v4815_v45 = vpop.f32.mrf.mxu1  ;;  %v1133_v9 = vld [vmem:[#allocation1 + $0x24] sm:$0xff]  ;;  %v7804_v41 = vld [vmem:[%s9476_s3 + $0x38] sm:$0xff] }
 0x1e0   :  { %5034 = vmatpush.bf16.msra.mxu2 %v7749_v23 }
 0x1e1   :  { %5047 = vmatpush.bf16.msra.mxu3 %v7757_v24  ;;  %5009 = vmatmul.bf16.vlgmr.msra.gmra.mxu0 %v1129_v29  ;;  %v4816_v48 = vadd.f32 %v4815_v45, %v4803_v42  ;;  %v7802_v45 = vld [vmem:[%s9476_s3 + $0x28] sm:$0xff] }
 0x1e2   :  { %5053 = vmatpush.bf16.msrb.mxu0 %v7772_v25  ;;  %5022 = vmatmul.bf16.vlgmr.msra.gmra.mxu1 %v1130_v31 }
 0x1e3   :  { %5066 = vmatpush.bf16.msrb.mxu1 %v7780_v26  ;;  %5035 = vmatmul.bf16.vlgmr.msra.gmra.mxu2 %v1131_v30 }
 0x1e4   :  { %5079 = vmatpush.bf16.msrb.mxu2 %v7788_v27  ;;  %5048 = vmatmul.bf16.vlgmr.msra.gmra.mxu3 %v1132_v32 }
 0x1e5   :  { %5092 = vmatpush.bf16.msrb.mxu3 %v7796_v28 }
 0x1e6   :  { %5054 = vmatpush.bf16.msrb.mxu0 %v7771_v33  ;;  %v4828_v53 = vpop.f32.mrf.mxu2  ;;  %v4804_v56 = vpop.f32.mrf.mxu0 }
 0x1e7   :  { %5067 = vmatpush.bf16.msrb.mxu1 %v7779_v34  ;;  %v4829_v54 = vadd.f32 %v4828_v53, %v4816_v48  ;;  %v4841_v55 = vpop.f32.mrf.mxu3  ;;  %v4817_v60 = vpop.f32.mrf.mxu1  ;;  %v7801_v48 = vld [vmem:[%s9476_s3 + $0x20] sm:$0xff]  ;;  %v7798_v53 = vld [vmem:[%s9476_s3 + $0x8] sm:$0xff] }
 0x1e8   :  { %5080 = vmatpush.bf16.msrb.mxu2 %v7787_v35 }
 0x1e9   :  { %5093 = vmatpush.bf16.msrb.mxu3 %v7795_v36  ;;  %v4842_v57 = vadd.f32 %v4841_v55, %v4829_v54 }
 0x1ea   :  { %5055 = vmatpush.bf16.msrb.mxu0 %v7770_v37 }
 0x1eb   :  { %5068 = vmatpush.bf16.msrb.mxu1 %v7778_v38 }
 0x1ec   :  { %5081 = vmatpush.bf16.msrb.mxu2 %v7786_v39 }
 0x1ed   :  { %5094 = vmatpush.bf16.msrb.mxu3 %v7794_v40 }
 0x1ee   :  { %5056 = vmatpush.bf16.msrb.mxu0 %v7769_v43  ;;  %v4830_v3 = vpop.f32.mrf.mxu2 }
 0x1ef   :  { %5069 = vmatpush.bf16.msrb.mxu1 %v7777_v44  ;;  %v4843_v4 = vpop.f32.mrf.mxu3  ;;  %v7803_v44 = vld [vmem:[%s9476_s3 + $0x30] sm:$0xff] }
 0x1f0   :  { %5082 = vmatpush.bf16.msrb.mxu2 %v7785_v46 }
 0x1f1   :  { %5095 = vmatpush.bf16.msrb.mxu3 %v7793_v47 }
 0x1f2   :  { %5057 = vmatpush.bf16.msrb.mxu0 %v7768_v49  ;;  %v7800_v49 = vld [vmem:[%s9476_s3 + $0x18] sm:$0xff] }
 0x1f3   :  { %5070 = vmatpush.bf16.msrb.mxu1 %v7776_v50 }
 0x1f4   :  { %5083 = vmatpush.bf16.msrb.mxu2 %v7784_v51  ;;  %v7799_v51 = vld [vmem:[%s9476_s3 + $0x10] sm:$0xff] }
 0x1f5   :  { %5096 = vmatpush.bf16.msrb.mxu3 %v7792_v52 }
 0x1f6   :  { %5058 = vmatpush.bf16.msrb.mxu0 %v7767_v58  ;;  %v7797_v58 = vld [vmem:[%s9476_s3] sm:$0xff] }
 0x1f7   :  { %5071 = vmatpush.bf16.msrb.mxu1 %v7775_v59 }
 0x1f8   :  { %5084 = vmatpush.bf16.msrb.mxu2 %v7783_v61 }
 0x1f9   :  { %5097 = vmatpush.bf16.msrb.mxu3 %v7791_v62 }
 0x1fa   :  { %5059 = vmatpush.bf16.msrb.mxu0 %v7766_v63 }
 0x1fb   :  { %5072 = vmatpush.bf16.msrb.mxu1 %v7774_v0 }
 0x1fc   :  { %5085 = vmatpush.bf16.msrb.mxu2 %v7782_v1 }
 0x1fd   :  { %5098 = vmatpush.bf16.msrb.mxu3 %v7790_v2 }
 0x1fe   :  { %5060 = vmatpush.bf16.msrb.mxu0 %v7765_v5  ;;  %v4854_v13 = vpop.f32.mrf.mxu0 }
 0x1ff   :  { %5073 = vmatpush.bf16.msrb.mxu1 %v7773_v6  ;;  %v4855_v14 = vadd.f32 %v4854_v13, %v4842_v57  ;;  %v4867_v15 = vpop.f32.mrf.mxu1 }
 0x200   :  { %5086 = vmatpush.bf16.msrb.mxu2 %v7781_v7 }
 0x201   :  { %5099 = vmatpush.bf16.msrb.mxu3 %v7789_v8  ;;  %5061 = vmatmul.bf16.vlgmr.msrb.gmra.mxu0 %v1133_v9  ;;  %v4868_v16 = vadd.f32 %v4867_v15, %v4855_v14 }
 0x202   :  { %5074 = vmatmul.bf16.vlgmr.msrb.gmra.mxu1 %v1134_v10  ;;  %5175 = vmatpush.bf16.msra.mxu0 %v7804_v41 }
 0x203   :  { %5087 = vmatmul.bf16.vlgmr.msrb.gmra.mxu2 %v1135_v11 }
 0x204   :  { %5100 = vmatmul.bf16.vlgmr.msrb.gmra.mxu3 %v1136_v12 }
 0x206   :  { %v4880_v17 = vpop.f32.mrf.mxu2  ;;  %v4856_v20 = vpop.f32.mrf.mxu0  ;;  %5176 = vmatpush.bf16.msra.mxu0 %v7803_v44 }
 0x207   :  { %v4881_v18 = vadd.f32 %v4880_v17, %v4868_v16  ;;  %v4893_v19 = vpop.f32.mrf.mxu3  ;;  %v4869_v22 = vpop.f32.mrf.mxu1 }
 0x209   :  { %v4894_v21 = vadd.f32 %v4893_v19, %v4881_v18  ;;  %v7807_v19 = vld [vmem:[%s9477_s4] ss:$0 sm:$0xff] }
 0x20a   :  { %5177 = vmatpush.bf16.msra.mxu0 %v7802_v45 }
 0x20e   :  { %v4882_v23 = vpop.f32.mrf.mxu2  ;;  %5178 = vmatpush.bf16.msra.mxu0 %v7801_v48 }
 0x20f   :  { %v4895_v24 = vpop.f32.mrf.mxu3 }
 0x212   :  { %5179 = vmatpush.bf16.msra.mxu0 %v7800_v49 }
 0x216   :  { %5180 = vmatpush.bf16.msra.mxu0 %v7799_v51 }
 0x21a   :  { %5181 = vmatpush.bf16.msra.mxu0 %v7798_v53 }
 0x21e   :  { %v4906_v25 = vpop.f32.mrf.mxu0  ;;  %5182 = vmatpush.bf16.msra.mxu0 %v7797_v58 }
 0x21f   :  { %v4907_v26 = vadd.f32 %v4906_v25, %v4894_v21  ;;  %v4919_v27 = vpop.f32.mrf.mxu1 }
 0x221   :  { %v4920_v28 = vadd.f32 %v4919_v27, %v4907_v26 }
 0x226   :  { %v4932_v29 = vpop.f32.mrf.mxu2  ;;  %v4908_v32 = vpop.f32.mrf.mxu0 }
 0x227   :  { %v4933_v30 = vadd.f32 %v4932_v29, %v4920_v28  ;;  %v4945_v31 = vpop.f32.mrf.mxu3  ;;  %v4921_v34 = vpop.f32.mrf.mxu1 }
 0x229   :  { %v4946_v33 = vadd.f32 %v4945_v31, %v4933_v30 }
 0x22e   :  { %v4934_v35 = vpop.f32.mrf.mxu2 }
 0x22f   :  { %v4947_v36 = vpop.f32.mrf.mxu3 }
 0x23e   :  { %v4958_v37 = vpop.f32.mrf.mxu0 }
 0x23f   :  { %v4971_v38 = vpop.f32.mrf.mxu1  ;;  %v4959_v55 = vadd.f32 %v4958_v37, %v4946_v33 }
 0x241   :  { %v4972_v60 = vadd.f32 %v4971_v38, %v4959_v55 }
 0x246   :  { %v4984_v39 = vpop.f32.mrf.mxu2  ;;  %v4960_v42 = vpop.f32.mrf.mxu0 }
 0x247   :  { %v4997_v40 = vpop.f32.mrf.mxu3  ;;  %v4973_v43 = vpop.f32.mrf.mxu1  ;;  %v4985_v61 = vadd.f32 %v4984_v39, %v4972_v60 }
 0x249   :  { %v4998_v0 = vadd.f32 %v4997_v40, %v4985_v61 }
 0x24e   :  { %v4986_v46 = vpop.f32.mrf.mxu2 }
 0x24f   :  { %v4999_v47 = vpop.f32.mrf.mxu3 }
 0x25e   :  { %v5010_v50 = vpop.f32.mrf.mxu0 }
 0x25f   :  { %v5023_v52 = vpop.f32.mrf.mxu1  ;;  %v5011_v1 = vadd.f32 %v5010_v50, %v4998_v0 }
 0x261   :  { %v5024_v2 = vadd.f32 %v5023_v52, %v5011_v1 }
 0x266   :  { %v5036_v54 = vpop.f32.mrf.mxu2  ;;  %v5012_v57 = vpop.f32.mrf.mxu0 }
 0x267   :  { %v5049_v56 = vpop.f32.mrf.mxu3  ;;  %v5025_v59 = vpop.f32.mrf.mxu1  ;;  %v5037_v3 = vadd.f32 %v5036_v54, %v5024_v2 }
 0x269   :  { %v5050_v4 = vadd.f32 %v5049_v56, %v5037_v3 }
 0x26e   :  { %v5038_v62 = vpop.f32.mrf.mxu2 }
 0x26f   :  { %v5051_v63 = vpop.f32.mrf.mxu3 }
 0x27e   :  { %v5062_v5 = vpop.f32.mrf.mxu0 }
 0x27f   :  { %v5075_v6 = vpop.f32.mrf.mxu1  ;;  %v5063_v7 = vadd.f32 %v5062_v5, %v5050_v4 }
 0x281   :  { %v5076_v8 = vadd.f32 %v5075_v6, %v5063_v7 }
 0x286   :  { %v5088_v9 = vpop.f32.mrf.mxu2  ;;  %v5064_v12 = vpop.f32.mrf.mxu0 }
 0x287   :  { %v5101_v10 = vpop.f32.mrf.mxu3  ;;  %v5089_v11 = vadd.f32 %v5088_v9, %v5076_v8  ;;  %v5077_v13 = vpop.f32.mrf.mxu1 }
 0x289   :  { %v5102_v14 = vadd.f32 %v5101_v10, %v5089_v11 }
 0x28b   :  { %v5105_v15 = vmax.f32 %v5102_v14, 0.0 }
 0x28d   :  { %v5106_v16 = vpack.c.bf16 %v5105_v15, %v5105_v15 }
 0x28e   :  { %v5090_v17 = vpop.f32.mrf.mxu2 }
 0x28f   :  { %v5103_v18 = vpop.f32.mrf.mxu3  ;;  %5183 = vmatmul.bf16.vlgmr.msra.gmra.mxu0 %v5106_v16 }
 0x30c   :  { %v5184_v20 = vpop.f32.mrf.mxu0 }
 0x30d   :  { %v5185_v21 = vadd.f32 %v7807_v19, %v5184_v20 }
 0x30f   :  { %5188 = vst [vmem:[#allocation2] sm:$0x3] %v5185_v21 }
 0x310   :  { %5199 = dma.vmem_to_hbm [thread:$0]  %s5195_s19, 32, %s5197_s22, [#allocation3]  }
 0x314   :  { %v5186_v22 = vpop.f32.mrf.mxu0 }
 0x315   :  { %7832 = dma.done.wait [#allocation3], 32  }
 0x316   :  { %7833 = vsyncadd [#allocation3], 4294967264 }
 0x317   :  { %5204 = vsyncpa [#allocation3], 1 }

</bundles_post_ra>
